<compile_context>
chip_gen: v5e
topology: v5e:2x2
jax: 0.10.0
libtpu: 0.0.40
codegen_flags: <defaults>
</compile_context>

<pallas_src>
import functools

import jax
import jax.numpy as jnp
from jax.experimental import pallas as pl
from jax.experimental.pallas import tpu as pltpu

NUM_CLASSES = 2
IMG_CHANNELS = 3
CIN = IMG_CHANNELS + 1          # 3 image channels + 1 label channel
STAGE0_CH = 512                 # stage_channels[0]
LANE = 128


def _round_up(x, m):
    return ((x + m - 1) // m) * m


def _disc_kernel(img_ref, lab_ref, w1s_ref, b1s_ref, w2s_ref, b2_ref, out_ref,
                 acc_ref, *, inv_p, nb):
    # img_ref : (3, TILE_P)        image pixels of one batch element, channel-major
    # lab_ref : (1, TILE_P)        label-map pixels of the same batch element
    # w1s_ref : (C1, 4*128)        from_rgb weight; column c pre-broadcast to lanes [c*128,(c+1)*128)
    # b1s_ref : (C1, 128)          from_rgb bias, lane-broadcast slab
    # w2s_ref : (C1, 128)          final 1x1 conv weight, lane-broadcast slab
    # b2_ref  : (1,)  SMEM         final bias (already pad-corrected in the wrapper)
    # out_ref : (1, 1, 1)          sigmoid output for this batch element
    # acc_ref : (C1, 128) f32 VMEM running per-channel, per-lane-slot pixel sums
    t = pl.program_id(1)

    @pl.when(t == 0)
    def _():
        acc_ref[...] = jnp.zeros_like(acc_ref)

    # Grid-invariant weight slabs: plain aligned VMEM loads, no per-tile broadcasts.
    wi0 = w1s_ref[:, 0 * LANE:1 * LANE]
    wi1 = w1s_ref[:, 1 * LANE:2 * LANE]
    wi2 = w1s_ref[:, 2 * LANE:3 * LANE]
    wlb = w1s_ref[:, 3 * LANE:4 * LANE]
    b1s = b1s_ref[...]

    # 1x1 conv over 4 input channels == broadcast multiply-adds on the VPU, one
    # 128-lane pixel block at a time; accumulate lane-block partial sums only
    # (no cross-lane reduction in the hot loop).
    acc = acc_ref[...]
    for blk in range(nb):
        lo = blk * LANE
        h = b1s + wlb * lab_ref[:, lo:lo + LANE]
        h = h + wi0 * img_ref[0:1, lo:lo + LANE]
        h = h + wi1 * img_ref[1:2, lo:lo + LANE]
        h = h + wi2 * img_ref[2:3, lo:lo + LANE]
        h = jnp.maximum(h, 0.2 * h)          # LeakyReLU(0.2), 2 VPU ops
        acc = acc + h
    acc_ref[...] = acc

    # The output block index depends only on the batch axis, so it is written back
    # to HBM only when the batch block changes; writing it only in the last pixel
    # tile is therefore correct under Pallas' output-writeback semantics.
    @pl.when(t == pl.num_programs(1) - 1)
    def _():
        # AdaptiveAvgPool2d(1) + final 1x1 conv: single cross-lane/sublane reduce.
        logit = jnp.sum(acc_ref[...] * w2s_ref[...]) * inv_p + b2_ref[0]
        out_ref[...] = jax.nn.sigmoid(logit).reshape(1, 1, 1)


def conditional_progressive_discriminator(img, labels, params, *, tile_cap=4096):
    """img: (B, 3, res, res) float32 NCHW; labels: (B,) int32. Returns (B,) float32."""
    B, _, res, _ = img.shape
    P = res * res
    C1 = STAGE0_CH

    # ---- plain-JAX glue: embedding lookup + nearest-neighbour resize.
    emb = params["label_embed"][labels].reshape(B, 64, 64)
    idx = (jnp.arange(res) * 64) // res          # F.interpolate(mode='nearest')
    label_map = emb[:, idx][:, :, idx]           # (B, res, res)

    # Channel-major lane-dense views (free reshapes of contiguous NCHW); pad the pixel
    # axis with zeros to a multiple of the tile so blocks are always (.,128)-aligned.
    tile_p = min(tile_cap, _round_up(P, LANE))
    Pp = _round_up(P, tile_p)
    n_tiles = Pp // tile_p
    nb = tile_p // LANE

    img_f = img.reshape(B, IMG_CHANNELS, P).astype(jnp.float32)
    lab_f = label_map.reshape(B, 1, P).astype(jnp.float32)
    if Pp != P:
        pad = ((0, 0), (0, 0), (0, Pp - P))
        img_f = jnp.pad(img_f, pad)
        lab_f = jnp.pad(lab_f, pad)

    w1 = params["from_rgb_w"].reshape(C1, CIN).astype(jnp.float32)     # (512, 4)
    b1 = params["from_rgb_b"].reshape(C1).astype(jnp.float32)
    w2 = params["final_w"].reshape(C1).astype(jnp.float32)
    b2 = params["final_b"].reshape(()).astype(jnp.float32)

    # Pre-broadcast grid-invariant weight columns to 128-lane slabs (tiny: ~1.5 MiB total)
    # so the kernel's hot loop never re-materializes lane broadcasts.
    w1_slab = jnp.broadcast_to(w1[:, :, None], (C1, CIN, LANE)).reshape(C1, CIN * LANE)
    b1_slab = jnp.broadcast_to(b1[:, None], (C1, LANE))
    w2_slab = jnp.broadcast_to(w2[:, None], (C1, LANE))

    # Zero-padded pixels contribute LeakyReLU(b1) to every channel sum; fold the exact
    # correction into the final bias so no masking is needed in the kernel.
    n_pad = Pp - P
    leaky_b1 = jnp.maximum(b1, 0.2 * b1)
    b2_eff = (b2 - n_pad * jnp.sum(leaky_b1 * w2) / P).reshape(1)

    # Right-sized VMEM ask: double-buffered input tiles + resident weight slabs (x2) +
    # accumulator scratch + headroom for elementwise temporaries.
    vmem_bytes = int(
        2 * 2 * (CIN * tile_p * 4)               # img+lab tiles, double-buffered
        + 2 * (C1 * (CIN + 2) * LANE * 4)        # w1/b1/w2 slabs, double-buffered
        + C1 * LANE * 4                          # accumulator scratch
        + (16 << 20))                            # headroom for temporaries

    cost = pl.CostEstimate(
        flops=int(B * Pp * C1 * (2 * CIN + 3) + 2 * B * C1),
        transcendentals=int(B),
        bytes_accessed=int(4 * (B * Pp * CIN + C1 * (CIN + 2) * LANE + B)),
    )

    # TODO(synk): small-resolution path packing several batch elements per grid step
    # (lane-packing for res<=8 with large B) is not implemented; each batch element
    # gets its own grid step.
    kernel = functools.partial(_disc_kernel, inv_p=1.0 / P, nb=nb)
    out = pl.pallas_call(
        kernel,
        out_shape=jax.ShapeDtypeStruct((B, 1, 1), jnp.float32),
        grid=(B, n_tiles),
        in_specs=[
            pl.BlockSpec((None, IMG_CHANNELS, tile_p), lambda b, t: (b, 0, t)),
            pl.BlockSpec((None, 1, tile_p), lambda b, t: (b, 0, t)),
            pl.BlockSpec((C1, CIN * LANE), lambda b, t: (0, 0)),
            pl.BlockSpec((C1, LANE), lambda b, t: (0, 0)),
            pl.BlockSpec((C1, LANE), lambda b, t: (0, 0)),
            pl.BlockSpec(memory_space=pltpu.MemorySpace.SMEM),
        ],
        out_specs=pl.BlockSpec((1, 1, 1), lambda b, t: (b, 0, 0)),
        scratch_shapes=[pltpu.VMEM((C1, LANE), jnp.float32)],
        compiler_params=pltpu.CompilerParams(
            dimension_semantics=("parallel", "arbitrary"),
            vmem_limit_bytes=vmem_bytes,
        ),
        cost_estimate=cost,
    )(img_f, lab_f, w1_slab, b1_slab, w2_slab, b2_eff)
    return out.reshape(-1)                       # == out.view(-1)


def init_params(key):
    # Only stage-0 parameters are needed (current_stage=0, alpha=1.0 path).
    # TODO(synk): alpha<1 fade-in path (old-stage from_rgb + conv/BN block) not exercised
    # at the module's default settings and is not implemented.
    k0, k1, k2, k3 = jax.random.split(key, 4)
    return {
        "label_embed": jax.random.normal(k0, (NUM_CLASSES, 64 * 64), jnp.float32),
        "from_rgb_w": 0.1 * jax.random.normal(k1, (STAGE0_CH, CIN, 1, 1), jnp.float32),
        "from_rgb_b": 0.1 * jax.random.normal(k2, (STAGE0_CH,), jnp.float32),
        "final_w": 0.1 * jax.random.normal(k3, (1, STAGE0_CH, 1, 1), jnp.float32),
        "final_b": jnp.zeros((1,), jnp.float32),
    }


def _reference(img, labels, params):
    # Pure-JAX reference of the same forward for a sanity check.
    B, _, res, _ = img.shape
    emb = params["label_embed"][labels].reshape(B, 64, 64)
    idx = (jnp.arange(res) * 64) // res
    lm = emb[:, idx][:, :, idx]
    x = jnp.concatenate([img, lm[:, None]], axis=1)                     # (B,4,res,res)
    w1 = params["from_rgb_w"].reshape(STAGE0_CH, CIN)
    h = jnp.einsum("bchw,oc->bohw", x, w1) + params["from_rgb_b"][None, :, None, None]
    h = jnp.where(h >= 0, h, 0.2 * h)
    m = h.mean(axis=(2, 3))                                             # (B, C1)
    logit = m @ params["final_w"].reshape(1, STAGE0_CH).T + params["final_b"]
    return jax.nn.sigmoid(logit).reshape(-1)


if __name__ == "__main__":
    key = jax.random.PRNGKey(0)
    kp, kx = jax.random.split(key)
    params = init_params(kp)

    B, res = 2, 16
    img = jax.random.normal(kx, (B, IMG_CHANNELS, res, res), jnp.float32)
    labels = jnp.array([0, 1], dtype=jnp.int32)

    out = conditional_progressive_discriminator(img, labels, params)
    out = jax.block_until_ready(out)

    ref = _reference(img, labels, params)
    assert out.shape == (B,)
    assert jnp.allclose(out, ref, atol=1e-5, rtol=1e-5), (out, ref)
    print("KERNEL_OK")
</pallas_src>

<mosaic_0001>
module attributes {stable_mosaic.version = 11 : i64} {
  func.func @_disc_kernel(%arg0: i32, %arg1: i32, %arg2: memref<1x3x256xf32, #tpu.memory_space<vmem>>, %arg3: memref<1x1x256xf32, #tpu.memory_space<vmem>>, %arg4: memref<512x512xf32, #tpu.memory_space<vmem>>, %arg5: memref<512x128xf32, #tpu.memory_space<vmem>>, %arg6: memref<512x128xf32, #tpu.memory_space<vmem>>, %arg7: memref<1xf32, #tpu.memory_space<smem>>, %arg8: memref<1x1x1xf32, #tpu.memory_space<vmem>>, %arg9: memref<512x128xf32, #tpu.memory_space<vmem>>) attributes {dimension_semantics = [#tpu.dimension_semantics<parallel>, #tpu.dimension_semantics<arbitrary>], iteration_bounds = array<i64: 2, 1>, scalar_prefetch = 0 : i64, scratch_operands = 1 : i64, tpu.core_type = #tpu.core_type<tc>, window_params = [{transform_indices = @transform_0, window_bounds = array<i64: 1, 3, 256>}, {transform_indices = @transform_1, window_bounds = array<i64: 1, 1, 256>}, {pipeline_mode = #tpu.pipeline_mode<synchronous>, transform_indices = @transform_2, window_bounds = array<i64: 512, 512>}, {pipeline_mode = #tpu.pipeline_mode<synchronous>, transform_indices = @transform_3, window_bounds = array<i64: 512, 128>}, {pipeline_mode = #tpu.pipeline_mode<synchronous>, transform_indices = @transform_4, window_bounds = array<i64: 512, 128>}, {transform_indices = @transform_5, window_bounds = array<i64: 1>}, {transform_indices = @transform_6, window_bounds = array<i64: 1, 1, 1>}]} {
    %c0_i32 = arith.constant 0 : i32
    %0 = arith.cmpi eq, %arg1, %c0_i32 : i32
    %1 = arith.extui %0 : i1 to i32
    %c0_i32_0 = arith.constant 0 : i32
    %2 = arith.cmpi ne, %1, %c0_i32_0 : i32
    scf.if %2 {
      %cst_36 = arith.constant 0.000000e+00 : f32
      %61 = vector.broadcast %cst_36 : f32 to vector<512x128xf32>
      %c0_37 = arith.constant 0 : index
      %c0_38 = arith.constant 0 : index
      %62 = vector.load %arg9[%c0_37, %c0_38] : memref<512x128xf32, #tpu.memory_space<vmem>>, vector<512x128xf32>
      tpu.vector_store %arg9[%c0_37, %c0_38], %61 {strides = array<i32>} : memref<512x128xf32, #tpu.memory_space<vmem>>, vector<512x128xf32>,
    } else {
    }
    %c0 = arith.constant 0 : index
    %c0_1 = arith.constant 0 : index
    %3 = vector.load %arg4[%c0, %c0_1] : memref<512x512xf32, #tpu.memory_space<vmem>>, vector<512x128xf32>
    %c0_2 = arith.constant 0 : index
    %c128 = arith.constant 128 : index
    %4 = vector.load %arg4[%c0_2, %c128] : memref<512x512xf32, #tpu.memory_space<vmem>>, vector<512x128xf32>
    %c0_3 = arith.constant 0 : index
    %c256 = arith.constant 256 : index
    %5 = vector.load %arg4[%c0_3, %c256] : memref<512x512xf32, #tpu.memory_space<vmem>>, vector<512x128xf32>
    %c0_4 = arith.constant 0 : index
    %c384 = arith.constant 384 : index
    %6 = vector.load %arg4[%c0_4, %c384] : memref<512x512xf32, #tpu.memory_space<vmem>>, vector<512x128xf32>
    %c0_5 = arith.constant 0 : index
    %c0_6 = arith.constant 0 : index
    %7 = vector.load %arg5[%c0_5, %c0_6] : memref<512x128xf32, #tpu.memory_space<vmem>>, vector<512x128xf32>
    %c0_7 = arith.constant 0 : index
    %c0_8 = arith.constant 0 : index
    %8 = vector.load %arg9[%c0_7, %c0_8] : memref<512x128xf32, #tpu.memory_space<vmem>>, vector<512x128xf32>
    %c0_9 = arith.constant 0 : index
    %c0_10 = arith.constant 0 : index
    %c0_11 = arith.constant 0 : index
    %9 = vector.load %arg3[%c0_9, %c0_10, %c0_11] : memref<1x1x256xf32, #tpu.memory_space<vmem>>, vector<1x1x128xf32>
    %10 = vector.shape_cast %9 : vector<1x1x128xf32> to vector<1x128xf32>
    %11 = vector.broadcast %10 : vector<1x128xf32> to vector<512x128xf32>
    %12 = arith.mulf %6, %11 : vector<512x128xf32>
    %13 = arith.addf %7, %12 : vector<512x128xf32>
    %c0_12 = arith.constant 0 : index
    %c0_13 = arith.constant 0 : index
    %c0_14 = arith.constant 0 : index
    %14 = vector.load %arg2[%c0_12, %c0_13, %c0_14] : memref<1x3x256xf32, #tpu.memory_space<vmem>>, vector<1x1x128xf32>
    %15 = vector.shape_cast %14 : vector<1x1x128xf32> to vector<1x128xf32>
    %16 = vector.broadcast %15 : vector<1x128xf32> to vector<512x128xf32>
    %17 = arith.mulf %3, %16 : vector<512x128xf32>
    %18 = arith.addf %13, %17 : vector<512x128xf32>
    %c0_15 = arith.constant 0 : index
    %c1 = arith.constant 1 : index
    %c0_16 = arith.constant 0 : index
    %19 = vector.load %arg2[%c0_15, %c1, %c0_16] : memref<1x3x256xf32, #tpu.memory_space<vmem>>, vector<1x1x128xf32>
    %20 = vector.shape_cast %19 : vector<1x1x128xf32> to vector<1x128xf32>
    %21 = vector.broadcast %20 : vector<1x128xf32> to vector<512x128xf32>
    %22 = arith.mulf %4, %21 : vector<512x128xf32>
    %23 = arith.addf %18, %22 : vector<512x128xf32>
    %c0_17 = arith.constant 0 : index
    %c2 = arith.constant 2 : index
    %c0_18 = arith.constant 0 : index
    %24 = vector.load %arg2[%c0_17, %c2, %c0_18] : memref<1x3x256xf32, #tpu.memory_space<vmem>>, vector<1x1x128xf32>
    %25 = vector.shape_cast %24 : vector<1x1x128xf32> to vector<1x128xf32>
    %26 = vector.broadcast %25 : vector<1x128xf32> to vector<512x128xf32>
    %27 = arith.mulf %5, %26 : vector<512x128xf32>
    %28 = arith.addf %23, %27 : vector<512x128xf32>
    %cst = arith.constant 2.000000e-01 : f32
    %29 = vector.broadcast %cst : f32 to vector<512x128xf32>
    %30 = arith.mulf %29, %28 : vector<512x128xf32>
    %31 = arith.maximumf %28, %30 : vector<512x128xf32>
    %32 = arith.addf %8, %31 : vector<512x128xf32>
    %c0_19 = arith.constant 0 : index
    %c0_20 = arith.constant 0 : index
    %c128_21 = arith.constant 128 : index
    %33 = vector.load %arg3[%c0_19, %c0_20, %c128_21] : memref<1x1x256xf32, #tpu.memory_space<vmem>>, vector<1x1x128xf32>
    %34 = vector.shape_cast %33 : vector<1x1x128xf32> to vector<1x128xf32>
    %35 = vector.broadcast %34 : vector<1x128xf32> to vector<512x128xf32>
    %36 = arith.mulf %6, %35 : vector<512x128xf32>
    %37 = arith.addf %7, %36 : vector<512x128xf32>
    %c0_22 = arith.constant 0 : index
    %c0_23 = arith.constant 0 : index
    %c128_24 = arith.constant 128 : index
    %38 = vector.load %arg2[%c0_22, %c0_23, %c128_24] : memref<1x3x256xf32, #tpu.memory_space<vmem>>, vector<1x1x128xf32>
    %39 = vector.shape_cast %38 : vector<1x1x128xf32> to vector<1x128xf32>
    %40 = vector.broadcast %39 : vector<1x128xf32> to vector<512x128xf32>
    %41 = arith.mulf %3, %40 : vector<512x128xf32>
    %42 = arith.addf %37, %41 : vector<512x128xf32>
    %c0_25 = arith.constant 0 : index
    %c1_26 = arith.constant 1 : index
    %c128_27 = arith.constant 128 : index
    %43 = vector.load %arg2[%c0_25, %c1_26, %c128_27] : memref<1x3x256xf32, #tpu.memory_space<vmem>>, vector<1x1x128xf32>
    %44 = vector.shape_cast %43 : vector<1x1x128xf32> to vector<1x128xf32>
    %45 = vector.broadcast %44 : vector<1x128xf32> to vector<512x128xf32>
    %46 = arith.mulf %4, %45 : vector<512x128xf32>
    %47 = arith.addf %42, %46 : vector<512x128xf32>
    %c0_28 = arith.constant 0 : index
    %c2_29 = arith.constant 2 : index
    %c128_30 = arith.constant 128 : index
    %48 = vector.load %arg2[%c0_28, %c2_29, %c128_30] : memref<1x3x256xf32, #tpu.memory_space<vmem>>, vector<1x1x128xf32>
    %49 = vector.shape_cast %48 : vector<1x1x128xf32> to vector<1x128xf32>
    %50 = vector.broadcast %49 : vector<1x128xf32> to vector<512x128xf32>
    %51 = arith.mulf %5, %50 : vector<512x128xf32>
    %52 = arith.addf %47, %51 : vector<512x128xf32>
    %cst_31 = arith.constant 2.000000e-01 : f32
    %53 = vector.broadcast %cst_31 : f32 to vector<512x128xf32>
    %54 = arith.mulf %53, %52 : vector<512x128xf32>
    %55 = arith.maximumf %52, %54 : vector<512x128xf32>
    %56 = arith.addf %32, %55 : vector<512x128xf32>
    %c0_32 = arith.constant 0 : index
    %c0_33 = arith.constant 0 : index
    %57 = vector.load %arg9[%c0_32, %c0_33] : memref<512x128xf32, #tpu.memory_space<vmem>>, vector<512x128xf32>
    tpu.vector_store %arg9[%c0_32, %c0_33], %56 {strides = array<i32>} : memref<512x128xf32, #tpu.memory_space<vmem>>, vector<512x128xf32>,
    %c0_i32_34 = arith.constant 0 : i32
    %58 = arith.cmpi eq, %arg1, %c0_i32_34 : i32
    %59 = arith.extui %58 : i1 to i32
    %c0_i32_35 = arith.constant 0 : i32
    %60 = arith.cmpi ne, %59, %c0_i32_35 : i32
    scf.if %60 {
      %c0_36 = arith.constant 0 : index
      %c0_37 = arith.constant 0 : index
      %61 = vector.load %arg9[%c0_36, %c0_37] : memref<512x128xf32, #tpu.memory_space<vmem>>, vector<512x128xf32>
      %c0_38 = arith.constant 0 : index
      %c0_39 = arith.constant 0 : index
      %62 = vector.load %arg6[%c0_38, %c0_39] : memref<512x128xf32, #tpu.memory_space<vmem>>, vector<512x128xf32>
      %63 = arith.mulf %61, %62 : vector<512x128xf32>
      %64 = vector.shape_cast %63 : vector<512x128xf32> to vector<1x512x128xf32>
      %cst_40 = arith.constant dense<0.000000e+00> : vector<1xf32>
      %65 = vector.multi_reduction <add>, %64, %cst_40 [1, 2] : vector<1x512x128xf32> to vector<1xf32>
      %66 = vector.shape_cast %65 : vector<1xf32> to vector<1x1x1xf32>
      %67 = vector.extract %66[0, 0, 0] : f32 from vector<1x1x1xf32>
      %cst_41 = arith.constant 3.906250e-03 : f32
      %68 = arith.mulf %67, %cst_41 : f32
      %c0_42 = arith.constant 0 : index
      %69 = memref.load %arg7[%c0_42] : memref<1xf32, #tpu.memory_space<smem>>
      %70 = arith.addf %68, %69 : f32
      %71 = arith.negf %70 : f32
      %72 = math.exp %71 : f32
      %cst_43 = arith.constant 1.000000e+00 : f32
      %73 = arith.addf %cst_43, %72 : f32
      %74 = arith.divf %cst_43, %73 : f32
      %75 = vector.broadcast %74 : f32 to vector<1x1x1xf32>
      %c0_44 = arith.constant 0 : index
      %c0_45 = arith.constant 0 : index
      %c0_46 = arith.constant 0 : index
      %76 = vector.load %arg8[%c0_44, %c0_45, %c0_46] : memref<1x1x1xf32, #tpu.memory_space<vmem>>, vector<1x1x1xf32>
      tpu.vector_store %arg8[%c0_44, %c0_45, %c0_46], %75 {strides = array<i32>} : memref<1x1x1xf32, #tpu.memory_space<vmem>>, vector<1x1x1xf32>,
    } else {
    }
    return
  }
  func.func @transform_0(%arg0: i32, %arg1: i32) -> (i32, i32, i32) {
    %c0_i32 = arith.constant 0 : i32
    %c0_i32_0 = arith.constant 0 : i32
    return %arg0, %c0_i32, %arg1 : i32, i32, i32
  }
  func.func @transform_1(%arg0: i32, %arg1: i32) -> (i32, i32, i32) {
    %c0_i32 = arith.constant 0 : i32
    %c0_i32_0 = arith.constant 0 : i32
    return %arg0, %c0_i32, %arg1 : i32, i32, i32
  }
  func.func @transform_2(%arg0: i32, %arg1: i32) -> (i32, i32) {
    %c0_i32 = arith.constant 0 : i32
    %c0_i32_0 = arith.constant 0 : i32
    %c0_i32_1 = arith.constant 0 : i32
    return %c0_i32, %c0_i32_0 : i32, i32
  }
  func.func @transform_3(%arg0: i32, %arg1: i32) -> (i32, i32) {
    %c0_i32 = arith.constant 0 : i32
    %c0_i32_0 = arith.constant 0 : i32
    %c0_i32_1 = arith.constant 0 : i32
    return %c0_i32, %c0_i32_0 : i32, i32
  }
  func.func @transform_4(%arg0: i32, %arg1: i32) -> (i32, i32) {
    %c0_i32 = arith.constant 0 : i32
    %c0_i32_0 = arith.constant 0 : i32
    %c0_i32_1 = arith.constant 0 : i32
    return %c0_i32, %c0_i32_0 : i32, i32
  }
  func.func @transform_5(%arg0: i32, %arg1: i32) -> i32 {
    %c0_i32 = arith.constant 0 : i32
    %c0_i32_0 = arith.constant 0 : i32
    return %c0_i32 : i32
  }
  func.func @transform_6(%arg0: i32, %arg1: i32) -> (i32, i32, i32) {
    %c0_i32 = arith.constant 0 : i32
    %c0_i32_0 = arith.constant 0 : i32
    %c0_i32_1 = arith.constant 0 : i32
    return %arg0, %c0_i32, %c0_i32_0 : i32, i32, i32
  }
}

</mosaic_0001>

<bundles_post_ra>
// kernel: tpu_custom_call.1
= control target key start
LH: loop header
LB: loop body
LE: loop exit
PB: predicated region body
PF: predicated region fallthrough
CT: control target
= control target key end

     0   :  { %s6332_s0 = inlined_call_operand.vmem [shape: f32[2,3,256], index: 0, kind: input, shape index: {}]   ;;  %s6333_s1 = inlined_call_operand.vmem [shape: f32[2,1,256], index: 1, kind: input, shape index: {}]   ;;  %s6334_s2 = inlined_call_operand.hbm [shape: f32[512,512], index: 2, kind: input, shape index: {}]   ;;  %s6335_s3 = inlined_call_operand.hbm [shape: f32[512,128], index: 3, kind: input, shape index: {}]   ;;  %s6336_s4 = inlined_call_operand.hbm [shape: f32[512,128], index: 4, kind: input, shape index: {}]   ;;  %s6337_s5 = inlined_call_operand.<no memory space> [shape: f32[1], index: 5, kind: input, shape index: {}]   ;;  %s6338_s6 = inlined_call_operand.vmem [shape: f32[2,1,1], index: 6, kind: output, shape index: {}]  }
   0x1   :  { %11 = sst [smem:[#allocation3]] %s6337_s5 }
   0x2   :  { %12 = vsyncpa [#allocation5], 0 }
   0x3   :  { %13 = vsyncpa [#allocation7], 0  ;;  %s3288_s23 = smov 0   ;;  %s3290_s24 = smov 0  }
   0x4   :  { %s3292_s25 = smov 0  }
   0x5 LB: > { %s227_s27 = sshll.u32 %s6335_s3, 4  ;;  %s2707_s28 = sadd.s32 4294967295, %s3241_s25   ;;  %s3241_s25 = sphi %s3292_s25, %s19_s25   ;;  %s3237_s24 = sphi %s3290_s24, %s7448_s24   ;;  %s3233_s23 = sphi %s3288_s23, %s7447_s23   ;;  %s228_s27 = int_to_ptr.hbm [resolvable:$true] %s227_s27 }
   0x6   : > { %p2709_p0 = scmp.ge.s32.totalorder %s3241_s25, 1  ;;  %p202_p1 = scmp.lt.s32.totalorder %s3241_s25, 3 }
   0x7   : > { %p3309_p2 = scmp.eq.s32.totalorder %s2707_s28, 0  ;;  %s3243_s7 = smov [#allocation6]  }
   0x8   : > { %p3313_p3 = pnand %p2709_p0, %p202_p1  ;;  %s229_s8 = sshll.u32 %s3243_s7, 4  ;;  %s230_s8 = int_to_ptr.vmem [resolvable:$true] %s229_s8 }
   0x9   : > { %s31_s10 = sadd.s32 1, %s3237_s24  ;;  %s3244_s11 = smov 128  }
   0xa   : > { %p2742_p4 = pneg %p3313_p3  ;;  %p33_p6 = scmp.ge.s32.totalorder %s31_s10, 2 }
   0xb   : > { %s3245_s12 = smov 8   ;;  %s213_s15 = sshll.u32 %s6334_s2, 4  ;;  %s214_s15 = int_to_ptr.hbm [resolvable:$true] %s213_s15 }
   0xc   : > { %p3321_p5 = pnand %p3309_p2, %p2742_p4  ;;  %s7450_s10 = smov (%p33_p6, %s31_s10), 0 }
   0xd   : > { %s3246_s16 = smov [#allocation4]   ;;  %s241_s20 = sshll.u32 %s6336_s4, 4  ;;  %s242_s20 = int_to_ptr.hbm [resolvable:$true] %s241_s20 }
   0xe   : > { %2748 = dma.hbm_to_vmem [thread:$0]  (!%p3321_p5), %s228_s27, 8192, %s230_s8, [#allocation7], %s3244_s11, %s3244_s11, %s3245_s12  }
   0xf   : > { %s215_s17 = sshll.u32 %s3246_s16, 4  ;;  %s3247_s21 = smov 512   ;;  %s216_s17 = int_to_ptr.vmem [resolvable:$true] %s215_s17 }
  0x10   : > { %s3248_s22 = smov 32   ;;  %s3249_s5 = smov [#allocation8]  }
  0x11   : > { %2745 = dma.hbm_to_vmem [thread:$0]  (!%p3321_p5), %s214_s15, 32768, %s216_s17, [#allocation5], %s3247_s21, %s3247_s21, %s3248_s22  }
  0x12   : > { %s243_s26 = sshll.u32 %s3249_s5, 4  ;;  %287 = sbr.rel (%p3313_p3) target bundleno = 1017 (0x3f9), region = 44  ;;  %s244_s26 = int_to_ptr.vmem [resolvable:$true] %s243_s26 }
  0x13   : > { %2751 = dma.hbm_to_vmem [thread:$0]  (!%p3321_p5), %s242_s20, 8192, %s244_s26, [#allocation7], %s3244_s11, %s3244_s11, %s3245_s12  }
  0x17   : > { %3224 = dma.done.wait (%p3309_p2), [#allocation5], 32768  }
  0x18   : > { %3226 = vsyncadd (%p3309_p2), [#allocation5], 4294934528 }
  0x19   : > { %3228 = dma.done.wait (%p3309_p2), [#allocation7], 16384  }
  0x1a   : > { %3230 = vsyncadd (%p3309_p2), [#allocation7], 4294950912  ;;  %p339_p7 = scmp.lt.s32.totalorder %s3233_s23, 1  ;;  %v653_v0 = vld [vmem:[#allocation4 + $0x438] sm:$0xff]  ;;  %v717_v40 = vld [vmem:[#allocation6 + $0x108] sm:$0xff]  ;;  %s2572_s29 = sld [smem:[#allocation3]] }
  0x1b   : > { %v654_v1 = vld [vmem:[#allocation4 + $0x458] sm:$0xff]  ;;  %v718_v45 = vld [vmem:[#allocation6 + $0x110] sm:$0xff]  ;;  %v720_v47 = vld [vmem:[#allocation6 + $0x120] sm:$0xff]  ;;  %vm2597_vm4 = vcmask 0  }
  0x1c   : > { %s7452_s23 = smov (!%p339_p7, %s3233_s23), 1  ;;  %v655_v2 = vld [vmem:[#allocation4 + $0x478] sm:$0xff]  ;;  %v721_v48 = vld [vmem:[#allocation6 + $0x128] sm:$0xff]  ;;  %v722_v53 = vld [vmem:[#allocation6 + $0x130] sm:$0xff] }
  0x1d   : > { %s2720_s27 = sshll.u32 %s7452_s23, 1  ;;  %s2723_s28 = sshll.u32 %s7452_s23, 3  ;;  %v656_v3 = vld [vmem:[#allocation4 + $0x498] sm:$0xff]  ;;  %v724_v55 = vld [vmem:[#allocation6 + $0x140] sm:$0xff]  ;;  %v725_v60 = vld [vmem:[#allocation6 + $0x148] sm:$0xff] }
  0x1e   : > { %s3359_s8 = scalar_lea.vmem %s6333_s1, %s2720_s27  ;;  %s3364_s12 = scalar_lea.vmem %s6332_s0, %s2723_s28  ;;  %v657_v4 = vld [vmem:[#allocation4 + $0x4b8] sm:$0xff]  ;;  %v726_v61 = vld [vmem:[#allocation6 + $0x150] sm:$0xff] }
  0x1f   : > { %v658_v5 = vld [vmem:[#allocation4 + $0x4d8] sm:$0xff]  ;;  %v3367_v16 = vld [vmem:[%s3359_s8] ss:$0 sm:$0xff]  ;;  %s359_s21 = scalar_lea.vmem %s6338_s6, %s7452_s23 }
  0x20   : > { %v659_v6 = vld [vmem:[#allocation4 + $0x4f8] sm:$0xff]  ;;  %6535 = vst [vmem:[#allocation11_spill] sm:$0xff] %v3367_v16  ;;  %v849_v25 = vmul.f32 %v3367_v16, %v653_v0  ;;  %v850_v26 = vmul.f32 %v3367_v16, %v654_v1  ;;  %v851_v27 = vmul.f32 %v3367_v16, %v655_v2  ;;  %v852_v28 = vmul.f32 %v3367_v16, %v656_v3  ;;  %v728_v3 = vld [vmem:[#allocation6 + $0x160] sm:$0xff] }
  0x21   : > { %v660_v7 = vld [vmem:[#allocation4 + $0x518] sm:$0xff]  ;;  %v853_v33 = vmul.f32 %v3367_v16, %v657_v4  ;;  %v854_v34 = vmul.f32 %v3367_v16, %v658_v5  ;;  %v855_v35 = vmul.f32 %v3367_v16, %v659_v6  ;;  %v729_v4 = vld [vmem:[#allocation6 + $0x168] sm:$0xff]  ;;  %v730_v5 = vld [vmem:[#allocation6 + $0x170] sm:$0xff] }
  0x22   : > { %v661_v8 = vld [vmem:[#allocation4 + $0x538] sm:$0xff]  ;;  %v856_v36 = vmul.f32 %v3367_v16, %v660_v7 }
  0x23   : > { %v662_v9 = vld [vmem:[#allocation4 + $0x558] sm:$0xff]  ;;  %v857_v41 = vmul.f32 %v3367_v16, %v661_v8 }
  0x24   : > { %v663_v10 = vld [vmem:[#allocation4 + $0x578] sm:$0xff]  ;;  %v858_v42 = vmul.f32 %v3367_v16, %v662_v9 }
  0x25   : > { %v664_v11 = vld [vmem:[#allocation4 + $0x598] sm:$0xff]  ;;  %v859_v43 = vmul.f32 %v3367_v16, %v663_v10 }
  0x26   : > { %v665_v12 = vld [vmem:[#allocation4 + $0x5b8] sm:$0xff]  ;;  %v860_v44 = vmul.f32 %v3367_v16, %v664_v11  ;;  %v732_v11 = vld [vmem:[#allocation6 + $0x180] sm:$0xff] }
  0x27   : > { %v666_v13 = vld [vmem:[#allocation4 + $0x5d8] sm:$0xff]  ;;  %v861_v49 = vmul.f32 %v3367_v16, %v665_v12  ;;  %v733_v12 = vld [vmem:[#allocation6 + $0x188] sm:$0xff] }
  0x28   : > { %v667_v14 = vld [vmem:[#allocation4 + $0x5f8] sm:$0xff]  ;;  %v862_v50 = vmul.f32 %v3367_v16, %v666_v13 }
  0x29   : > { %v668_v15 = vld [vmem:[#allocation4 + $0x618] sm:$0xff]  ;;  %v863_v51 = vmul.f32 %v3367_v16, %v667_v14 }
  0x2a   : > { %v669_v17 = vld [vmem:[#allocation4 + $0x638] sm:$0xff]  ;;  %v864_v52 = vmul.f32 %v3367_v16, %v668_v15 }
  0x2b   : > { %v670_v18 = vld [vmem:[#allocation4 + $0x658] sm:$0xff]  ;;  %v865_v56 = vmul.f32 %v3367_v16, %v669_v17  ;;  %v3422_v17 = vadd.f32 %v849_v25, %v717_v40  ;;  %v3436_v25 = vadd.f32 %v856_v36, %v724_v55  ;;  %v740_v40 = vld [vmem:[#allocation6 + $0x1c0] sm:$0xff]  ;;  %v3448_v55 = vadd.f32 %v862_v50, %v730_v5 }
  0x2c   : > { %v671_v19 = vld [vmem:[#allocation4 + $0x678] sm:$0xff]  ;;  %v3387_v57 = vmul.f32 %v3367_v16, %v670_v18  ;;  %v734_v18 = vld [vmem:[#allocation6 + $0x190] sm:$0xff]  ;;  %v466_v36 = vld [vmem:[#allocation4 + $0x4c0] sm:$0xff] }
  0x2d   : > { %v672_v20 = vld [vmem:[#allocation4 + $0x698] sm:$0xff]  ;;  %v3390_v58 = vmul.f32 %v3367_v16, %v671_v19 }
  0x2e   : > { %v673_v21 = vld [vmem:[#allocation4 + $0x6b8] sm:$0xff]  ;;  %v3393_v59 = vmul.f32 %v3367_v16, %v672_v20  ;;  %v736_v20 = vld [vmem:[#allocation6 + $0x1a0] sm:$0xff] }
  0x2f   : > { %v674_v22 = vld [vmem:[#allocation4 + $0x6d8] sm:$0xff]  ;;  %v869_v63 = vmul.f32 %v3367_v16, %v673_v21  ;;  %v3424_v21 = vadd.f32 %v850_v26, %v718_v45  ;;  %v462_v26 = vld [vmem:[#allocation4 + $0x440] sm:$0xff]  ;;  %v742_v45 = vld [vmem:[#allocation6 + $0x1d0] sm:$0xff] }
  0x30   : > { %v675_v23 = vld [vmem:[#allocation4 + $0x6f8] sm:$0xff]  ;;  %v3397_v0 = vmul.f32 %v3367_v16, %v674_v22  ;;  %v3463_v50 = vadd.f32 %v3393_v59, %v736_v20  ;;  %v474_v59 = vld [vmem:[#allocation4 + $0x5c0] sm:$0xff] }
  0x31   : > { %v676_v24 = vld [vmem:[#allocation4 + $0x718] sm:$0xff]  ;;  %v3400_v1 = vmul.f32 %v3367_v16, %v675_v23  ;;  %v3428_v23 = vadd.f32 %v852_v28, %v720_v47  ;;  %v3440_v28 = vadd.f32 %v858_v42, %v726_v61  ;;  %v3446_v47 = vadd.f32 %v861_v49, %v729_v4  ;;  %v469_v49 = vld [vmem:[#allocation4 + $0x520] sm:$0xff] }
  0x32   : > { %v677_v29 = vld [vmem:[#allocation4 + $0x738] sm:$0xff]  ;;  %v3403_v2 = vmul.f32 %v3367_v16, %v676_v24  ;;  %v3430_v24 = vadd.f32 %v853_v33, %v721_v48  ;;  %v465_v48 = vld [vmem:[#allocation4 + $0x4a0] sm:$0xff]  ;;  %v3454_v42 = vadd.f32 %v865_v56, %v733_v12  ;;  %v3457_v4 = vadd.f32 %v3387_v57, %v734_v18 }
  0x33   : > { %v678_v30 = vld [vmem:[#allocation4 + $0x758] sm:$0xff]  ;;  %v873_v6 = vmul.f32 %v3367_v16, %v677_v29  ;;  %v737_v29 = vld [vmem:[#allocation6 + $0x1a8] sm:$0xff]  ;;  %6536 = vst [vmem:[#allocation12_spill] sm:$0xff] %v3446_v47  ;;  %v470_v61 = vld [vmem:[#allocation4 + $0x540] sm:$0xff] }
  0x34   : > { %v679_v31 = vld [vmem:[#allocation4 + $0x778] sm:$0xff]  ;;  %v3407_v7 = vmul.f32 %v3367_v16, %v678_v30  ;;  %v738_v30 = vld [vmem:[#allocation6 + $0x1b0] sm:$0xff]  ;;  %v472_v56 = vld [vmem:[#allocation4 + $0x580] sm:$0xff] }
  0x35   : > { %v680_v32 = vld [vmem:[#allocation4 + $0x798] sm:$0xff]  ;;  %v3410_v8 = vmul.f32 %v3367_v16, %v679_v31  ;;  %v3468_v5 = vadd.f32 %v3397_v0, %v738_v30  ;;  %v473_v12 = vld [vmem:[#allocation4 + $0x5a0] sm:$0xff] }
  0x36   : > { %v681_v37 = vld [vmem:[#allocation4 + $0x7b8] sm:$0xff]  ;;  %v3413_v9 = vmul.f32 %v3367_v16, %v680_v32  ;;  %v3432_v32 = vadd.f32 %v854_v34, %v722_v53  ;;  %v463_v34 = vld [vmem:[#allocation4 + $0x460] sm:$0xff] }
  0x37   : > { %v682_v38 = vld [vmem:[#allocation4 + $0x7d8] sm:$0xff]  ;;  %v877_v13 = vmul.f32 %v3367_v16, %v681_v37  ;;  %v475_v18 = vld [vmem:[#allocation4 + $0x5e0] sm:$0xff] }
  0x38   : > { %v683_v39 = vld [vmem:[#allocation4 + $0x7f8] sm:$0xff]  ;;  %v3417_v14 = vmul.f32 %v3367_v16, %v682_v38  ;;  %v3438_v38 = vadd.f32 %v857_v41, %v725_v60  ;;  %v744_v41 = vld [vmem:[#allocation6 + $0x1e0] sm:$0xff] }
  0x39   : > { %v719_v46 = vld [vmem:[#allocation6 + $0x118] sm:$0xff]  ;;  %v3420_v15 = vmul.f32 %v3367_v16, %v683_v39  ;;  %v461_v39 = vld [vmem:[#allocation4 + $0x420] sm:$0xff]  ;;  %v3452_v16 = vadd.f32 %v864_v52, %v732_v11  ;;  %v3474_v11 = vadd.f32 %v3403_v2, %v740_v40  ;;  %v3488_v0 = vadd.f32 %v3413_v9, %v744_v41 }
  0x3a   : > { %v723_v54 = vld [vmem:[#allocation6 + $0x138] sm:$0xff]  ;;  %v3426_v22 = vadd.f32 %v851_v27, %v719_v46  ;;  %v741_v27 = vld [vmem:[#allocation6 + $0x1c8] sm:$0xff]  ;;  %v3444_v46 = vadd.f32 %v860_v44, %v728_v3  ;;  %v468_v44 = vld [vmem:[#allocation4 + $0x500] sm:$0xff] }
  0x3b   : > { %v727_v62 = vld [vmem:[#allocation6 + $0x158] sm:$0xff]  ;;  %v3434_v37 = vadd.f32 %v855_v35, %v723_v54  ;;  %v464_v35 = vld [vmem:[#allocation4 + $0x480] sm:$0xff]  ;;  %v745_v54 = vld [vmem:[#allocation6 + $0x1e8] sm:$0xff]  ;;  %6537 = vst [vmem:[#allocation13_spill] sm:$0xff] %v3474_v11  ;;  %v3476_v57 = vadd.f32 %v873_v6, %v741_v27 }
  0x3c   : > { %v731_v10 = vld [vmem:[#allocation6 + $0x178] sm:$0xff]  ;;  %v3442_v33 = vadd.f32 %v859_v43, %v727_v62  ;;  %v467_v43 = vld [vmem:[#allocation4 + $0x4e0] sm:$0xff]  ;;  %v746_v62 = vld [vmem:[#allocation6 + $0x1f0] sm:$0xff]  ;;  %6542 = vst [vmem:[#allocation18_spill] sm:$0xff] %v3488_v0 }
  0x3d   : > { %v735_v19 = vld [vmem:[#allocation6 + $0x198] sm:$0xff]  ;;  %v3450_v60 = vadd.f32 %v863_v51, %v731_v10  ;;  %v3465_v51 = vadd.f32 %v869_v63, %v737_v29  ;;  %v471_v52 = vld [vmem:[#allocation4 + $0x560] sm:$0xff]  ;;  %6538 = vst [vmem:[#allocation14_spill] sm:$0xff] %v3476_v57  ;;  %v3482_v63 = vadd.f32 %v3407_v7, %v742_v45  ;;  %v3493_v29 = vadd.f32 %v3417_v14, %v746_v62 }
  0x3e   : > { %v739_v31 = vld [vmem:[#allocation6 + $0x1b8] sm:$0xff]  ;;  %v3460_v47 = vadd.f32 %v3390_v58, %v735_v19  ;;  %v3479_v58 = vld [vmem:[%s3364_s12] ss:$0 sm:$0xff] }
  0x3f   : > { %v743_v53 = vld [vmem:[#allocation6 + $0x1d8] sm:$0xff]  ;;  %v3471_v10 = vadd.f32 %v3400_v1, %v739_v31  ;;  %6539 = vst [vmem:[#allocation15_spill] sm:$0xff] %v3479_v58  ;;  %v3490_v1 = vadd.f32 %v877_v13, %v745_v54  ;;  %v476_v2 = vld [vmem:[#allocation4 + $0x600] sm:$0xff]  ;;  %v979_v7 = vmul.f32 %v3479_v58, %v461_v39  ;;  %v980_v31 = vmul.f32 %v3479_v58, %v462_v26 }
  0x40   : > { %v747_v3 = vld [vmem:[#allocation6 + $0x1f8] sm:$0xff]  ;;  %6540 = vst [vmem:[#allocation16_spill] sm:$0xff] %v3482_v63  ;;  %v3485_v19 = vadd.f32 %v3410_v8, %v743_v53  ;;  %v477_v20 = vld [vmem:[#allocation4 + $0x620] sm:$0xff]  ;;  %v981_v9 = vmul.f32 %v3479_v58, %v463_v34  ;;  %v982_v13 = vmul.f32 %v3479_v58, %v464_v35  ;;  %v983_v45 = vmul.f32 %v3479_v58, %v465_v48 }
  0x41   : > { %6543 = vst [vmem:[#allocation19_spill] sm:$0xff] %v3490_v1  ;;  %v478_v6 = vld [vmem:[#allocation4 + $0x640] sm:$0xff]  ;;  %v3496_v30 = vadd.f32 %v3420_v15, %v747_v3  ;;  %v984_v53 = vmul.f32 %v3479_v58, %v466_v36  ;;  %v985_v15 = vmul.f32 %v3479_v58, %v467_v43  ;;  %v986_v39 = vmul.f32 %v3479_v58, %v468_v44 }
  0x42   : > { %6541 = vst [vmem:[#allocation17_spill] sm:$0xff] %v3485_v19  ;;  %v479_v8 = vld [vmem:[#allocation4 + $0x660] sm:$0xff]  ;;  %v987_v26 = vmul.f32 %v3479_v58, %v469_v49  ;;  %v988_v62 = vmul.f32 %v3479_v58, %v470_v61  ;;  %v989_v35 = vmul.f32 %v3479_v58, %v471_v52  ;;  %v990_v48 = vmul.f32 %v3479_v58, %v472_v56 }
  0x43   : > { %6544 = vst [vmem:[#allocation20_spill] sm:$0xff] %v3493_v29  ;;  %v480_v40 = vld [vmem:[#allocation4 + $0x680] sm:$0xff]  ;;  %v991_v36 = vmul.f32 %v3479_v58, %v473_v12  ;;  %v992_v29 = vmul.f32 %v3479_v58, %v474_v59  ;;  %v993_v44 = vmul.f32 %v3479_v58, %v475_v18  ;;  %v994_v49 = vmul.f32 %v3479_v58, %v476_v2 }
  0x44   : > { %6545 = vst [vmem:[#allocation21_spill] sm:$0xff] %v3496_v30  ;;  %v481_v27 = vld [vmem:[#allocation4 + $0x6a0] sm:$0xff]  ;;  %v995_v61 = vmul.f32 %v3479_v58, %v477_v20  ;;  %v996_v19 = vmul.f32 %v3479_v58, %v478_v6  ;;  %v997_v52 = vmul.f32 %v3479_v58, %v479_v8  ;;  %v998_v56 = vmul.f32 %v3479_v58, %v480_v40 }
  0x45   : > { %v482_v14 = vld [vmem:[#allocation4 + $0x6c0] sm:$0xff]  ;;  %v999_v12 = vmul.f32 %v3479_v58, %v481_v27 }
  0x46   : > { %v483_v41 = vld [vmem:[#allocation4 + $0x6e0] sm:$0xff]  ;;  %v1000_v59 = vmul.f32 %v3479_v58, %v482_v14  ;;  %v3530_v14 = vadd.f32 %v979_v7, %v3422_v17  ;;  %v3551_v17 = vadd.f32 %v986_v39, %v3436_v25  ;;  %v3572_v25 = vadd.f32 %v993_v44, %v3450_v60  ;;  %v525_v39 = vld [vmem:[#allocation4 + $0x428] sm:$0xff] }
  0x47   : > { %v484_v54 = vld [vmem:[#allocation4 + $0x700] sm:$0xff]  ;;  %v1001_v57 = vmul.f32 %v3479_v58, %v483_v41  ;;  %v3533_v41 = vadd.f32 %v980_v31, %v3424_v21  ;;  %v3554_v21 = vadd.f32 %v987_v26, %v3438_v38  ;;  %v3575_v38 = vadd.f32 %v994_v49, %v3452_v16  ;;  %v526_v26 = vld [vmem:[#allocation4 + $0x448] sm:$0xff] }
  0x48   : > { %v485_v3 = vld [vmem:[#allocation4 + $0x720] sm:$0xff]  ;;  %v1002_v11 = vmul.f32 %v3479_v58, %v484_v54  ;;  %v3536_v54 = vadd.f32 %v981_v9, %v3426_v22  ;;  %v3557_v22 = vadd.f32 %v988_v62, %v3440_v28  ;;  %v3578_v28 = vadd.f32 %v995_v61, %v3454_v42  ;;  %v6548_v42 = vld [vmem:[#allocation13_spill] sm:$0xff]  ;;  %v527_v62 = vld [vmem:[#allocation4 + $0x468] sm:$0xff] }
  0x49   : > { %v486_v30 = vld [vmem:[#allocation4 + $0x740] sm:$0xff]  ;;  %v1003_v18 = vmul.f32 %v3479_v58, %v485_v3  ;;  %v3587_v31 = vadd.f32 %v998_v56, %v3463_v50  ;;  %v3593_v60 = vadd.f32 %v1000_v59, %v3468_v5  ;;  %v3596_v16 = vadd.f32 %v1001_v57, %v3471_v10  ;;  %v6554_v50 = vld [vmem:[#allocation17_spill] sm:$0xff]  ;;  %v528_v3 = vld [vmem:[#allocation4 + $0x488] sm:$0xff] }
  0x4a   : > { %v487_v34 = vld [vmem:[#allocation4 + $0x760] sm:$0xff]  ;;  %v1004_v2 = vmul.f32 %v3479_v58, %v486_v30  ;;  %v3539_v30 = vadd.f32 %v982_v13, %v3428_v23  ;;  %v3560_v23 = vadd.f32 %v989_v35, %v3442_v33  ;;  %v3581_v33 = vadd.f32 %v996_v19, %v3457_v4  ;;  %v6550_v4 = vld [vmem:[#allocation14_spill] sm:$0xff]  ;;  %v6560_v10 = vld [vmem:[#allocation20_spill] sm:$0xff] }
  0x4b   : > { %v488_v1 = vld [vmem:[#allocation4 + $0x780] sm:$0xff]  ;;  %v1005_v20 = vmul.f32 %v3479_v58, %v487_v34  ;;  %v3602_v19 = vadd.f32 %v1003_v18, %v6550_v4  ;;  %v529_v34 = vld [vmem:[#allocation4 + $0x4a8] sm:$0xff] }
  0x4c   : > { %v489_v0 = vld [vmem:[#allocation4 + $0x7a0] sm:$0xff]  ;;  %v1006_v6 = vmul.f32 %v3479_v58, %v488_v1  ;;  %v3542_v1 = vadd.f32 %v983_v45, %v3430_v24  ;;  %v3563_v24 = vadd.f32 %v990_v48, %v3444_v46  ;;  %v3584_v46 = vadd.f32 %v997_v52, %v3460_v47  ;;  %v6552_v47 = vld [vmem:[#allocation16_spill] sm:$0xff] }
  0x4d   : > { %v490_v43 = vld [vmem:[#allocation4 + $0x7c0] sm:$0xff]  ;;  %v1007_v8 = vmul.f32 %v3479_v58, %v489_v0  ;;  %v3545_v0 = vadd.f32 %v984_v53, %v3432_v32  ;;  %v6546_v32 = vld [vmem:[#allocation12_spill] sm:$0xff]  ;;  %6551 = vst [vmem:[#allocation14_spill] sm:$0xff] %v3602_v19  ;;  %v3605_v9 = vadd.f32 %v1004_v2, %v6552_v47  ;;  %v3608_v13 = vadd.f32 %v1005_v20, %v6554_v50 }
  0x4e   : > { %v491_v63 = vld [vmem:[#allocation4 + $0x7e0] sm:$0xff]  ;;  %v1008_v40 = vmul.f32 %v3479_v58, %v490_v43  ;;  %v3566_v7 = vadd.f32 %v991_v36, %v6546_v32  ;;  %6547 = vst [vmem:[#allocation12_spill] sm:$0xff] %v3596_v16  ;;  %v530_v35 = vld [vmem:[#allocation4 + $0x4c8] sm:$0xff] }
  0x4f   : > { %v1009_v27 = vmul.f32 %v3479_v58, %v491_v63  ;;  %v3548_v63 = vadd.f32 %v985_v15, %v3434_v37  ;;  %v3569_v37 = vadd.f32 %v992_v29, %v3448_v55  ;;  %v3590_v55 = vadd.f32 %v999_v12, %v3465_v51  ;;  %6553 = vst [vmem:[#allocation16_spill] sm:$0xff] %v3605_v9  ;;  %v6556_v51 = vld [vmem:[#allocation18_spill] sm:$0xff]  ;;  %v6558_v5 = vld [vmem:[#allocation19_spill] sm:$0xff]  ;;  %v531_v48 = vld [vmem:[#allocation4 + $0x4e8] sm:$0xff] }
  0x50   : > { %v3599_v29 = vadd.f32 %v1002_v11, %v6548_v42  ;;  %6555 = vst [vmem:[#allocation17_spill] sm:$0xff] %v3608_v13  ;;  %v3611_v45 = vadd.f32 %v1006_v6, %v6556_v51  ;;  %v3614_v53 = vadd.f32 %v1007_v8, %v6558_v5  ;;  %v3617_v57 = vadd.f32 %v1008_v40, %v6560_v10  ;;  %v6562_v11 = vld [vmem:[#allocation21_spill] sm:$0xff]  ;;  %v532_v36 = vld [vmem:[#allocation4 + $0x508] sm:$0xff]  ;;  %v3623_v52 = vld [vmem:[%s3364_s12 + $0x1] ss:$0 sm:$0xff] }
  0x51   : > { %v3620_v15 = vadd.f32 %v1009_v27, %v6562_v11  ;;  %v533_v43 = vld [vmem:[#allocation4 + $0x528] sm:$0xff]  ;;  %6564 = vst [vmem:[#allocation22_spill] sm:$0xff] %v3623_v52  ;;  %v1109_v6 = vmul.f32 %v3623_v52, %v525_v39  ;;  %v1110_v8 = vmul.f32 %v3623_v52, %v526_v26  ;;  %v1111_v42 = vmul.f32 %v3623_v52, %v527_v62 }
  0x52   : > { %6549 = vst [vmem:[#allocation13_spill] sm:$0xff] %v3599_v29  ;;  %v534_v44 = vld [vmem:[#allocation4 + $0x548] sm:$0xff]  ;;  %v1112_v4 = vmul.f32 %v3623_v52, %v528_v3  ;;  %v1113_v47 = vmul.f32 %v3623_v52, %v529_v34  ;;  %v1114_v50 = vmul.f32 %v3623_v52, %v530_v35  ;;  %v1115_v11 = vmul.f32 %v3623_v52, %v531_v48 }
  0x53   : > { %6557 = vst [vmem:[#allocation18_spill] sm:$0xff] %v3611_v45  ;;  %v535_v49 = vld [vmem:[#allocation4 + $0x568] sm:$0xff]  ;;  %v1116_v39 = vmul.f32 %v3623_v52, %v532_v36  ;;  %v1117_v26 = vmul.f32 %v3623_v52, %v533_v43  ;;  %v1118_v58 = vmul.f32 %v3623_v52, %v534_v44 }
  0x54   : > { %6559 = vst [vmem:[#allocation19_spill] sm:$0xff] %v3614_v53  ;;  %v536_v61 = vld [vmem:[#allocation4 + $0x588] sm:$0xff]  ;;  %v1119_v3 = vmul.f32 %v3623_v52, %v535_v49 }
  0x55   : > { %6561 = vst [vmem:[#allocation20_spill] sm:$0xff] %v3617_v57  ;;  %v537_v56 = vld [vmem:[#allocation4 + $0x5a8] sm:$0xff]  ;;  %v1120_v34 = vmul.f32 %v3623_v52, %v536_v61 }
  0x56   : > { %6563 = vst [vmem:[#allocation21_spill] sm:$0xff] %v3620_v15  ;;  %v538_v12 = vld [vmem:[#allocation4 + $0x5c8] sm:$0xff]  ;;  %v1121_v35 = vmul.f32 %v3623_v52, %v537_v56 }
  0x57   : > { %v539_v59 = vld [vmem:[#allocation4 + $0x5e8] sm:$0xff]  ;;  %v1122_v53 = vmul.f32 %v3623_v52, %v538_v12 }
  0x58   : > { %v540_v18 = vld [vmem:[#allocation4 + $0x608] sm:$0xff]  ;;  %v1123_v36 = vmul.f32 %v3623_v52, %v539_v59 }
  0x59   : > { %v541_v2 = vld [vmem:[#allocation4 + $0x628] sm:$0xff]  ;;  %v1124_v43 = vmul.f32 %v3623_v52, %v540_v18 }
  0x5a   : > { %v542_v20 = vld [vmem:[#allocation4 + $0x648] sm:$0xff]  ;;  %v1125_v44 = vmul.f32 %v3623_v52, %v541_v2 }
  0x5b   : > { %v543_v40 = vld [vmem:[#allocation4 + $0x668] sm:$0xff]  ;;  %v1126_v9 = vmul.f32 %v3623_v52, %v542_v20 }
  0x5c   : > { %v544_v27 = vld [vmem:[#allocation4 + $0x688] sm:$0xff]  ;;  %v1127_v49 = vmul.f32 %v3623_v52, %v543_v40 }
  0x5d   : > { %v545_v32 = vld [vmem:[#allocation4 + $0x6a8] sm:$0xff]  ;;  %v1128_v61 = vmul.f32 %v3623_v52, %v544_v27 }
  0x5e   : > { %v546_v51 = vld [vmem:[#allocation4 + $0x6c8] sm:$0xff]  ;;  %v1129_v56 = vmul.f32 %v3623_v52, %v545_v32 }
  0x5f   : > { %v547_v5 = vld [vmem:[#allocation4 + $0x6e8] sm:$0xff]  ;;  %v1130_v12 = vmul.f32 %v3623_v52, %v546_v51  ;;  %v3657_v51 = vadd.f32 %v1109_v6, %v3530_v14  ;;  %v3678_v14 = vadd.f32 %v1116_v39, %v3551_v17  ;;  %v3699_v17 = vadd.f32 %v1123_v36, %v3572_v25  ;;  %v622_v6 = vld [vmem:[#allocation4 + $0x58] sm:$0xff]  ;;  %v6594_v36 = vld [vmem:[#allocation21_spill] sm:$0xff] }
  0x60   : > { %v548_v10 = vld [vmem:[#allocation4 + $0x708] sm:$0xff]  ;;  %v1131_v29 = vmul.f32 %v3623_v52, %v547_v5  ;;  %v3660_v5 = vadd.f32 %v1110_v8, %v3533_v41  ;;  %v3681_v41 = vadd.f32 %v1117_v26, %v3554_v21  ;;  %v3702_v21 = vadd.f32 %v1124_v43, %v3575_v38  ;;  %v625_v8 = vld [vmem:[#allocation4 + $0xb8] sm:$0xff] }
  0x61   : > { %v549_v15 = vld [vmem:[#allocation4 + $0x728] sm:$0xff]  ;;  %v1132_v16 = vmul.f32 %v3623_v52, %v548_v10  ;;  %6570 = vst [vmem:[#allocation28_spill] sm:$0xff] %v3699_v17  ;;  %v3717_v25 = vadd.f32 %v1129_v56, %v3590_v55  ;;  %v3720_v38 = vadd.f32 %v1130_v12, %v3593_v60  ;;  %v6586_v55 = vld [vmem:[#allocation17_spill] sm:$0xff]  ;;  %v627_v60 = vld [vmem:[#allocation4 + $0xf8] sm:$0xff] }
  0x62   : > { %v550_v57 = vld [vmem:[#allocation4 + $0x748] sm:$0xff]  ;;  %v1133_v59 = vmul.f32 %v3623_v52, %v549_v15  ;;  %v3663_v15 = vadd.f32 %v1111_v42, %v3536_v54  ;;  %v3684_v54 = vadd.f32 %v1118_v58, %v3557_v22  ;;  %6571 = vst [vmem:[#allocation29_spill] sm:$0xff] %v3702_v21  ;;  %v3705_v58 = vadd.f32 %v1125_v44, %v3578_v28  ;;  %v6580_v42 = vld [vmem:[#allocation13_spill] sm:$0xff]  ;;  %v628_v39 = vld [vmem:[#allocation4 + $0x118] sm:$0xff] }
  0x63   : > { %v551_v62 = vld [vmem:[#allocation4 + $0x768] sm:$0xff]  ;;  %v1134_v18 = vmul.f32 %v3623_v52, %v550_v57  ;;  %v3666_v57 = vadd.f32 %v1112_v4, %v3539_v30  ;;  %v3687_v30 = vadd.f32 %v1119_v3, %v3560_v23  ;;  %v3708_v22 = vadd.f32 %v1126_v9, %v3581_v33  ;;  %6576 = vst [vmem:[#allocation34_spill] sm:$0xff] %v3717_v25  ;;  %v623_v33 = vld [vmem:[#allocation4 + $0x78] sm:$0xff] }
  0x64   : > { %v552_v45 = vld [vmem:[#allocation4 + $0x788] sm:$0xff]  ;;  %v1135_v2 = vmul.f32 %v3623_v52, %v551_v62  ;;  %6565 = vst [vmem:[#allocation23_spill] sm:$0xff] %v3684_v54  ;;  %v3711_v23 = vadd.f32 %v1127_v49, %v3584_v46  ;;  %v624_v9 = vld [vmem:[#allocation4 + $0x98] sm:$0xff]  ;;  %v3726_v4 = vadd.f32 %v1132_v16, %v6580_v42 }
  0x65   : > { %v553_v13 = vld [vmem:[#allocation4 + $0x7a8] sm:$0xff]  ;;  %v1136_v20 = vmul.f32 %v3623_v52, %v552_v45  ;;  %v3669_v45 = vadd.f32 %v1113_v47, %v3542_v1  ;;  %6566 = vst [vmem:[#allocation24_spill] sm:$0xff] %v3687_v30  ;;  %v3690_v1 = vadd.f32 %v1120_v34, %v3563_v24  ;;  %v620_v24 = vld [vmem:[#allocation4 + $0x18] sm:$0xff]  ;;  %v6590_v34 = vld [vmem:[#allocation19_spill] sm:$0xff] }
  0x66   : > { %v554_v48 = vld [vmem:[#allocation4 + $0x7c8] sm:$0xff]  ;;  %v1137_v40 = vmul.f32 %v3623_v52, %v553_v13  ;;  %v3672_v13 = vadd.f32 %v1114_v50, %v3545_v0  ;;  %v3693_v0 = vadd.f32 %v1121_v35, %v3566_v7  ;;  %6572 = vst [vmem:[#allocation30_spill] sm:$0xff] %v3705_v58  ;;  %v621_v7 = vld [vmem:[#allocation4 + $0x38] sm:$0xff]  ;;  %v692_v58 = vld [vmem:[#allocation6 + $0x40] sm:$0xff] }
  0x67   : > { %v555_v19 = vld [vmem:[#allocation4 + $0x7e8] sm:$0xff]  ;;  %v1138_v27 = vmul.f32 %v3623_v52, %v554_v48  ;;  %6567 = vst [vmem:[#allocation25_spill] sm:$0xff] %v3690_v1  ;;  %v626_v46 = vld [vmem:[#allocation4 + $0xd8] sm:$0xff]  ;;  %v702_v30 = vld [vmem:[#allocation6 + $0x90] sm:$0xff] }
  0x68   : > { %v1139_v32 = vmul.f32 %v3623_v52, %v555_v19  ;;  %v3675_v19 = vadd.f32 %v1115_v11, %v3548_v63  ;;  %6568 = vst [vmem:[#allocation26_spill] sm:$0xff] %v3693_v0  ;;  %v3696_v63 = vadd.f32 %v1122_v53, %v3569_v37  ;;  %v3714_v37 = vadd.f32 %v1128_v61, %v3587_v31  ;;  %v6578_v28 = vld [vmem:[#allocation12_spill] sm:$0xff]  ;;  %v6582_v47 = vld [vmem:[#allocation14_spill] sm:$0xff]  ;;  %v696_v0 = vld [vmem:[#allocation6 + $0x60] sm:$0xff] }
  0x69   : > { %6573 = vst [vmem:[#allocation31_spill] sm:$0xff] %v3708_v22  ;;  %v3723_v53 = vadd.f32 %v1131_v29, %v6578_v28  ;;  %v3729_v50 = vadd.f32 %v1133_v59, %v6582_v47  ;;  %v6584_v31 = vld [vmem:[#allocation16_spill] sm:$0xff]  ;;  %v3735_v11 = vadd.f32 %v1135_v2, %v6586_v55  ;;  %v629_v29 = vld [vmem:[#allocation4 + $0x138] sm:$0xff]  ;;  %v3741_v35 = vadd.f32 %v1137_v40, %v6590_v34  ;;  %v6596_v40 = vld [vmem:[#allocation11_spill] sm:$0xff] }
  0x6a   : > { %6569 = vst [vmem:[#allocation27_spill] sm:$0xff] %v3696_v63  ;;  %v3732_v10 = vadd.f32 %v1134_v18, %v6584_v31  ;;  %v630_v26 = vld [vmem:[#allocation4 + $0x158] sm:$0xff]  ;;  %v6592_v16 = vld [vmem:[#allocation20_spill] sm:$0xff]  ;;  %v3747_v43 = vadd.f32 %v1139_v32, %v6594_v36  ;;  %v816_v31 = vmul.f32 %v6596_v40, %v620_v24  ;;  %v3752_v55 = vmul.f32 %v6596_v40, %v622_v6 }
  0x6b   : > { %6574 = vst [vmem:[#allocation32_spill] sm:$0xff] %v3711_v23  ;;  %v6588_v62 = vld [vmem:[#allocation18_spill] sm:$0xff]  ;;  %v3744_v48 = vadd.f32 %v1138_v27, %v6592_v16  ;;  %v817_v27 = vmul.f32 %v6596_v40, %v621_v7  ;;  %v819_v36 = vmul.f32 %v6596_v40, %v623_v33  ;;  %v820_v52 = vmul.f32 %v6596_v40, %v624_v9  ;;  %v690_v23 = vld [vmem:[#allocation6 + $0x30] sm:$0xff]  ;;  %v693_v21 = vld [vmem:[#allocation6 + $0x48] sm:$0xff] }
  0x6c   : > { %6575 = vst [vmem:[#allocation33_spill] sm:$0xff] %v3714_v37  ;;  %v3738_v3 = vadd.f32 %v1136_v20, %v6588_v62  ;;  %v631_v44 = vld [vmem:[#allocation4 + $0x178] sm:$0xff]  ;;  %v3761_v6 = vmul.f32 %v6596_v40, %v627_v60  ;;  %v3770_v33 = vmul.f32 %v6596_v40, %v630_v26  ;;  %v689_v37 = vld [vmem:[#allocation6 + $0x28] sm:$0xff] }
  0x6d   : > { %6577 = vst [vmem:[#allocation35_spill] sm:$0xff] %v3720_v38  ;;  %v632_v49 = vld [vmem:[#allocation4 + $0x198] sm:$0xff] }
  0x6e   : > { %6579 = vst [vmem:[#allocation12_spill] sm:$0xff] %v3723_v53  ;;  %v633_v61 = vld [vmem:[#allocation4 + $0x1b8] sm:$0xff]  ;;  %v686_v53 = vld [vmem:[#allocation6 + $0x10] sm:$0xff] }
  0x6f   : > { %6581 = vst [vmem:[#allocation13_spill] sm:$0xff] %v3726_v4  ;;  %v634_v56 = vld [vmem:[#allocation4 + $0x1d8] sm:$0xff]  ;;  %v3776_v4 = vmul.f32 %v6596_v40, %v632_v49  ;;  %v3779_v60 = vmul.f32 %v6596_v40, %v633_v61  ;;  %v688_v61 = vld [vmem:[#allocation6 + $0x20] sm:$0xff] }
  0x70   : > { %6583 = vst [vmem:[#allocation14_spill] sm:$0xff] %v3729_v50  ;;  %v635_v12 = vld [vmem:[#allocation4 + $0x1f8] sm:$0xff]  ;;  %v3773_v50 = vmul.f32 %v6596_v40, %v631_v44  ;;  %v3847_v54 = vadd.f32 %v820_v52, %v688_v61 }
  0x71   : > { %6585 = vst [vmem:[#allocation16_spill] sm:$0xff] %v3732_v10  ;;  %v636_v59 = vld [vmem:[#allocation4 + $0x218] sm:$0xff]  ;;  %v3767_v10 = vmul.f32 %v6596_v40, %v629_v29  ;;  %v685_v29 = vld [vmem:[#allocation6 + $0x8] sm:$0xff]  ;;  %v3785_v26 = vmul.f32 %v6596_v40, %v635_v12 }
  0x72   : > { %6587 = vst [vmem:[#allocation17_spill] sm:$0xff] %v3735_v11  ;;  %v637_v18 = vld [vmem:[#allocation4 + $0x238] sm:$0xff]  ;;  %v3764_v11 = vmul.f32 %v6596_v40, %v628_v39  ;;  %v3782_v39 = vmul.f32 %v6596_v40, %v634_v56  ;;  %v3788_v25 = vmul.f32 %v6596_v40, %v636_v59 }
  0x73   : > { %6589 = vst [vmem:[#allocation18_spill] sm:$0xff] %v3738_v3  ;;  %v638_v2 = vld [vmem:[#allocation4 + $0x258] sm:$0xff]  ;;  %v3791_v44 = vmul.f32 %v6596_v40, %v637_v18  ;;  %v3861_v52 = vadd.f32 %v3767_v10, %v693_v21  ;;  %v599_v21 = vld [vmem:[#allocation4 + $0x570] sm:$0xff] }
  0x74   : > { %6591 = vst [vmem:[#allocation19_spill] sm:$0xff] %v3741_v35  ;;  %v639_v28 = vld [vmem:[#allocation4 + $0x278] sm:$0xff]  ;;  %v3794_v49 = vmul.f32 %v6596_v40, %v638_v2  ;;  %v600_v10 = vld [vmem:[#allocation4 + $0x590] sm:$0xff] }
  0x75   : > { %6593 = vst [vmem:[#allocation20_spill] sm:$0xff] %v3744_v48  ;;  %v640_v20 = vld [vmem:[#allocation4 + $0x298] sm:$0xff]  ;;  %v3758_v48 = vmul.f32 %v6596_v40, %v626_v46  ;;  %v684_v46 = vld [vmem:[#allocation6] sm:$0xff]  ;;  %v3797_v56 = vmul.f32 %v6596_v40, %v639_v28 }
  0x76   : > { %6595 = vst [vmem:[#allocation21_spill] sm:$0xff] %v3747_v43  ;;  %v641_v42 = vld [vmem:[#allocation4 + $0x2b8] sm:$0xff]  ;;  %v821_v43 = vmul.f32 %v6596_v40, %v625_v8  ;;  %v3800_v22 = vmul.f32 %v6596_v40, %v640_v20 }
  0x77   : > { %v642_v47 = vld [vmem:[#allocation4 + $0x2d8] sm:$0xff]  ;;  %v3803_v12 = vmul.f32 %v6596_v40, %v641_v42  ;;  %v694_v42 = vld [vmem:[#allocation6 + $0x50] sm:$0xff] }
  0x78   : > { %v643_v32 = vld [vmem:[#allocation4 + $0x2f8] sm:$0xff]  ;;  %v3806_v59 = vmul.f32 %v6596_v40, %v642_v47 }
  0x79   : > { %v644_v62 = vld [vmem:[#allocation4 + $0x318] sm:$0xff]  ;;  %v3809_v2 = vmul.f32 %v6596_v40, %v643_v32 }
  0x7a   : > { %v645_v34 = vld [vmem:[#allocation4 + $0x338] sm:$0xff]  ;;  %v3812_v17 = vmul.f32 %v6596_v40, %v644_v62 }
  0x7b   : > { %v646_v16 = vld [vmem:[#allocation4 + $0x358] sm:$0xff]  ;;  %v3815_v28 = vmul.f32 %v6596_v40, %v645_v34  ;;  %v697_v34 = vld [vmem:[#allocation6 + $0x68] sm:$0xff] }
  0x7c   : > { %v647_v35 = vld [vmem:[#allocation4 + $0x378] sm:$0xff]  ;;  %6597 = vst [vmem:[#allocation11_spill] sm:$0xff] %v3812_v17  ;;  %v3818_v20 = vmul.f32 %v6596_v40, %v646_v16 }
  0x7d   : > { %v648_v24 = vld [vmem:[#allocation4 + $0x398] sm:$0xff]  ;;  %6598 = vst [vmem:[#allocation36_spill] sm:$0xff] %v3815_v28  ;;  %v3821_v47 = vmul.f32 %v6596_v40, %v647_v35  ;;  %v698_v28 = vld [vmem:[#allocation6 + $0x70] sm:$0xff]  ;;  %v3838_v35 = vadd.f32 %v816_v31, %v684_v46 }
  0x7e   : > { %v649_v3 = vld [vmem:[#allocation4 + $0x3b8] sm:$0xff]  ;;  %6599 = vst [vmem:[#allocation37_spill] sm:$0xff] %v3818_v20  ;;  %v3824_v1 = vmul.f32 %v6596_v40, %v648_v24  ;;  %v589_v24 = vld [vmem:[#allocation4 + $0x430] sm:$0xff] }
  0x7f   : > { %v650_v7 = vld [vmem:[#allocation4 + $0x3d8] sm:$0xff]  ;;  %6600 = vst [vmem:[#allocation38_spill] sm:$0xff] %v3821_v47  ;;  %v3827_v32 = vmul.f32 %v6596_v40, %v649_v3  ;;  %v3840_v47 = vadd.f32 %v817_v27, %v685_v29  ;;  %v700_v3 = vld [vmem:[#allocation6 + $0x80] sm:$0xff]  ;;  %v593_v31 = vld [vmem:[#allocation4 + $0x4b0] sm:$0xff] }
  0x80   : > { %v651_v9 = vld [vmem:[#allocation4 + $0x3f8] sm:$0xff]  ;;  %6601 = vst [vmem:[#allocation39_spill] sm:$0xff] %v3824_v1  ;;  %v3830_v62 = vmul.f32 %v6596_v40, %v650_v7  ;;  %v590_v1 = vld [vmem:[#allocation4 + $0x450] sm:$0xff]  ;;  %v3843_v7 = vadd.f32 %v3752_v55, %v686_v53  ;;  %v704_v29 = vld [vmem:[#allocation6 + $0xa0] sm:$0xff] }
  0x81   : > { %v652_v8 = vld [vmem:[#allocation4 + $0x418] sm:$0xff]  ;;  %6602 = vst [vmem:[#allocation40_spill] sm:$0xff] %v3827_v32  ;;  %v3833_v16 = vmul.f32 %v6596_v40, %v651_v9  ;;  %v701_v32 = vld [vmem:[#allocation6 + $0x88] sm:$0xff]  ;;  %v3849_v9 = vadd.f32 %v821_v43, %v689_v37  ;;  %v594_v46 = vld [vmem:[#allocation4 + $0x4d0] sm:$0xff] }
  0x82   : > { %v687_v38 = vld [vmem:[#allocation6 + $0x18] sm:$0xff]  ;;  %6603 = vst [vmem:[#allocation41_spill] sm:$0xff] %v3830_v62  ;;  %v3836_v20 = vmul.f32 %v6596_v40, %v652_v8  ;;  %v591_v40 = vld [vmem:[#allocation4 + $0x470] sm:$0xff] }
  0x83   : > { %v691_v18 = vld [vmem:[#allocation6 + $0x38] sm:$0xff]  ;;  %6605 = vst [vmem:[#allocation43_spill] sm:$0xff] %v3838_v35  ;;  %v3845_v62 = vadd.f32 %v819_v36, %v687_v38  ;;  %v592_v8 = vld [vmem:[#allocation4 + $0x490] sm:$0xff]  ;;  %v3852_v35 = vadd.f32 %v3758_v48, %v690_v23  ;;  %v3858_v38 = vadd.f32 %v3764_v11, %v692_v58  ;;  %v3870_v48 = vadd.f32 %v3776_v4, %v696_v0 }
  0x84   : > { %v695_v63 = vld [vmem:[#allocation6 + $0x58] sm:$0xff]  ;;  %6604 = vst [vmem:[#allocation42_spill] sm:$0xff] %v3836_v20  ;;  %v3855_v20 = vadd.f32 %v3761_v6, %v691_v18  ;;  %v595_v37 = vld [vmem:[#allocation4 + $0x4f0] sm:$0xff]  ;;  %v3873_v58 = vadd.f32 %v3779_v60, %v697_v34  ;;  %v3876_v11 = vadd.f32 %v3782_v39, %v698_v28  ;;  %v3891_v18 = vadd.f32 %v3794_v49, %v702_v30 }
  0x85   : > { %v699_v17 = vld [vmem:[#allocation6 + $0x78] sm:$0xff]  ;;  %6606 = vst [vmem:[#allocation44_spill] sm:$0xff] %v3840_v47  ;;  %v705_v47 = vld [vmem:[#allocation6 + $0xa8] sm:$0xff]  ;;  %v596_v53 = vld [vmem:[#allocation4 + $0x510] sm:$0xff]  ;;  %v3867_v23 = vadd.f32 %v3773_v50, %v695_v63  ;;  %v3885_v63 = vadd.f32 %v3791_v44, %v701_v32 }
  0x86   : > { %6607 = vst [vmem:[#allocation45_spill] sm:$0xff] %v3849_v9  ;;  %v703_v27 = vld [vmem:[#allocation6 + $0x98] sm:$0xff]  ;;  %v597_v43 = vld [vmem:[#allocation4 + $0x530] sm:$0xff]  ;;  %v3864_v9 = vadd.f32 %v3770_v33, %v694_v42  ;;  %v3879_v6 = vadd.f32 %v3785_v26, %v699_v17  ;;  %v3882_v33 = vadd.f32 %v3788_v25, %v700_v3  ;;  %v3888_v50 = vld [vmem:[%s3364_s12 + $0x2] ss:$0 sm:$0xff]  ;;  %v3897_v17 = vadd.f32 %v3800_v22, %v704_v29 }
  0x87   : > { %v598_v55 = vld [vmem:[#allocation4 + $0x550] sm:$0xff]  ;;  %v707_v61 = vld [vmem:[#allocation6 + $0xb8] sm:$0xff]  ;;  %6610 = vst [vmem:[#allocation48_spill] sm:$0xff] %v3885_v63  ;;  %v3894_v39 = vadd.f32 %v3797_v56, %v703_v27  ;;  %v3900_v25 = vadd.f32 %v3803_v12, %v705_v47  ;;  %v1239_v30 = vmul.f32 %v3888_v50, %v589_v24  ;;  %v1240_v49 = vmul.f32 %v3888_v50, %v590_v1 }
  0x88   : > { %v706_v36 = vld [vmem:[#allocation6 + $0xb0] sm:$0xff]  ;;  %6608 = vst [vmem:[#allocation46_spill] sm:$0xff] %v3879_v6  ;;  %v3906_v32 = vadd.f32 %v3809_v2, %v707_v61  ;;  %v1241_v3 = vmul.f32 %v3888_v50, %v591_v40  ;;  %v1242_v12 = vmul.f32 %v3888_v50, %v592_v8  ;;  %v1243_v47 = vmul.f32 %v3888_v50, %v593_v31 }
  0x89   : > { %6609 = vst [vmem:[#allocation47_spill] sm:$0xff] %v3882_v33  ;;  %v601_v0 = vld [vmem:[#allocation4 + $0x5b0] sm:$0xff]  ;;  %v3903_v42 = vadd.f32 %v3806_v59, %v706_v36  ;;  %v1244_v27 = vmul.f32 %v3888_v50, %v594_v46  ;;  %v1245_v2 = vmul.f32 %v3888_v50, %v595_v37  ;;  %v1246_v24 = vmul.f32 %v3888_v50, %v596_v53 }
  0x8a   : > { %6611 = vst [vmem:[#allocation49_spill] sm:$0xff] %v3888_v50  ;;  %v602_v4 = vld [vmem:[#allocation4 + $0x5d0] sm:$0xff]  ;;  %v1247_v1 = vmul.f32 %v3888_v50, %v597_v43  ;;  %v1248_v61 = vmul.f32 %v3888_v50, %v598_v55  ;;  %v1249_v8 = vmul.f32 %v3888_v50, %v599_v21  ;;  %v1250_v31 = vmul.f32 %v3888_v50, %v600_v10 }
  0x8b   : > { %v603_v60 = vld [vmem:[#allocation4 + $0x5f0] sm:$0xff]  ;;  %6612 = vst [vmem:[#allocation50_spill] sm:$0xff] %v3891_v18  ;;  %v1251_v46 = vmul.f32 %v3888_v50, %v601_v0 }
  0x8c   : > { %6613 = vst [vmem:[#allocation51_spill] sm:$0xff] %v3894_v39  ;;  %v604_v26 = vld [vmem:[#allocation4 + $0x610] sm:$0xff]  ;;  %v1253_v53 = vmul.f32 %v3888_v50, %v603_v60 }
  0x8d   : > { %6614 = vst [vmem:[#allocation52_spill] sm:$0xff] %v3897_v17  ;;  %v605_v44 = vld [vmem:[#allocation4 + $0x630] sm:$0xff]  ;;  %v1254_v43 = vmul.f32 %v3888_v50, %v604_v26 }
  0x8e   : > { %6615 = vst [vmem:[#allocation53_spill] sm:$0xff] %v3900_v25  ;;  %v606_v28 = vld [vmem:[#allocation4 + $0x650] sm:$0xff]  ;;  %v1252_v25 = vmul.f32 %v3888_v50, %v602_v4  ;;  %v1255_v55 = vmul.f32 %v3888_v50, %v605_v44 }
  0x8f   : > { %6616 = vst [vmem:[#allocation54_spill] sm:$0xff] %v3903_v42  ;;  %v607_v56 = vld [vmem:[#allocation4 + $0x670] sm:$0xff]  ;;  %v1256_v18 = vmul.f32 %v3888_v50, %v606_v28 }
  0x90   : > { %6617 = vst [vmem:[#allocation55_spill] sm:$0xff] %v3906_v32  ;;  %v608_v34 = vld [vmem:[#allocation4 + $0x690] sm:$0xff]  ;;  %v1257_v21 = vmul.f32 %v3888_v50, %v607_v56 }
  0x91   : > { %v609_v22 = vld [vmem:[#allocation4 + $0x6b0] sm:$0xff]  ;;  %v1258_v10 = vmul.f32 %v3888_v50, %v608_v34 }
  0x92   : > { %v610_v59 = vld [vmem:[#allocation4 + $0x6d0] sm:$0xff]  ;;  %v1259_v0 = vmul.f32 %v3888_v50, %v609_v22 }
  0x93   : > { %v611_v29 = vld [vmem:[#allocation4 + $0x6f0] sm:$0xff]  ;;  %v1260_v4 = vmul.f32 %v3888_v50, %v610_v59  ;;  %v3940_v59 = vadd.f32 %v1239_v30, %v3657_v51  ;;  %v3961_v51 = vadd.f32 %v1246_v24, %v3678_v14  ;;  %v6637_v14 = vld [vmem:[#allocation28_spill] sm:$0xff] }
  0x94   : > { %v612_v36 = vld [vmem:[#allocation4 + $0x710] sm:$0xff]  ;;  %v1261_v33 = vmul.f32 %v3888_v50, %v611_v29  ;;  %v3943_v29 = vadd.f32 %v1240_v49, %v3660_v5  ;;  %v3964_v5 = vadd.f32 %v1247_v1, %v3681_v41  ;;  %v708_v41 = vld [vmem:[#allocation6 + $0xc0] sm:$0xff]  ;;  %v6641_v1 = vld [vmem:[#allocation30_spill] sm:$0xff] }
  0x95   : > { %v613_v32 = vld [vmem:[#allocation4 + $0x730] sm:$0xff]  ;;  %v1262_v6 = vmul.f32 %v3888_v50, %v612_v36  ;;  %6618 = vst [vmem:[#allocation56_spill] sm:$0xff] %v3940_v59  ;;  %v709_v36 = vld [vmem:[#allocation6 + $0xc8] sm:$0xff]  ;;  %v460_v59 = vld [vmem:[#allocation4 + $0x400] sm:$0xff] }
  0x96   : > { %v614_v42 = vld [vmem:[#allocation4 + $0x750] sm:$0xff]  ;;  %v1263_v60 = vmul.f32 %v3888_v50, %v613_v32  ;;  %6619 = vst [vmem:[#allocation57_spill] sm:$0xff] %v3943_v29  ;;  %v3946_v32 = vadd.f32 %v1241_v3, %v3663_v15  ;;  %v6627_v15 = vld [vmem:[#allocation23_spill] sm:$0xff] }
  0x97   : > { %v615_v40 = vld [vmem:[#allocation4 + $0x770] sm:$0xff]  ;;  %v1264_v26 = vmul.f32 %v3888_v50, %v614_v42  ;;  %v3949_v42 = vadd.f32 %v1242_v12, %v3666_v57  ;;  %6625 = vst [vmem:[#allocation63_spill] sm:$0xff] %v3961_v51  ;;  %v3967_v30 = vadd.f32 %v1248_v61, %v6627_v15  ;;  %v6629_v57 = vld [vmem:[#allocation24_spill] sm:$0xff]  ;;  %v3988_v61 = vadd.f32 %v1255_v55, %v6641_v1  ;;  %v430_v15 = vld [vmem:[#allocation4 + $0x40] sm:$0xff] }
  0x98   : > { %v616_v17 = vld [vmem:[#allocation4 + $0x790] sm:$0xff]  ;;  %v1265_v44 = vmul.f32 %v3888_v50, %v615_v40  ;;  %6620 = vst [vmem:[#allocation58_spill] sm:$0xff] %v3946_v32  ;;  %v3970_v49 = vadd.f32 %v1249_v8, %v6629_v57  ;;  %v6643_v40 = vld [vmem:[#allocation31_spill] sm:$0xff] }
  0x99   : > { %v617_v39 = vld [vmem:[#allocation4 + $0x7b0] sm:$0xff]  ;;  %v1266_v28 = vmul.f32 %v3888_v50, %v616_v17  ;;  %6621 = vst [vmem:[#allocation59_spill] sm:$0xff] %v3949_v42  ;;  %v3952_v17 = vadd.f32 %v1243_v47, %v3669_v45  ;;  %v3991_v8 = vadd.f32 %v1256_v18, %v6643_v40  ;;  %v6651_v55 = vld [vmem:[#allocation35_spill] sm:$0xff]  ;;  %v6653_v18 = vld [vmem:[#allocation12_spill] sm:$0xff] }
  0x9a   : > { %v618_v37 = vld [vmem:[#allocation4 + $0x7d0] sm:$0xff]  ;;  %v1267_v56 = vmul.f32 %v3888_v50, %v617_v39  ;;  %v3955_v39 = vadd.f32 %v1244_v27, %v3672_v13  ;;  %6626 = vst [vmem:[#allocation64_spill] sm:$0xff] %v3964_v5  ;;  %v6633_v13 = vld [vmem:[#allocation26_spill] sm:$0xff]  ;;  %v3982_v27 = vadd.f32 %v1253_v53, %v6637_v14  ;;  %v4006_v1 = vadd.f32 %v1261_v33, %v6653_v18  ;;  %v432_v40 = vld [vmem:[#allocation4 + $0x80] sm:$0xff] }
  0x9b   : > { %v619_v63 = vld [vmem:[#allocation4 + $0x7f0] sm:$0xff]  ;;  %v1268_v34 = vmul.f32 %v3888_v50, %v618_v37  ;;  %6622 = vst [vmem:[#allocation60_spill] sm:$0xff] %v3952_v17  ;;  %v3976_v12 = vadd.f32 %v1251_v46, %v6633_v13  ;;  %v428_v37 = vld [vmem:[#allocation4] sm:$0xff]  ;;  %v711_v53 = vld [vmem:[#allocation6 + $0xd8] sm:$0xff] }
  0x9c   : > { %v1269_v22 = vmul.f32 %v3888_v50, %v619_v63  ;;  %6623 = vst [vmem:[#allocation61_spill] sm:$0xff] %v3955_v39  ;;  %v3958_v63 = vadd.f32 %v1245_v2, %v3675_v19  ;;  %v6631_v45 = vld [vmem:[#allocation25_spill] sm:$0xff]  ;;  %v6635_v19 = vld [vmem:[#allocation27_spill] sm:$0xff] }
  0x9d   : > { %6628 = vst [vmem:[#allocation23_spill] sm:$0xff] %v3967_v30  ;;  %v3973_v3 = vadd.f32 %v1250_v31, %v6631_v45  ;;  %v3979_v47 = vadd.f32 %v1252_v25, %v6635_v19  ;;  %v6639_v2 = vld [vmem:[#allocation29_spill] sm:$0xff]  ;;  %v6645_v31 = vld [vmem:[#allocation32_spill] sm:$0xff]  ;;  %v429_v25 = vld [vmem:[#allocation4 + $0x20] sm:$0xff] }
  0x9e   : > { %6624 = vst [vmem:[#allocation62_spill] sm:$0xff] %v3958_v63  ;;  %v3985_v24 = vadd.f32 %v1254_v43, %v6639_v2  ;;  %v3994_v46 = vadd.f32 %v1257_v21, %v6645_v31  ;;  %v710_v57 = vld [vmem:[#allocation6 + $0xd0] sm:$0xff]  ;;  %v712_v45 = vld [vmem:[#allocation6 + $0xe0] sm:$0xff]  ;;  %v6649_v43 = vld [vmem:[#allocation34_spill] sm:$0xff]  ;;  %v4003_v2 = vadd.f32 %v1260_v4, %v6651_v55 }
  0x9f   : > { %6630 = vst [vmem:[#allocation24_spill] sm:$0xff] %v3970_v49  ;;  %v6647_v13 = vld [vmem:[#allocation33_spill] sm:$0xff]  ;;  %v4000_v14 = vadd.f32 %v1259_v0, %v6649_v43  ;;  %v431_v21 = vld [vmem:[#allocation4 + $0x60] sm:$0xff]  ;;  %v6659_v0 = vld [vmem:[#allocation16_spill] sm:$0xff] }
  0xa0   : > { %6632 = vst [vmem:[#allocation25_spill] sm:$0xff] %v3973_v3  ;;  %v3997_v19 = vadd.f32 %v1258_v10, %v6647_v13  ;;  %v433_v31 = vld [vmem:[#allocation4 + $0xa0] sm:$0xff]  ;;  %v6657_v10 = vld [vmem:[#allocation14_spill] sm:$0xff]  ;;  %v4015_v43 = vadd.f32 %v1264_v26, %v6659_v0  ;;  %v6661_v4 = vld [vmem:[#allocation17_spill] sm:$0xff] }
  0xa1   : > { %6634 = vst [vmem:[#allocation26_spill] sm:$0xff] %v3976_v12  ;;  %v4012_v13 = vadd.f32 %v1263_v60, %v6657_v10  ;;  %v4018_v55 = vadd.f32 %v1265_v44, %v6661_v4  ;;  %v435_v33 = vld [vmem:[#allocation4 + $0xe0] sm:$0xff]  ;;  %v6669_v60 = vld [vmem:[#allocation21_spill] sm:$0xff] }
  0xa2   : > { %6636 = vst [vmem:[#allocation27_spill] sm:$0xff] %v3979_v47  ;;  %v436_v18 = vld [vmem:[#allocation4 + $0x100] sm:$0xff]  ;;  %v4030_v10 = vadd.f32 %v1269_v22, %v6669_v60 }
  0xa3   : > { %6638 = vst [vmem:[#allocation28_spill] sm:$0xff] %v3982_v27  ;;  %v6655_v27 = vld [vmem:[#allocation13_spill] sm:$0xff]  ;;  %v6665_v12 = vld [vmem:[#allocation19_spill] sm:$0xff] }
  0xa4   : > { %6640 = vst [vmem:[#allocation29_spill] sm:$0xff] %v3985_v24  ;;  %v715_v24 = vld [vmem:[#allocation6 + $0xf8] sm:$0xff]  ;;  %v4009_v47 = vadd.f32 %v1262_v6, %v6655_v27  ;;  %v4024_v3 = vadd.f32 %v1267_v56, %v6665_v12  ;;  %v6667_v6 = vld [vmem:[#allocation20_spill] sm:$0xff]  ;;  %v438_v26 = vld [vmem:[#allocation4 + $0x140] sm:$0xff] }
  0xa5   : > { %6642 = vst [vmem:[#allocation30_spill] sm:$0xff] %v3988_v61  ;;  %v714_v61 = vld [vmem:[#allocation6 + $0xf0] sm:$0xff]  ;;  %v4027_v27 = vadd.f32 %v1268_v34, %v6667_v6  ;;  %v439_v0 = vld [vmem:[#allocation4 + $0x160] sm:$0xff]  ;;  %v6674_v56 = vld [vmem:[#allocation38_spill] sm:$0xff] }
  0xa6   : > { %6644 = vst [vmem:[#allocation31_spill] sm:$0xff] %v3991_v8  ;;  %v713_v8 = vld [vmem:[#allocation6 + $0xe8] sm:$0xff]  ;;  %v440_v44 = vld [vmem:[#allocation4 + $0x180] sm:$0xff]  ;;  %v4042_v12 = vadd.f32 %v6674_v56, %v711_v53  ;;  %v6680_v53 = vld [vmem:[#allocation42_spill] sm:$0xff] }
  0xa7   : > { %6646 = vst [vmem:[#allocation32_spill] sm:$0xff] %v3994_v46  ;;  %v434_v46 = vld [vmem:[#allocation4 + $0xc0] sm:$0xff] }
  0xa8   : > { %6648 = vst [vmem:[#allocation33_spill] sm:$0xff] %v3997_v19  ;;  %v6671_v4 = vld [vmem:[#allocation11_spill] sm:$0xff] }
  0xa9   : > { %6650 = vst [vmem:[#allocation34_spill] sm:$0xff] %v4000_v14  ;;  %v6663_v14 = vld [vmem:[#allocation18_spill] sm:$0xff]  ;;  %v441_v34 = vld [vmem:[#allocation4 + $0x1a0] sm:$0xff] }
  0xaa   : > { %6652 = vst [vmem:[#allocation35_spill] sm:$0xff] %v4003_v2  ;;  %v716_v2 = vld [vmem:[#allocation6 + $0x100] sm:$0xff]  ;;  %v4021_v19 = vadd.f32 %v1266_v28, %v6663_v14  ;;  %v6673_v28 = vld [vmem:[#allocation37_spill] sm:$0xff] }
  0xab   : > { %6654 = vst [vmem:[#allocation12_spill] sm:$0xff] %v4006_v1  ;;  %v437_v1 = vld [vmem:[#allocation4 + $0x120] sm:$0xff]  ;;  %v4039_v14 = vadd.f32 %v6673_v28, %v710_v57  ;;  %v4057_v56 = vadd.f32 %v6680_v53, %v716_v2 }
  0xac   : > { %6656 = vst [vmem:[#allocation13_spill] sm:$0xff] %v4009_v47  ;;  %v442_v6 = vld [vmem:[#allocation4 + $0x1c0] sm:$0xff] }
  0xad   : > { %6658 = vst [vmem:[#allocation14_spill] sm:$0xff] %v4012_v13  ;;  %v6675_v22 = vld [vmem:[#allocation39_spill] sm:$0xff] }
  0xae   : > { %6660 = vst [vmem:[#allocation16_spill] sm:$0xff] %v4015_v43  ;;  %v6672_v43 = vld [vmem:[#allocation36_spill] sm:$0xff]  ;;  %v4045_v60 = vadd.f32 %v6675_v22, %v712_v45  ;;  %v444_v57 = vld [vmem:[#allocation4 + $0x200] sm:$0xff] }
  0xaf   : > { %6662 = vst [vmem:[#allocation17_spill] sm:$0xff] %v4018_v55  ;;  %v4033_v55 = vadd.f32 %v6671_v4, %v708_v41  ;;  %v4036_v13 = vadd.f32 %v6672_v43, %v709_v36  ;;  %v6677_v41 = vld [vmem:[#allocation41_spill] sm:$0xff]  ;;  %v4054_v36 = vadd.f32 %v3833_v16, %v715_v24  ;;  %v445_v43 = vld [vmem:[#allocation4 + $0x220] sm:$0xff] }
  0xb0   : > { %6664 = vst [vmem:[#allocation18_spill] sm:$0xff] %v4021_v19  ;;  %v4051_v4 = vadd.f32 %v6677_v41, %v714_v61  ;;  %v446_v28 = vld [vmem:[#allocation4 + $0x240] sm:$0xff] }
  0xb1   : > { %6666 = vst [vmem:[#allocation19_spill] sm:$0xff] %v4024_v3  ;;  %v6682_v19 = vld [vmem:[#allocation15_spill] sm:$0xff] }
  0xb2   : > { %6668 = vst [vmem:[#allocation20_spill] sm:$0xff] %v4027_v27  ;;  %v443_v27 = vld [vmem:[#allocation4 + $0x1e0] sm:$0xff]  ;;  %v946_v47 = vmul.f32 %v6682_v19, %v428_v37  ;;  %v947_v45 = vmul.f32 %v6682_v19, %v429_v25  ;;  %v948_v22 = vmul.f32 %v6682_v19, %v430_v15  ;;  %v949_v61 = vmul.f32 %v6682_v19, %v431_v21 }
  0xb3   : > { %6670 = vst [vmem:[#allocation21_spill] sm:$0xff] %v4030_v10  ;;  %v6676_v10 = vld [vmem:[#allocation40_spill] sm:$0xff]  ;;  %v449_v49 = vld [vmem:[#allocation4 + $0x2a0] sm:$0xff]  ;;  %v950_v16 = vmul.f32 %v6682_v19, %v432_v40  ;;  %v951_v24 = vmul.f32 %v6682_v19, %v433_v31  ;;  %v952_v41 = vmul.f32 %v6682_v19, %v434_v46  ;;  %v953_v37 = vmul.f32 %v6682_v19, %v435_v33 }
  0xb4   : > { %v4048_v3 = vadd.f32 %v6676_v10, %v713_v8  ;;  %6678 = vst [vmem:[#allocation11_spill] sm:$0xff] %v4051_v4  ;;  %v447_v8 = vld [vmem:[#allocation4 + $0x260] sm:$0xff]  ;;  %v954_v25 = vmul.f32 %v6682_v19, %v436_v18  ;;  %v955_v15 = vmul.f32 %v6682_v19, %v437_v1  ;;  %v956_v5 = vmul.f32 %v6682_v19, %v438_v26 }
  0xb5   : > { %6679 = vst [vmem:[#allocation36_spill] sm:$0xff] %v4054_v36  ;;  %v448_v10 = vld [vmem:[#allocation4 + $0x280] sm:$0xff]  ;;  %v957_v40 = vmul.f32 %v6682_v19, %v439_v0  ;;  %v958_v31 = vmul.f32 %v6682_v19, %v440_v44  ;;  %v959_v46 = vmul.f32 %v6682_v19, %v441_v34  ;;  %v960_v39 = vmul.f32 %v6682_v19, %v442_v6 }
  0xb6   : > { %6681 = vst [vmem:[#allocation37_spill] sm:$0xff] %v4057_v56  ;;  %v450_v30 = vld [vmem:[#allocation4 + $0x2c0] sm:$0xff]  ;;  %v961_v18 = vmul.f32 %v6682_v19, %v443_v27  ;;  %v962_v1 = vmul.f32 %v6682_v19, %v444_v57  ;;  %v963_v26 = vmul.f32 %v6682_v19, %v445_v43  ;;  %v964_v32 = vmul.f32 %v6682_v19, %v446_v28 }
  0xb7   : > { %v451_v2 = vld [vmem:[#allocation4 + $0x2e0] sm:$0xff]  ;;  %v965_v0 = vmul.f32 %v6682_v19, %v447_v8  ;;  %v966_v44 = vmul.f32 %v6682_v19, %v448_v10  ;;  %v967_v34 = vmul.f32 %v6682_v19, %v449_v49  ;;  %v968_v6 = vmul.f32 %v6682_v19, %v450_v30 }
  0xb8   : > { %v452_v53 = vld [vmem:[#allocation4 + $0x300] sm:$0xff]  ;;  %v969_v50 = vmul.f32 %v6682_v19, %v451_v2  ;;  %v978_v30 = vmul.f32 %v6682_v19, %v460_v59  ;;  %v4111_v59 = vadd.f32 %v952_v41, %v3852_v35  ;;  %v4132_v35 = vadd.f32 %v959_v46, %v3873_v58  ;;  %v498_v41 = vld [vmem:[#allocation4 + $0xc8] sm:$0xff]  ;;  %v6693_v46 = vld [vmem:[#allocation53_spill] sm:$0xff] }
  0xb9   : > { %v453_v51 = vld [vmem:[#allocation4 + $0x320] sm:$0xff]  ;;  %v970_v27 = vmul.f32 %v6682_v19, %v452_v53  ;;  %v6684_v53 = vld [vmem:[#allocation44_spill] sm:$0xff] }
  0xba   : > { %v454_v63 = vld [vmem:[#allocation4 + $0x340] sm:$0xff]  ;;  %v971_v57 = vmul.f32 %v6682_v19, %v453_v51  ;;  %v4096_v4 = vadd.f32 %v947_v45, %v6684_v53  ;;  %v4102_v51 = vadd.f32 %v949_v61, %v3845_v62  ;;  %v492_v62 = vld [vmem:[#allocation4 + $0x8] sm:$0xff]  ;;  %v6686_v61 = vld [vmem:[#allocation46_spill] sm:$0xff] }
  0xbb   : > { %v455_v21 = vld [vmem:[#allocation4 + $0x360] sm:$0xff]  ;;  %v972_v43 = vmul.f32 %v6682_v19, %v454_v63  ;;  %v4099_v63 = vadd.f32 %v948_v22, %v3843_v7  ;;  %v4120_v7 = vadd.f32 %v955_v15, %v3861_v52  ;;  %v494_v45 = vld [vmem:[#allocation4 + $0x48] sm:$0xff]  ;;  %v4135_v52 = vadd.f32 %v960_v39, %v3876_v11  ;;  %v6695_v53 = vld [vmem:[#allocation54_spill] sm:$0xff] }
  0xbc   : > { %v456_v17 = vld [vmem:[#allocation4 + $0x380] sm:$0xff]  ;;  %v973_v28 = vmul.f32 %v6682_v19, %v455_v21  ;;  %v496_v22 = vld [vmem:[#allocation4 + $0x88] sm:$0xff] }
  0xbd   : > { %v457_v42 = vld [vmem:[#allocation4 + $0x3a0] sm:$0xff]  ;;  %v974_v56 = vmul.f32 %v6682_v19, %v456_v17  ;;  %v6685_v17 = vld [vmem:[#allocation45_spill] sm:$0xff]  ;;  %v499_v58 = vld [vmem:[#allocation4 + $0xe8] sm:$0xff] }
  0xbe   : > { %v458_v33 = vld [vmem:[#allocation4 + $0x3c0] sm:$0xff]  ;;  %v975_v8 = vmul.f32 %v6682_v19, %v457_v42  ;;  %v4105_v42 = vadd.f32 %v950_v16, %v3847_v54  ;;  %v4108_v21 = vadd.f32 %v951_v24, %v6685_v17  ;;  %v4126_v54 = vadd.f32 %v957_v40, %v3867_v23  ;;  %v6688_v23 = vld [vmem:[#allocation48_spill] sm:$0xff] }
  0xbf   : > { %v459_v29 = vld [vmem:[#allocation4 + $0x3e0] sm:$0xff]  ;;  %v976_v10 = vmul.f32 %v6682_v19, %v458_v33  ;;  %v4138_v16 = vadd.f32 %v961_v18, %v6686_v61  ;;  %v4144_v24 = vadd.f32 %v963_v26, %v6688_v23  ;;  %v6691_v11 = vld [vmem:[#allocation52_spill] sm:$0xff]  ;;  %v4156_v33 = vadd.f32 %v967_v34, %v6693_v46 }
  0xc0   : > { %v977_v49 = vmul.f32 %v6682_v19, %v459_v29  ;;  %v6683_v36 = vld [vmem:[#allocation43_spill] sm:$0xff]  ;;  %v4114_v29 = vadd.f32 %v953_v37, %v3855_v20  ;;  %v4123_v19 = vadd.f32 %v956_v5, %v3864_v9  ;;  %v493_v20 = vld [vmem:[#allocation4 + $0x28] sm:$0xff]  ;;  %v4153_v39 = vadd.f32 %v966_v44, %v6691_v11 }
  0xc1   : > { %v4093_v2 = vadd.f32 %v946_v47, %v6683_v36  ;;  %v4117_v47 = vadd.f32 %v954_v25, %v3858_v38  ;;  %v4129_v36 = vadd.f32 %v958_v31, %v3870_v48  ;;  %v495_v38 = vld [vmem:[#allocation4 + $0x68] sm:$0xff]  ;;  %v6687_v9 = vld [vmem:[#allocation47_spill] sm:$0xff]  ;;  %v6689_v25 = vld [vmem:[#allocation50_spill] sm:$0xff]  ;;  %6694 = vst [vmem:[#allocation39_spill] sm:$0xff] %v4156_v33  ;;  %v4159_v17 = vadd.f32 %v968_v6, %v6695_v53 }
  0xc2   : > { %v4141_v5 = vadd.f32 %v962_v1, %v6687_v9  ;;  %v497_v48 = vld [vmem:[#allocation4 + $0xa8] sm:$0xff]  ;;  %v4147_v15 = vadd.f32 %v964_v32, %v6689_v25  ;;  %v6690_v40 = vld [vmem:[#allocation51_spill] sm:$0xff]  ;;  %6692 = vst [vmem:[#allocation38_spill] sm:$0xff] %v4153_v39  ;;  %v4165_v32 = vadd.f32 %v970_v27, %v4033_v55  ;;  %v4171_v34 = vadd.f32 %v972_v43, %v4039_v14  ;;  %v6709_v14 = vld [vmem:[#allocation37_spill] sm:$0xff] }
  0xc3   : > { %v500_v37 = vld [vmem:[#allocation4 + $0x108] sm:$0xff]  ;;  %v4150_v31 = vadd.f32 %v965_v0, %v6690_v40  ;;  %6696 = vst [vmem:[#allocation40_spill] sm:$0xff] %v4159_v17  ;;  %v6697_v61 = vld [vmem:[#allocation55_spill] sm:$0xff]  ;;  %v4168_v0 = vadd.f32 %v971_v57, %v4036_v13  ;;  %v4174_v40 = vadd.f32 %v973_v28, %v4042_v12  ;;  %v4177_v6 = vadd.f32 %v974_v56, %v4045_v60  ;;  %v6711_v12 = vld [vmem:[#allocation22_spill] sm:$0xff] }
  0xc4   : > { %v501_v18 = vld [vmem:[#allocation4 + $0x128] sm:$0xff]  ;;  %v4162_v9 = vadd.f32 %v969_v50, %v6697_v61  ;;  %6699 = vst [vmem:[#allocation42_spill] sm:$0xff] %v4165_v32  ;;  %v4180_v50 = vadd.f32 %v975_v8, %v4048_v3  ;;  %v6705_v13 = vld [vmem:[#allocation11_spill] sm:$0xff]  ;;  %v4189_v43 = vadd.f32 %v978_v30, %v6709_v14  ;;  %v1076_v28 = vmul.f32 %v6711_v12, %v492_v62 }
  0xc5   : > { %v502_v1 = vld [vmem:[#allocation4 + $0x148] sm:$0xff]  ;;  %6700 = vst [vmem:[#allocation15_spill] sm:$0xff] %v4168_v0  ;;  %v4183_v57 = vadd.f32 %v976_v10, %v6705_v13  ;;  %v1077_v3 = vmul.f32 %v6711_v12, %v493_v20  ;;  %v1078_v8 = vmul.f32 %v6711_v12, %v494_v45  ;;  %v1080_v10 = vmul.f32 %v6711_v12, %v496_v22 }
  0xc6   : > { %v503_v26 = vld [vmem:[#allocation4 + $0x168] sm:$0xff]  ;;  %6698 = vst [vmem:[#allocation41_spill] sm:$0xff] %v4162_v9  ;;  %v1082_v30 = vmul.f32 %v6711_v12, %v498_v41  ;;  %v1083_v62 = vmul.f32 %v6711_v12, %v499_v58  ;;  %v1084_v14 = vmul.f32 %v6711_v12, %v500_v37  ;;  %v1085_v45 = vmul.f32 %v6711_v12, %v501_v18 }
  0xc7   : > { %v504_v44 = vld [vmem:[#allocation4 + $0x188] sm:$0xff]  ;;  %6701 = vst [vmem:[#allocation43_spill] sm:$0xff] %v4171_v34  ;;  %v1087_v22 = vmul.f32 %v6711_v12, %v503_v26 }
  0xc8   : > { %v505_v23 = vld [vmem:[#allocation4 + $0x1a8] sm:$0xff]  ;;  %6702 = vst [vmem:[#allocation44_spill] sm:$0xff] %v4174_v40 }
  0xc9   : > { %v506_v25 = vld [vmem:[#allocation4 + $0x1c8] sm:$0xff]  ;;  %6703 = vst [vmem:[#allocation45_spill] sm:$0xff] %v4177_v6  ;;  %v1088_v6 = vmul.f32 %v6711_v12, %v504_v44  ;;  %v1089_v41 = vmul.f32 %v6711_v12, %v505_v23 }
  0xca   : > { %6704 = vst [vmem:[#allocation46_spill] sm:$0xff] %v4180_v50  ;;  %v507_v55 = vld [vmem:[#allocation4 + $0x1e8] sm:$0xff]  ;;  %v1079_v50 = vmul.f32 %v6711_v12, %v495_v38  ;;  %v1086_v38 = vmul.f32 %v6711_v12, %v502_v1  ;;  %v1090_v58 = vmul.f32 %v6711_v12, %v506_v25 }
  0xcb   : > { %v508_v27 = vld [vmem:[#allocation4 + $0x208] sm:$0xff]  ;;  %6706 = vst [vmem:[#allocation47_spill] sm:$0xff] %v4183_v57  ;;  %v1091_v37 = vmul.f32 %v6711_v12, %v507_v55 }
  0xcc   : > { %v509_v11 = vld [vmem:[#allocation4 + $0x228] sm:$0xff]  ;;  %6710 = vst [vmem:[#allocation50_spill] sm:$0xff] %v4189_v43  ;;  %v1092_v0 = vmul.f32 %v6711_v12, %v508_v27 }
  0xcd   : > { %v6707_v46 = vld [vmem:[#allocation36_spill] sm:$0xff]  ;;  %v1093_v1 = vmul.f32 %v6711_v12, %v509_v11 }
  0xce   : > { %v4186_v53 = vadd.f32 %v977_v49, %v6707_v46  ;;  %v510_v61 = vld [vmem:[#allocation4 + $0x248] sm:$0xff]  ;;  %v1081_v46 = vmul.f32 %v6711_v12, %v497_v48 }
  0xcf   : > { %v511_v60 = vld [vmem:[#allocation4 + $0x268] sm:$0xff]  ;;  %v1094_v26 = vmul.f32 %v6711_v12, %v510_v61 }
  0xd0   : > { %6708 = vst [vmem:[#allocation48_spill] sm:$0xff] %v4186_v53  ;;  %v512_v56 = vld [vmem:[#allocation4 + $0x288] sm:$0xff]  ;;  %v1095_v44 = vmul.f32 %v6711_v12, %v511_v60 }
  0xd1   : > { %v513_v13 = vld [vmem:[#allocation4 + $0x2a8] sm:$0xff]  ;;  %v1096_v17 = vmul.f32 %v6711_v12, %v512_v56 }
  0xd2   : > { %v514_v57 = vld [vmem:[#allocation4 + $0x2c8] sm:$0xff]  ;;  %v1097_v33 = vmul.f32 %v6711_v12, %v513_v13 }
  0xd3   : > { %v515_v49 = vld [vmem:[#allocation4 + $0x2e8] sm:$0xff]  ;;  %v1098_v23 = vmul.f32 %v6711_v12, %v514_v57 }
  0xd4   : > { %v516_v43 = vld [vmem:[#allocation4 + $0x308] sm:$0xff]  ;;  %v1099_v25 = vmul.f32 %v6711_v12, %v515_v49  ;;  %v4225_v49 = vadd.f32 %v1076_v28, %v4093_v2  ;;  %v4246_v2 = vadd.f32 %v1083_v62, %v4114_v29  ;;  %v4264_v29 = vadd.f32 %v1089_v41, %v4132_v35  ;;  %v560_v28 = vld [vmem:[#allocation4 + $0x90] sm:$0xff]  ;;  %v6714_v62 = vld [vmem:[#allocation39_spill] sm:$0xff] }
  0xd5   : > { %v517_v53 = vld [vmem:[#allocation4 + $0x328] sm:$0xff]  ;;  %v1100_v55 = vmul.f32 %v6711_v12, %v516_v43  ;;  %v4228_v43 = vadd.f32 %v1077_v3, %v4096_v4  ;;  %v4249_v4 = vadd.f32 %v1084_v14, %v4117_v47  ;;  %v4267_v47 = vadd.f32 %v1090_v58, %v4135_v52  ;;  %v561_v3 = vld [vmem:[#allocation4 + $0xb0] sm:$0xff] }
  0xd6   : > { %v518_v20 = vld [vmem:[#allocation4 + $0x348] sm:$0xff]  ;;  %v1101_v27 = vmul.f32 %v6711_v12, %v517_v53  ;;  %v4231_v53 = vadd.f32 %v1078_v8, %v4099_v63  ;;  %v4252_v63 = vadd.f32 %v1085_v45, %v4120_v7  ;;  %v4270_v7 = vadd.f32 %v1091_v37, %v4138_v16  ;;  %v563_v52 = vld [vmem:[#allocation4 + $0xf0] sm:$0xff] }
  0xd7   : > { %v519_v40 = vld [vmem:[#allocation4 + $0x368] sm:$0xff]  ;;  %v1102_v39 = vmul.f32 %v6711_v12, %v518_v20  ;;  %v4273_v8 = vadd.f32 %v1092_v0, %v4141_v5  ;;  %v4282_v35 = vadd.f32 %v1095_v44, %v4150_v31  ;;  %v565_v16 = vld [vmem:[#allocation4 + $0x130] sm:$0xff]  ;;  %v4288_v14 = vadd.f32 %v1097_v33, %v6714_v62  ;;  %v6720_v31 = vld [vmem:[#allocation42_spill] sm:$0xff] }
  0xd8   : > { %v520_v34 = vld [vmem:[#allocation4 + $0x388] sm:$0xff]  ;;  %v1103_v11 = vmul.f32 %v6711_v12, %v519_v40  ;;  %v4234_v40 = vadd.f32 %v1079_v50, %v4102_v51  ;;  %v4255_v51 = vadd.f32 %v1086_v38, %v4123_v19  ;;  %v557_v50 = vld [vmem:[#allocation4 + $0x30] sm:$0xff] }
  0xd9   : > { %v521_v48 = vld [vmem:[#allocation4 + $0x3a8] sm:$0xff]  ;;  %v1104_v61 = vmul.f32 %v6711_v12, %v520_v34  ;;  %v4237_v34 = vadd.f32 %v1080_v10, %v4105_v42  ;;  %v4258_v42 = vadd.f32 %v1087_v22, %v4126_v54  ;;  %v559_v19 = vld [vmem:[#allocation4 + $0x70] sm:$0xff]  ;;  %v4276_v10 = vadd.f32 %v1093_v1, %v4144_v24  ;;  %6715 = vst [vmem:[#allocation52_spill] sm:$0xff] %v4288_v14 }
  0xda   : > { %v522_v32 = vld [vmem:[#allocation4 + $0x3c8] sm:$0xff]  ;;  %v1105_v60 = vmul.f32 %v6711_v12, %v521_v48  ;;  %v562_v54 = vld [vmem:[#allocation4 + $0xd0] sm:$0xff]  ;;  %v4297_v22 = vadd.f32 %v1100_v55, %v6720_v31  ;;  %v6722_v48 = vld [vmem:[#allocation15_spill] sm:$0xff] }
  0xdb   : > { %v523_v9 = vld [vmem:[#allocation4 + $0x3e8] sm:$0xff]  ;;  %v1106_v56 = vmul.f32 %v6711_v12, %v522_v32  ;;  %v4240_v32 = vadd.f32 %v1081_v46, %v4108_v21  ;;  %v556_v21 = vld [vmem:[#allocation4 + $0x10] sm:$0xff]  ;;  %v6712_v46 = vld [vmem:[#allocation38_spill] sm:$0xff]  ;;  %v4300_v41 = vadd.f32 %v1101_v27, %v6722_v48 }
  0xdc   : > { %v524_v18 = vld [vmem:[#allocation4 + $0x408] sm:$0xff]  ;;  %v1107_v13 = vmul.f32 %v6711_v12, %v523_v9  ;;  %v4243_v9 = vadd.f32 %v1082_v30, %v4111_v59  ;;  %v4261_v59 = vadd.f32 %v1088_v6, %v4129_v36  ;;  %v4279_v36 = vadd.f32 %v1094_v26, %v4147_v15  ;;  %v564_v6 = vld [vmem:[#allocation4 + $0x110] sm:$0xff]  ;;  %6721 = vst [vmem:[#allocation55_spill] sm:$0xff] %v4297_v22  ;;  %v6732_v55 = vld [vmem:[#allocation47_spill] sm:$0xff] }
  0xdd   : > { %v1108_v57 = vmul.f32 %v6711_v12, %v524_v18  ;;  %v558_v12 = vld [vmem:[#allocation4 + $0x50] sm:$0xff]  ;;  %v4285_v30 = vadd.f32 %v1096_v17, %v6712_v46  ;;  %v6716_v5 = vld [vmem:[#allocation40_spill] sm:$0xff]  ;;  %6723 = vst [vmem:[#allocation11_spill] sm:$0xff] %v4300_v41  ;;  %v6724_v17 = vld [vmem:[#allocation43_spill] sm:$0xff]  ;;  %v4315_v62 = vadd.f32 %v1106_v56, %v6732_v55 }
  0xde   : > { %v4291_v0 = vadd.f32 %v1098_v23, %v6716_v5  ;;  %v6718_v24 = vld [vmem:[#allocation41_spill] sm:$0xff]  ;;  %v4303_v58 = vadd.f32 %v1102_v39, %v6724_v17  ;;  %v6726_v33 = vld [vmem:[#allocation44_spill] sm:$0xff] }
  0xdf   : > { %6713 = vst [vmem:[#allocation51_spill] sm:$0xff] %v4285_v30  ;;  %v4294_v20 = vadd.f32 %v1099_v25, %v6718_v24  ;;  %v566_v15 = vld [vmem:[#allocation4 + $0x150] sm:$0xff]  ;;  %v4306_v37 = vadd.f32 %v1103_v11, %v6726_v33  ;;  %v6730_v25 = vld [vmem:[#allocation46_spill] sm:$0xff]  ;;  %v6734_v27 = vld [vmem:[#allocation48_spill] sm:$0xff] }
  0xe0   : > { %6717 = vst [vmem:[#allocation53_spill] sm:$0xff] %v4291_v0  ;;  %v567_v45 = vld [vmem:[#allocation4 + $0x170] sm:$0xff]  ;;  %v4312_v46 = vadd.f32 %v1105_v60, %v6730_v25  ;;  %v4318_v5 = vadd.f32 %v1107_v13, %v6734_v27  ;;  %v6736_v11 = vld [vmem:[#allocation50_spill] sm:$0xff] }
  0xe1   : > { %6719 = vst [vmem:[#allocation54_spill] sm:$0xff] %v4294_v20  ;;  %v568_v38 = vld [vmem:[#allocation4 + $0x190] sm:$0xff]  ;;  %v4321_v48 = vadd.f32 %v1108_v57, %v6736_v11 }
  0xe2   : > { %6725 = vst [vmem:[#allocation36_spill] sm:$0xff] %v4303_v58  ;;  %v569_v18 = vld [vmem:[#allocation4 + $0x1b0] sm:$0xff] }
  0xe3   : > { %6727 = vst [vmem:[#allocation37_spill] sm:$0xff] %v4306_v37  ;;  %v570_v1 = vld [vmem:[#allocation4 + $0x1d0] sm:$0xff] }
  0xe4   : > { %v571_v26 = vld [vmem:[#allocation4 + $0x1f0] sm:$0xff]  ;;  %6731 = vst [vmem:[#allocation38_spill] sm:$0xff] %v4312_v46 }
  0xe5   : > { %v6728_v44 = vld [vmem:[#allocation45_spill] sm:$0xff]  ;;  %6733 = vst [vmem:[#allocation39_spill] sm:$0xff] %v4315_v62 }
  0xe6   : > { %v4309_v23 = vadd.f32 %v1104_v61, %v6728_v44  ;;  %6735 = vst [vmem:[#allocation40_spill] sm:$0xff] %v4318_v5  ;;  %v572_v39 = vld [vmem:[#allocation4 + $0x210] sm:$0xff] }
  0xe7   : > { %v573_v24 = vld [vmem:[#allocation4 + $0x230] sm:$0xff]  ;;  %6737 = vst [vmem:[#allocation41_spill] sm:$0xff] %v4321_v48 }
  0xe8   : > { %6729 = vst [vmem:[#allocation22_spill] sm:$0xff] %v4309_v23  ;;  %v574_v31 = vld [vmem:[#allocation4 + $0x250] sm:$0xff] }
  0xe9   : > { %v6738_v17 = vld [vmem:[#allocation49_spill] sm:$0xff] }
  0xea   : > { %v1206_v33 = vmul.f32 %v6738_v17, %v556_v21  ;;  %v1207_v61 = vmul.f32 %v6738_v17, %v557_v50  ;;  %v1208_v44 = vmul.f32 %v6738_v17, %v558_v12  ;;  %v575_v60 = vld [vmem:[#allocation4 + $0x270] sm:$0xff]  ;;  %v1209_v56 = vmul.f32 %v6738_v17, %v559_v19 }
  0xeb   : > { %v576_v25 = vld [vmem:[#allocation4 + $0x290] sm:$0xff]  ;;  %v1210_v13 = vmul.f32 %v6738_v17, %v560_v28  ;;  %v1211_v55 = vmul.f32 %v6738_v17, %v561_v3  ;;  %v1212_v27 = vmul.f32 %v6738_v17, %v562_v54  ;;  %v1213_v21 = vmul.f32 %v6738_v17, %v563_v52 }
  0xec   : > { %v577_v46 = vld [vmem:[#allocation4 + $0x2b0] sm:$0xff]  ;;  %v1214_v50 = vmul.f32 %v6738_v17, %v564_v6  ;;  %v1215_v12 = vmul.f32 %v6738_v17, %v565_v16  ;;  %v1216_v48 = vmul.f32 %v6738_v17, %v566_v15  ;;  %v1217_v28 = vmul.f32 %v6738_v17, %v567_v45 }
  0xed   : > { %v578_v5 = vld [vmem:[#allocation4 + $0x2d0] sm:$0xff]  ;;  %v1218_v3 = vmul.f32 %v6738_v17, %v568_v38  ;;  %v1219_v54 = vmul.f32 %v6738_v17, %v569_v18  ;;  %v1220_v37 = vmul.f32 %v6738_v17, %v570_v1  ;;  %v1221_v6 = vmul.f32 %v6738_v17, %v571_v26 }
  0xee   : > { %v579_v57 = vld [vmem:[#allocation4 + $0x2f0] sm:$0xff]  ;;  %v1222_v16 = vmul.f32 %v6738_v17, %v572_v39  ;;  %v1223_v15 = vmul.f32 %v6738_v17, %v573_v24  ;;  %v1224_v22 = vmul.f32 %v6738_v17, %v574_v31  ;;  %v1225_v45 = vmul.f32 %v6738_v17, %v575_v60 }
  0xef   : > { %v580_v11 = vld [vmem:[#allocation4 + $0x310] sm:$0xff]  ;;  %v1226_v38 = vmul.f32 %v6738_v17, %v576_v25  ;;  %v1227_v18 = vmul.f32 %v6738_v17, %v577_v46  ;;  %v1228_v1 = vmul.f32 %v6738_v17, %v578_v5  ;;  %v1229_v14 = vmul.f32 %v6738_v17, %v579_v57 }
  0xf0   : > { %v581_v62 = vld [vmem:[#allocation4 + $0x330] sm:$0xff]  ;;  %v1230_v26 = vmul.f32 %v6738_v17, %v580_v11  ;;  %v4357_v57 = vadd.f32 %v1206_v33, %v4225_v49  ;;  %v4360_v11 = vadd.f32 %v1207_v61, %v4228_v43  ;;  %v4378_v49 = vadd.f32 %v1213_v21, %v4246_v2  ;;  %v6768_v33 = vld [vmem:[#allocation55_spill] sm:$0xff]  ;;  %v6772_v61 = vld [vmem:[#allocation36_spill] sm:$0xff] }
  0xf1   : > { %v582_v23 = vld [vmem:[#allocation4 + $0x350] sm:$0xff]  ;;  %v1231_v39 = vmul.f32 %v6738_v17, %v581_v62  ;;  %v4366_v62 = vadd.f32 %v1209_v56, %v4234_v40  ;;  %v4381_v43 = vadd.f32 %v1214_v50, %v4249_v4  ;;  %v4387_v40 = vadd.f32 %v1216_v48, %v4255_v51 }
  0xf2   : > { %v583_v19 = vld [vmem:[#allocation4 + $0x370] sm:$0xff]  ;;  %v1232_v24 = vmul.f32 %v6738_v17, %v582_v23  ;;  %6739 = vst [vmem:[#allocation42_spill] sm:$0xff] %v4357_v57  ;;  %v4363_v23 = vadd.f32 %v1208_v44, %v4231_v53  ;;  %v4384_v53 = vadd.f32 %v1215_v12, %v4252_v63  ;;  %v4399_v2 = vadd.f32 %v1220_v37, %v4267_v47  ;;  %v6761_v47 = vld [vmem:[#allocation52_spill] sm:$0xff]  ;;  %v6781_v12 = vld [vmem:[#allocation39_spill] sm:$0xff] }
  0xf3   : > { %v584_v58 = vld [vmem:[#allocation4 + $0x390] sm:$0xff]  ;;  %v1233_v31 = vmul.f32 %v6738_v17, %v583_v19  ;;  %6740 = vst [vmem:[#allocation15_spill] sm:$0xff] %v4360_v11  ;;  %v4402_v4 = vadd.f32 %v1221_v6, %v4270_v7  ;;  %v4405_v63 = vadd.f32 %v1222_v16, %v4273_v8  ;;  %v4408_v51 = vadd.f32 %v1223_v15, %v4276_v10  ;;  %v4423_v7 = vld [vmem:[%s3359_s8 + $0x1] ss:$0 sm:$0xff]  ;;  %v2801_v15 = vld [vmem:[#allocation4 + $0x18] sm:$0xff] }
  0xf4   : > { %v585_v41 = vld [vmem:[#allocation4 + $0x3b0] sm:$0xff]  ;;  %v1234_v30 = vmul.f32 %v6738_v17, %v584_v58  ;;  %6741 = vst [vmem:[#allocation43_spill] sm:$0xff] %v4363_v23  ;;  %v4372_v58 = vadd.f32 %v1211_v55, %v4240_v32  ;;  %v4393_v32 = vadd.f32 %v1218_v3, %v4261_v59  ;;  %v4414_v59 = vadd.f32 %v1225_v45, %v4282_v35  ;;  %v6776_v55 = vld [vmem:[#allocation22_spill] sm:$0xff] }
  0xf5   : > { %v586_v52 = vld [vmem:[#allocation4 + $0x3d0] sm:$0xff]  ;;  %v1235_v60 = vmul.f32 %v6738_v17, %v585_v41  ;;  %6742 = vst [vmem:[#allocation44_spill] sm:$0xff] %v4366_v62  ;;  %v4369_v41 = vadd.f32 %v1210_v13, %v4237_v34  ;;  %v4390_v34 = vadd.f32 %v1217_v28, %v4258_v42  ;;  %v4411_v42 = vadd.f32 %v1224_v22, %v4279_v36  ;;  %v6770_v22 = vld [vmem:[#allocation11_spill] sm:$0xff]  ;;  %v6783_v28 = vld [vmem:[#allocation40_spill] sm:$0xff] }
  0xf6   : > { %v587_v20 = vld [vmem:[#allocation4 + $0x3f0] sm:$0xff]  ;;  %v1236_v25 = vmul.f32 %v6738_v17, %v586_v52  ;;  %6744 = vst [vmem:[#allocation46_spill] sm:$0xff] %v4372_v58  ;;  %v4420_v37 = vadd.f32 %v1227_v18, %v6761_v47  ;;  %v4432_v36 = vadd.f32 %v1230_v26, %v6768_v33  ;;  %v4435_v35 = vadd.f32 %v1231_v39, %v6770_v22  ;;  %v2802_v26 = vld [vmem:[#allocation4 + $0x38] sm:$0xff] }
  0xf7   : > { %v588_v0 = vld [vmem:[#allocation4 + $0x410] sm:$0xff]  ;;  %v1237_v46 = vmul.f32 %v6738_v17, %v587_v20  ;;  %6743 = vst [vmem:[#allocation45_spill] sm:$0xff] %v4369_v41  ;;  %v4438_v44 = vadd.f32 %v1232_v24, %v6772_v61  ;;  %v4447_v21 = vmul.f32 0.2, %v4357_v57  ;;  %v4468_v16 = vmul.f32 0.2, %v4366_v62 }
  0xf8   : > { %v1238_v5 = vmul.f32 %v6738_v17, %v588_v0  ;;  %v4375_v0 = vadd.f32 %v1212_v27, %v4243_v9  ;;  %6746 = vst [vmem:[#allocation48_spill] sm:$0xff] %v4378_v49  ;;  %v4396_v9 = vadd.f32 %v1219_v54, %v4264_v29  ;;  %v6759_v29 = vld [vmem:[#allocation51_spill] sm:$0xff]  ;;  %v6764_v48 = vld [vmem:[#allocation53_spill] sm:$0xff]  ;;  %v6766_v17 = vld [vmem:[#allocation54_spill] sm:$0xff]  ;;  %v4444_v27 = vadd.f32 %v1234_v30, %v6776_v55 }
  0xf9   : > { %6747 = vst [vmem:[#allocation50_spill] sm:$0xff] %v4381_v43  ;;  %v4417_v20 = vadd.f32 %v1226_v38, %v6759_v29  ;;  %v4426_v8 = vadd.f32 %v1228_v1, %v6764_v48  ;;  %v4429_v10 = vadd.f32 %v1229_v14, %v6766_v17  ;;  %v6774_v56 = vld [vmem:[#allocation37_spill] sm:$0xff]  ;;  %v6779_v14 = vld [vmem:[#allocation38_spill] sm:$0xff]  ;;  %v4453_v19 = vadd.f32 %v1236_v25, %v6781_v12  ;;  %v6833_v62 = vld [vmem:[#allocation64_spill] sm:$0xff] }
  0xfa   : > { %6745 = vst [vmem:[#allocation47_spill] sm:$0xff] %v4375_v0  ;;  %v4441_v13 = vadd.f32 %v1233_v31, %v6774_v56  ;;  %v4450_v50 = vadd.f32 %v1235_v60, %v6779_v14  ;;  %v4456_v3 = vadd.f32 %v1237_v46, %v6783_v28  ;;  %v4459_v54 = vmul.f32 0.2, %v4360_v11  ;;  %v6786_v52 = vld [vmem:[#allocation41_spill] sm:$0xff]  ;;  %v2804_v11 = vld [vmem:[#allocation4 + $0x458] sm:$0xff] }
  0xfb   : > { %6748 = vst [vmem:[#allocation49_spill] sm:$0xff] %v4384_v53  ;;  %v4462_v6 = vadd.f32 %v1238_v5, %v6786_v52  ;;  %v4465_v30 = vmul.f32 0.2, %v4363_v23  ;;  %v4471_v45 = vmul.f32 %v2801_v15, %v4423_v7  ;;  %v4474_v38 = vmul.f32 0.2, %v4369_v41  ;;  %v6835_v23 = vld [vmem:[#allocation23_spill] sm:$0xff] }
  0xfc   : > { %6749 = vst [vmem:[#allocation65_spill] sm:$0xff] %v4387_v40  ;;  %v4477_v18 = vmul.f32 0.2, %v4372_v58  ;;  %v4480_v1 = vmul.f32 0.2, %v4375_v0  ;;  %v4483_v39 = vmul.f32 %v2802_v26, %v4423_v7  ;;  %v6819_v58 = vld [vmem:[#allocation57_spill] sm:$0xff] }
  0xfd   : > { %6750 = vst [vmem:[#allocation66_spill] sm:$0xff] %v4390_v34  ;;  %v4486_v24 = vmul.f32 0.2, %v4378_v49  ;;  %v4489_v31 = vmul.f32 0.2, %v4381_v43  ;;  %v6827_v0 = vld [vmem:[#allocation61_spill] sm:$0xff] }
  0xfe   : > { %6751 = vst [vmem:[#allocation67_spill] sm:$0xff] %v4393_v32  ;;  %v4492_v60 = vmul.f32 0.2, %v4384_v53  ;;  %v4497_v46 = vmul.f32 0.2, %v4387_v40  ;;  %v6831_v43 = vld [vmem:[#allocation63_spill] sm:$0xff] }
  0xff   : > { %6752 = vst [vmem:[#allocation68_spill] sm:$0xff] %v4396_v9  ;;  %v4500_v5 = vmul.f32 0.2, %v4390_v34  ;;  %v4503_v29 = vmul.f32 0.2, %v4393_v32  ;;  %v2803_v53 = vld [vmem:[#allocation4 + $0x438] sm:$0xff] }
 0x100   : > { %6753 = vst [vmem:[#allocation69_spill] sm:$0xff] %v4399_v2  ;;  %v4508_v48 = vmul.f32 0.2, %v4396_v9  ;;  %v4511_v17 = vmul.f32 0.2, %v4399_v2  ;;  %v2805_v57 = vld [vmem:[#allocation4 + $0x478] sm:$0xff] }
 0x101   : > { %6754 = vst [vmem:[#allocation70_spill] sm:$0xff] %v4402_v4  ;;  %v4514_v33 = vmul.f32 0.2, %v4402_v4  ;;  %v4519_v61 = vmul.f32 0.2, %v4405_v63  ;;  %v2811_v34 = vld [vmem:[#allocation4 + $0x538] sm:$0xff] }
 0x102   : > { %6755 = vst [vmem:[#allocation71_spill] sm:$0xff] %v4405_v63  ;;  %v4522_v56 = vmul.f32 0.2, %v4408_v51  ;;  %v4525_v55 = vmul.f32 0.2, %v4411_v42  ;;  %v2880_v63 = vld [vmem:[#allocation4 + $0x600] sm:$0xff] }
 0x103   : > { %6756 = vst [vmem:[#allocation72_spill] sm:$0xff] %v4408_v51  ;;  %v4530_v12 = vmul.f32 0.2, %v4414_v59  ;;  %v4533_v28 = vmul.f32 0.2, %v4417_v20  ;;  %v2878_v51 = vld [vmem:[#allocation4 + $0x5c0] sm:$0xff] }
 0x104   : > { %6757 = vst [vmem:[#allocation73_spill] sm:$0xff] %v4411_v42  ;;  %v4536_v52 = vmul.f32 0.2, %v4420_v37  ;;  %v4541_v26 = vmul.f32 0.2, %v4426_v8  ;;  %v2876_v42 = vld [vmem:[#allocation4 + $0x580] sm:$0xff] }
 0x105   : > { %6758 = vst [vmem:[#allocation74_spill] sm:$0xff] %v4414_v59  ;;  %v4544_v22 = vmul.f32 0.2, %v4429_v10  ;;  %v4547_v14 = vmul.f32 0.2, %v4432_v36  ;;  %v2874_v59 = vld [vmem:[#allocation4 + $0x540] sm:$0xff] }
 0x106   : > { %6760 = vst [vmem:[#allocation51_spill] sm:$0xff] %v4417_v20  ;;  %v4552_v25 = vmul.f32 0.2, %v4435_v35  ;;  %v4558_v15 = vmul.f32 0.2, %v4441_v13  ;;  %v2872_v20 = vld [vmem:[#allocation4 + $0x500] sm:$0xff] }
 0x107   : > { %6762 = vst [vmem:[#allocation52_spill] sm:$0xff] %v4420_v37  ;;  %v4573_v41 = vmul.f32 0.2, %v6819_v58  ;;  %v4587_v47 = vmul.f32 0.2, %v6827_v0  ;;  %v2817_v0 = vld [vmem:[#allocation4 + $0x5f8] sm:$0xff] }
 0x108   : > { %6763 = vst [vmem:[#allocation75_spill] sm:$0xff] %v4423_v7  ;;  %v4595_v49 = vmul.f32 0.2, %v6831_v43  ;;  %v2813_v43 = vld [vmem:[#allocation4 + $0x578] sm:$0xff]  ;;  %v2882_v4 = vld [vmem:[#allocation4 + $0x640] sm:$0xff] }
 0x109   : > { %6765 = vst [vmem:[#allocation53_spill] sm:$0xff] %v4426_v8  ;;  %v2825_v58 = vld [vmem:[#allocation4 + $0x6f8] sm:$0xff]  ;;  %v2838_v8 = vld [vmem:[#allocation6 + $0x128] sm:$0xff]  ;;  %v2884_v2 = vld [vmem:[#allocation4 + $0x680] sm:$0xff] }
 0x10a   : > { %6767 = vst [vmem:[#allocation54_spill] sm:$0xff] %v4429_v10  ;;  %v2886_v9 = vld [vmem:[#allocation4 + $0x6c0] sm:$0xff] }
 0x10b   : > { %6769 = vst [vmem:[#allocation55_spill] sm:$0xff] %v4432_v36  ;;  %v2888_v32 = vld [vmem:[#allocation4 + $0x700] sm:$0xff] }
 0x10c   : > { %6771 = vst [vmem:[#allocation11_spill] sm:$0xff] %v4435_v35 }
 0x10d   : > { %6773 = vst [vmem:[#allocation36_spill] sm:$0xff] %v4438_v44 }
 0x10e   : > { %6775 = vst [vmem:[#allocation37_spill] sm:$0xff] %v4441_v13  ;;  %v6821_v13 = vld [vmem:[#allocation58_spill] sm:$0xff] }
 0x10f   : > { %6777 = vst [vmem:[#allocation22_spill] sm:$0xff] %v4444_v27 }
 0x110   : > { %6778 = vst [vmem:[#allocation76_spill] sm:$0xff] %v4447_v21  ;;  %v1564_v21 = vmul.f32 %v2804_v11, %v4423_v7  ;;  %v1571_v11 = vmul.f32 %v2811_v34, %v4423_v7 }
 0x111   : > { %6780 = vst [vmem:[#allocation38_spill] sm:$0xff] %v4450_v50  ;;  %v6817_v50 = vld [vmem:[#allocation56_spill] sm:$0xff] }
 0x112   : > { %6782 = vst [vmem:[#allocation39_spill] sm:$0xff] %v4453_v19  ;;  %v4563_v19 = vmul.f32 0.2, %v4444_v27  ;;  %v4601_v27 = vmul.f32 0.2, %v6835_v23  ;;  %v2808_v23 = vld [vmem:[#allocation4 + $0x4d8] sm:$0xff] }
 0x113   : > { %6784 = vst [vmem:[#allocation40_spill] sm:$0xff] %v4456_v3 }
 0x114   : > { %6785 = vst [vmem:[#allocation77_spill] sm:$0xff] %v4459_v54  ;;  %v1563_v54 = vmul.f32 %v2803_v53, %v4423_v7 }
 0x115   : > { %6787 = vst [vmem:[#allocation41_spill] sm:$0xff] %v4462_v6  ;;  %v4555_v6 = vmul.f32 0.2, %v4438_v44 }
 0x116   : > { %6788 = vst [vmem:[#allocation78_spill] sm:$0xff] %v4465_v30  ;;  %v4598_v30 = vmul.f32 0.2, %v6833_v62  ;;  %v2809_v62 = vld [vmem:[#allocation4 + $0x4f8] sm:$0xff] }
 0x117   : > { %6789 = vst [vmem:[#allocation79_spill] sm:$0xff] %v4468_v16  ;;  %v6823_v16 = vld [vmem:[#allocation59_spill] sm:$0xff] }
 0x118   : > { %6790 = vst [vmem:[#allocation80_spill] sm:$0xff] %v4471_v45  ;;  %v4579_v3 = vmul.f32 0.2, %v6823_v16  ;;  %v2821_v16 = vld [vmem:[#allocation4 + $0x678] sm:$0xff] }
 0x119   : > { %6791 = vst [vmem:[#allocation81_spill] sm:$0xff] %v4474_v38  ;;  %v4566_v38 = vmul.f32 0.2, %v6817_v50  ;;  %v2827_v50 = vld [vmem:[#allocation4 + $0x738] sm:$0xff] }
 0x11a   : > { %6792 = vst [vmem:[#allocation82_spill] sm:$0xff] %v4477_v18 }
 0x11b   : > { %6793 = vst [vmem:[#allocation83_spill] sm:$0xff] %v4480_v1 }
 0x11c   : > { %6794 = vst [vmem:[#allocation84_spill] sm:$0xff] %v4483_v39  ;;  %v2807_v39 = vld [vmem:[#allocation4 + $0x4b8] sm:$0xff] }
 0x11d   : > { %6795 = vst [vmem:[#allocation85_spill] sm:$0xff] %v4486_v24  ;;  %v6829_v24 = vld [vmem:[#allocation62_spill] sm:$0xff]  ;;  %v1567_v45 = vmul.f32 %v2807_v39, %v4423_v7 }
 0x11e   : > { %6796 = vst [vmem:[#allocation86_spill] sm:$0xff] %v4489_v31  ;;  %v4590_v18 = vmul.f32 0.2, %v6829_v24  ;;  %v1565_v31 = vmul.f32 %v2805_v57, %v4423_v7  ;;  %v2815_v24 = vld [vmem:[#allocation4 + $0x5b8] sm:$0xff] }
 0x11f   : > { %6797 = vst [vmem:[#allocation87_spill] sm:$0xff] %v4492_v60  ;;  %v1569_v60 = vmul.f32 %v2809_v62, %v4423_v7 }
 0x120   : > { %6798 = vst [vmem:[#allocation88_spill] sm:$0xff] %v4497_v46  ;;  %v2806_v46 = vld [vmem:[#allocation4 + $0x498] sm:$0xff] }
 0x121   : > { %6799 = vst [vmem:[#allocation89_spill] sm:$0xff] %v4500_v5  ;;  %v1566_v40 = vmul.f32 %v2806_v46, %v4423_v7  ;;  %v2810_v5 = vld [vmem:[#allocation4 + $0x518] sm:$0xff]  ;;  %v1573_v46 = vmul.f32 %v2813_v43, %v4423_v7 }
 0x122   : > { %6800 = vst [vmem:[#allocation90_spill] sm:$0xff] %v4503_v29  ;;  %v1570_v53 = vmul.f32 %v2810_v5, %v4423_v7  ;;  %v1577_v5 = vmul.f32 %v2817_v0, %v4423_v7  ;;  %v2889_v29 = vld [vmem:[#allocation4 + $0x720] sm:$0xff] }
 0x123   : > { %6801 = vst [vmem:[#allocation91_spill] sm:$0xff] %v4508_v48  ;;  %v2887_v48 = vld [vmem:[#allocation4 + $0x6e0] sm:$0xff] }
 0x124   : > { %6802 = vst [vmem:[#allocation92_spill] sm:$0xff] %v4511_v17  ;;  %v2885_v17 = vld [vmem:[#allocation4 + $0x6a0] sm:$0xff] }
 0x125   : > { %6803 = vst [vmem:[#allocation93_spill] sm:$0xff] %v4514_v33  ;;  %v2883_v33 = vld [vmem:[#allocation4 + $0x660] sm:$0xff] }
 0x126   : > { %6804 = vst [vmem:[#allocation94_spill] sm:$0xff] %v4519_v61  ;;  %v2881_v61 = vld [vmem:[#allocation4 + $0x620] sm:$0xff] }
 0x127   : > { %6805 = vst [vmem:[#allocation95_spill] sm:$0xff] %v4522_v56  ;;  %v2879_v56 = vld [vmem:[#allocation4 + $0x5e0] sm:$0xff] }
 0x128   : > { %6806 = vst [vmem:[#allocation96_spill] sm:$0xff] %v4525_v55  ;;  %v2877_v55 = vld [vmem:[#allocation4 + $0x5a0] sm:$0xff] }
 0x129   : > { %6807 = vst [vmem:[#allocation97_spill] sm:$0xff] %v4530_v12  ;;  %v2875_v12 = vld [vmem:[#allocation4 + $0x560] sm:$0xff] }
 0x12a   : > { %6808 = vst [vmem:[#allocation98_spill] sm:$0xff] %v4533_v28  ;;  %v2873_v28 = vld [vmem:[#allocation4 + $0x520] sm:$0xff] }
 0x12b   : > { %6809 = vst [vmem:[#allocation99_spill] sm:$0xff] %v4536_v52 }
 0x12c   : > { %6810 = vst [vmem:[#allocation100_spill] sm:$0xff] %v4541_v26  ;;  %v4656_v26 = vadd.f32 %v2838_v8, %v1567_v45  ;;  %v2845_v8 = vld [vmem:[#allocation6 + $0x160] sm:$0xff] }
 0x12d   : > { %6811 = vst [vmem:[#allocation101_spill] sm:$0xff] %v4544_v22  ;;  %v2837_v22 = vld [vmem:[#allocation6 + $0x120] sm:$0xff] }
 0x12e   : > { %6812 = vst [vmem:[#allocation102_spill] sm:$0xff] %v4547_v14 }
 0x12f   : > { %6813 = vst [vmem:[#allocation103_spill] sm:$0xff] %v4552_v25  ;;  %v2834_v25 = vld [vmem:[#allocation6 + $0x108] sm:$0xff] }
 0x130   : > { %6814 = vst [vmem:[#allocation104_spill] sm:$0xff] %v4555_v6  ;;  %v2831_v6 = vld [vmem:[#allocation4 + $0x7b8] sm:$0xff]  ;;  %v4648_v36 = vadd.f32 %v2834_v25, %v1563_v54  ;;  %v2841_v54 = vld [vmem:[#allocation6 + $0x140] sm:$0xff] }
 0x131   : > { %6815 = vst [vmem:[#allocation105_spill] sm:$0xff] %v4558_v15  ;;  %v4576_v15 = vmul.f32 0.2, %v6821_v13  ;;  %v2823_v13 = vld [vmem:[#allocation4 + $0x6b8] sm:$0xff]  ;;  %v4662_v25 = vadd.f32 %v2841_v54, %v1570_v53 }
 0x132   : > { %6816 = vst [vmem:[#allocation106_spill] sm:$0xff] %v4563_v19  ;;  %v6825_v19 = vld [vmem:[#allocation60_spill] sm:$0xff]  ;;  %v2848_v53 = vld [vmem:[#allocation6 + $0x178] sm:$0xff] }
 0x133   : > { %6818 = vst [vmem:[#allocation107_spill] sm:$0xff] %v4566_v38  ;;  %v4584_v1 = vmul.f32 0.2, %v6825_v19  ;;  %v2819_v19 = vld [vmem:[#allocation4 + $0x638] sm:$0xff]  ;;  %v4676_v54 = vadd.f32 %v2848_v53, %v1577_v5  ;;  %v2855_v5 = vld [vmem:[#allocation6 + $0x1b0] sm:$0xff] }
 0x134   : > { %6820 = vst [vmem:[#allocation108_spill] sm:$0xff] %v4573_v41  ;;  %v2826_v41 = vld [vmem:[#allocation4 + $0x718] sm:$0xff] }
 0x135   : > { %6822 = vst [vmem:[#allocation109_spill] sm:$0xff] %v4576_v15  ;;  %v2824_v15 = vld [vmem:[#allocation4 + $0x6d8] sm:$0xff] }
 0x136   : > { %6824 = vst [vmem:[#allocation110_spill] sm:$0xff] %v4579_v3  ;;  %v2822_v3 = vld [vmem:[#allocation4 + $0x698] sm:$0xff]  ;;  %v1584_v0 = vmul.f32 %v2824_v15, %v4423_v7 }
 0x137   : > { %6826 = vst [vmem:[#allocation111_spill] sm:$0xff] %v4584_v1  ;;  %v2820_v1 = vld [vmem:[#allocation4 + $0x658] sm:$0xff] }
 0x138   : > { %6828 = vst [vmem:[#allocation112_spill] sm:$0xff] %v4587_v47  ;;  %v2818_v47 = vld [vmem:[#allocation4 + $0x618] sm:$0xff]  ;;  %v1580_v43 = vmul.f32 %v2820_v1, %v4423_v7  ;;  %v1587_v1 = vmul.f32 %v2827_v50, %v4423_v7  ;;  %v4690_v53 = vadd.f32 %v2855_v5, %v1584_v0  ;;  %v2861_v0 = vld [vmem:[#allocation6 + $0x1e0] sm:$0xff] }
 0x139   : > { %6830 = vst [vmem:[#allocation113_spill] sm:$0xff] %v4590_v18  ;;  %v2816_v18 = vld [vmem:[#allocation4 + $0x5d8] sm:$0xff]  ;;  %v1578_v34 = vmul.f32 %v2818_v47, %v4423_v7  ;;  %v1585_v47 = vmul.f32 %v2825_v58, %v4423_v7  ;;  %v4640_v58 = vmul.f32 %v2831_v6, %v4423_v7  ;;  %v4654_v6 = vadd.f32 %v2837_v22, %v1566_v40 }
 0x13a   : > { %6832 = vst [vmem:[#allocation114_spill] sm:$0xff] %v4595_v49  ;;  %v2814_v49 = vld [vmem:[#allocation4 + $0x598] sm:$0xff]  ;;  %v1576_v62 = vmul.f32 %v2816_v18, %v4423_v7  ;;  %v1583_v18 = vmul.f32 %v2823_v13, %v4423_v7 }
 0x13b   : > { %6834 = vst [vmem:[#allocation115_spill] sm:$0xff] %v4598_v30  ;;  %v2812_v30 = vld [vmem:[#allocation4 + $0x558] sm:$0xff]  ;;  %v1574_v39 = vmul.f32 %v2814_v49, %v4423_v7  ;;  %v1581_v49 = vmul.f32 %v2821_v16, %v4423_v7 }
 0x13c   : > { %6836 = vst [vmem:[#allocation116_spill] sm:$0xff] %v4601_v27  ;;  %v1568_v27 = vmul.f32 %v2808_v23, %v4423_v7  ;;  %v1572_v57 = vmul.f32 %v2812_v30, %v4423_v7  ;;  %v1575_v23 = vmul.f32 %v2815_v24, %v4423_v7  ;;  %v1579_v30 = vmul.f32 %v2819_v19, %v4423_v7  ;;  %v2828_v38 = vld [vmem:[#allocation4 + $0x758] sm:$0xff] }
 0x13d   : > { %v1582_v24 = vmul.f32 %v2822_v3, %v4423_v7  ;;  %v1586_v19 = vmul.f32 %v2826_v41, %v4423_v7  ;;  %v4631_v16 = vmul.f32 %v2828_v38, %v4423_v7  ;;  %v2829_v3 = vld [vmem:[#allocation4 + $0x778] sm:$0xff]  ;;  %v4670_v45 = vadd.f32 %v2845_v8, %v1574_v39 }
 0x13e   : > { %v4634_v44 = vmul.f32 %v2829_v3, %v4423_v7  ;;  %v2830_v13 = vld [vmem:[#allocation4 + $0x798] sm:$0xff]  ;;  %v2835_v3 = vld [vmem:[#allocation6 + $0x110] sm:$0xff] }
 0x13f   : > { %v4637_v15 = vmul.f32 %v2830_v13, %v4423_v7  ;;  %v2832_v41 = vld [vmem:[#allocation4 + $0x7d8] sm:$0xff]  ;;  %v4650_v14 = vadd.f32 %v2835_v3, %v1564_v21  ;;  %v2842_v21 = vld [vmem:[#allocation6 + $0x148] sm:$0xff] }
 0x140   : > { %v4643_v35 = vmul.f32 %v2832_v41, %v4423_v7  ;;  %v2833_v50 = vld [vmem:[#allocation4 + $0x7f8] sm:$0xff]  ;;  %v2839_v41 = vld [vmem:[#allocation6 + $0x130] sm:$0xff]  ;;  %v4664_v3 = vadd.f32 %v2842_v21, %v1571_v11  ;;  %v2849_v11 = vld [vmem:[#allocation6 + $0x180] sm:$0xff] }
 0x141   : > { %v4646_v38 = vmul.f32 %v2833_v50, %v4423_v7  ;;  %v2836_v13 = vld [vmem:[#allocation6 + $0x118] sm:$0xff]  ;;  %v4658_v37 = vadd.f32 %v2839_v41, %v1568_v27  ;;  %v2846_v27 = vld [vmem:[#allocation6 + $0x168] sm:$0xff]  ;;  %v4678_v21 = vadd.f32 %v2849_v11, %v1578_v34 }
 0x142   : > { %v4652_v10 = vadd.f32 %v2836_v13, %v1565_v31  ;;  %v2840_v50 = vld [vmem:[#allocation6 + $0x138] sm:$0xff]  ;;  %v2843_v31 = vld [vmem:[#allocation6 + $0x150] sm:$0xff]  ;;  %v4672_v41 = vadd.f32 %v2846_v27, %v1575_v23  ;;  %v2853_v23 = vld [vmem:[#allocation6 + $0x1a0] sm:$0xff] }
 0x143   : > { %v4660_v7 = vadd.f32 %v2840_v50, %v1569_v60  ;;  %v4666_v13 = vadd.f32 %v2843_v31, %v1572_v57  ;;  %v2844_v40 = vld [vmem:[#allocation6 + $0x158] sm:$0xff]  ;;  %v2847_v60 = vld [vmem:[#allocation6 + $0x170] sm:$0xff]  ;;  %v2850_v57 = vld [vmem:[#allocation6 + $0x188] sm:$0xff]  ;;  %v4686_v27 = vadd.f32 %v2853_v23, %v1582_v24 }
 0x144   : > { %v4668_v22 = vadd.f32 %v2844_v40, %v1573_v46  ;;  %v4674_v50 = vadd.f32 %v2847_v60, %v1576_v62  ;;  %v4680_v31 = vadd.f32 %v2850_v57, %v1579_v30  ;;  %v2851_v46 = vld [vmem:[#allocation6 + $0x190] sm:$0xff]  ;;  %v2852_v39 = vld [vmem:[#allocation6 + $0x198] sm:$0xff]  ;;  %v2854_v62 = vld [vmem:[#allocation6 + $0x1a8] sm:$0xff] }
 0x145   : > { %v4682_v40 = vadd.f32 %v2851_v46, %v1580_v43  ;;  %v4684_v8 = vadd.f32 %v2852_v39, %v1581_v49  ;;  %v4688_v60 = vadd.f32 %v2854_v62, %v1583_v18  ;;  %v2856_v34 = vld [vmem:[#allocation6 + $0x1b8] sm:$0xff]  ;;  %v2857_v30 = vld [vmem:[#allocation6 + $0x1c0] sm:$0xff]  ;;  %v2858_v43 = vld [vmem:[#allocation6 + $0x1c8] sm:$0xff] }
 0x146   : > { %v4692_v11 = vadd.f32 %v2856_v34, %v1585_v47  ;;  %v4694_v57 = vadd.f32 %v2857_v30, %v1586_v19  ;;  %v4696_v46 = vadd.f32 %v2858_v43, %v1587_v1  ;;  %v4699_v49 = vld [vmem:[%s3364_s12 + $0x4] ss:$0 sm:$0xff]  ;;  %v2859_v39 = vld [vmem:[#allocation6 + $0x1d0] sm:$0xff]  ;;  %v2860_v18 = vld [vmem:[#allocation6 + $0x1d8] sm:$0xff]  ;;  %v4708_v47 = vadd.f32 %v2861_v0, %v4637_v15 }
 0x147   : > { %6837 = vst [vmem:[#allocation117_spill] sm:$0xff] %v4699_v49  ;;  %v4702_v24 = vadd.f32 %v2859_v39, %v4631_v16  ;;  %v4705_v23 = vadd.f32 %v2860_v18, %v4634_v44  ;;  %v2862_v62 = vld [vmem:[#allocation6 + $0x1e8] sm:$0xff]  ;;  %v2863_v1 = vld [vmem:[#allocation6 + $0x1f0] sm:$0xff]  ;;  %v2864_v34 = vld [vmem:[#allocation6 + $0x1f8] sm:$0xff] }
 0x148   : > { %6840 = vst [vmem:[#allocation120_spill] sm:$0xff] %v4708_v47  ;;  %v4711_v19 = vadd.f32 %v2862_v62, %v4640_v58  ;;  %v4714_v5 = vadd.f32 %v2863_v1, %v4643_v35  ;;  %v4717_v16 = vadd.f32 %v2864_v34, %v4646_v38  ;;  %v2865_v30 = vld [vmem:[#allocation4 + $0x420] sm:$0xff] }
 0x149   : > { %6838 = vst [vmem:[#allocation118_spill] sm:$0xff] %v4702_v24  ;;  %v1693_v44 = vmul.f32 %v2865_v30, %v4699_v49  ;;  %v2866_v43 = vld [vmem:[#allocation4 + $0x440] sm:$0xff]  ;;  %v1700_v30 = vmul.f32 %v2872_v20, %v4699_v49  ;;  %v1707_v20 = vmul.f32 %v2879_v56, %v4699_v49  ;;  %v1714_v56 = vmul.f32 %v2886_v9, %v4699_v49 }
 0x14a   : > { %6839 = vst [vmem:[#allocation119_spill] sm:$0xff] %v4705_v23  ;;  %v1694_v39 = vmul.f32 %v2866_v43, %v4699_v49  ;;  %v2867_v15 = vld [vmem:[#allocation4 + $0x460] sm:$0xff]  ;;  %v1701_v43 = vmul.f32 %v2873_v28, %v4699_v49  ;;  %v1708_v28 = vmul.f32 %v2880_v63, %v4699_v49  ;;  %v1715_v63 = vmul.f32 %v2887_v48, %v4699_v49 }
 0x14b   : > { %6841 = vst [vmem:[#allocation121_spill] sm:$0xff] %v4711_v19  ;;  %v1695_v18 = vmul.f32 %v2867_v15, %v4699_v49  ;;  %v2868_v0 = vld [vmem:[#allocation4 + $0x480] sm:$0xff]  ;;  %v1702_v15 = vmul.f32 %v2874_v59, %v4699_v49  ;;  %v1709_v59 = vmul.f32 %v2881_v61, %v4699_v49  ;;  %v1716_v61 = vmul.f32 %v2888_v32, %v4699_v49 }
 0x14c   : > { %6842 = vst [vmem:[#allocation122_spill] sm:$0xff] %v4714_v5  ;;  %v1696_v58 = vmul.f32 %v2868_v0, %v4699_v49  ;;  %v2869_v62 = vld [vmem:[#allocation4 + $0x4a0] sm:$0xff]  ;;  %v1703_v0 = vmul.f32 %v2875_v12, %v4699_v49  ;;  %v1710_v12 = vmul.f32 %v2882_v4, %v4699_v49  ;;  %v1717_v4 = vmul.f32 %v2889_v29, %v4699_v49 }
 0x14d   : > { %6843 = vst [vmem:[#allocation123_spill] sm:$0xff] %v4717_v16  ;;  %v1697_v35 = vmul.f32 %v2869_v62, %v4699_v49  ;;  %v2870_v1 = vld [vmem:[#allocation4 + $0x4c0] sm:$0xff]  ;;  %v1704_v62 = vmul.f32 %v2876_v42, %v4699_v49  ;;  %v1711_v42 = vmul.f32 %v2883_v33, %v4699_v49  ;;  %v4751_v29 = vadd.f32 %v1693_v44, %v4648_v36 }
 0x14e   : > { %v1698_v52 = vmul.f32 %v2870_v1, %v4699_v49  ;;  %v2871_v38 = vld [vmem:[#allocation4 + $0x4e0] sm:$0xff]  ;;  %v1705_v1 = vmul.f32 %v2877_v55, %v4699_v49  ;;  %v1712_v55 = vmul.f32 %v2884_v2, %v4699_v49  ;;  %v4772_v36 = vadd.f32 %v1700_v30, %v4662_v25  ;;  %v6881_v30 = vld [vmem:[#allocation25_spill] sm:$0xff] }
 0x14f   : > { %v1699_v34 = vmul.f32 %v2871_v38, %v4699_v49  ;;  %v1706_v38 = vmul.f32 %v2878_v51, %v4699_v49  ;;  %v1713_v51 = vmul.f32 %v2885_v17, %v4699_v49  ;;  %v2890_v16 = vld [vmem:[#allocation4 + $0x740] sm:$0xff]  ;;  %v4796_v25 = vadd.f32 %v1708_v28, %v4678_v21 }
 0x150   : > { %v1718_v33 = vmul.f32 %v2890_v16, %v4699_v49  ;;  %v2891_v5 = vld [vmem:[#allocation4 + $0x760] sm:$0xff]  ;;  %v4754_v16 = vadd.f32 %v1694_v39, %v4650_v14  ;;  %6849 = vst [vmem:[#allocation129_spill] sm:$0xff] %v4772_v36  ;;  %v4775_v14 = vadd.f32 %v1701_v43, %v4664_v3  ;;  %v4799_v3 = vadd.f32 %v1709_v59, %v4680_v31  ;;  %v6889_v59 = vld [vmem:[#allocation28_spill] sm:$0xff]  ;;  %v2952_v36 = vld [vmem:[#allocation4 + $0x378] sm:$0xff] }
 0x151   : > { %v1719_v2 = vmul.f32 %v2891_v5, %v4699_v49  ;;  %v2892_v19 = vld [vmem:[#allocation4 + $0x780] sm:$0xff]  ;;  %v4757_v5 = vadd.f32 %v1695_v18, %v4652_v10  ;;  %v4778_v10 = vadd.f32 %v1702_v15, %v4666_v13  ;;  %6857 = vst [vmem:[#allocation137_spill] sm:$0xff] %v4796_v25  ;;  %v4802_v13 = vadd.f32 %v1710_v12, %v4682_v40  ;;  %v6867_v40 = vld [vmem:[#allocation118_spill] sm:$0xff] }
 0x152   : > { %v1720_v17 = vmul.f32 %v2892_v19, %v4699_v49  ;;  %v2893_v47 = vld [vmem:[#allocation4 + $0x7a0] sm:$0xff]  ;;  %v4760_v19 = vadd.f32 %v1696_v58, %v4654_v6  ;;  %6850 = vst [vmem:[#allocation130_spill] sm:$0xff] %v4775_v14  ;;  %v4781_v6 = vadd.f32 %v1703_v0, %v4668_v22  ;;  %v4805_v22 = vadd.f32 %v1711_v42, %v4684_v8  ;;  %v6883_v15 = vld [vmem:[#allocation26_spill] sm:$0xff]  ;;  %v6891_v42 = vld [vmem:[#allocation29_spill] sm:$0xff] }
 0x153   : > { %v1721_v9 = vmul.f32 %v2893_v47, %v4699_v49  ;;  %v2894_v23 = vld [vmem:[#allocation4 + $0x7c0] sm:$0xff]  ;;  %6844 = vst [vmem:[#allocation124_spill] sm:$0xff] %v4757_v5  ;;  %v4763_v47 = vadd.f32 %v1697_v35, %v4656_v26  ;;  %v4784_v26 = vadd.f32 %v1704_v62, %v4670_v45  ;;  %v4808_v45 = vadd.f32 %v1712_v55, %v4686_v27  ;;  %v6911_v62 = vld [vmem:[#allocation12_spill] sm:$0xff]  ;;  %v2945_v25 = vld [vmem:[#allocation4 + $0x298] sm:$0xff] }
 0x154   : > { %v1722_v48 = vmul.f32 %v2894_v23, %v4699_v49  ;;  %v2895_v24 = vld [vmem:[#allocation4 + $0x7e0] sm:$0xff]  ;;  %6845 = vst [vmem:[#allocation125_spill] sm:$0xff] %v4760_v19  ;;  %v4766_v23 = vadd.f32 %v1698_v52, %v4658_v37  ;;  %v4787_v37 = vadd.f32 %v1705_v1, %v4672_v41  ;;  %v4793_v52 = vadd.f32 %v1707_v20, %v4676_v54  ;;  %v2949_v19 = vld [vmem:[#allocation4 + $0x318] sm:$0xff] }
 0x155   : > { %v1723_v32 = vmul.f32 %v2895_v24, %v4699_v49  ;;  %6846 = vst [vmem:[#allocation126_spill] sm:$0xff] %v4763_v47  ;;  %v4769_v24 = vadd.f32 %v1699_v34, %v4660_v7  ;;  %v4790_v7 = vadd.f32 %v1706_v38, %v4674_v50  ;;  %v4811_v41 = vadd.f32 %v1713_v51, %v4688_v60  ;;  %v6869_v27 = vld [vmem:[#allocation119_spill] sm:$0xff]  ;;  %v6871_v60 = vld [vmem:[#allocation120_spill] sm:$0xff]  ;;  %v6913_v49 = vld [vmem:[#allocation13_spill] sm:$0xff] }
 0x156   : > { %6847 = vst [vmem:[#allocation127_spill] sm:$0xff] %v4766_v23  ;;  %v4814_v50 = vadd.f32 %v1714_v56, %v4690_v53  ;;  %v4817_v54 = vadd.f32 %v1715_v63, %v4692_v11  ;;  %v4820_v21 = vadd.f32 %v1716_v61, %v4694_v57  ;;  %v4823_v31 = vadd.f32 %v1717_v4, %v4696_v46  ;;  %v6873_v53 = vld [vmem:[#allocation121_spill] sm:$0xff]  ;;  %v6875_v11 = vld [vmem:[#allocation122_spill] sm:$0xff]  ;;  %v6877_v57 = vld [vmem:[#allocation123_spill] sm:$0xff] }
 0x157   : > { %6848 = vst [vmem:[#allocation128_spill] sm:$0xff] %v4769_v24  ;;  %v4826_v8 = vadd.f32 %v1718_v33, %v6867_v40  ;;  %v4829_v44 = vadd.f32 %v1719_v2, %v6869_v27  ;;  %v4832_v39 = vadd.f32 %v1720_v17, %v6871_v60  ;;  %v4835_v18 = vadd.f32 %v1721_v9, %v6873_v53  ;;  %v6879_v46 = vld [vmem:[#allocation24_spill] sm:$0xff]  ;;  %v6887_v20 = vld [vmem:[#allocation27_spill] sm:$0xff]  ;;  %v6895_v61 = vld [vmem:[#allocation30_spill] sm:$0xff] }
 0x158   : > { %6851 = vst [vmem:[#allocation131_spill] sm:$0xff] %v4778_v10  ;;  %v4838_v58 = vadd.f32 %v1722_v48, %v6875_v11  ;;  %v4841_v35 = vadd.f32 %v1723_v32, %v6877_v57  ;;  %v4844_v34 = vmul.f32 0.2, %v6879_v46  ;;  %v4847_v43 = vmul.f32 0.2, %v6881_v30  ;;  %v6897_v33 = vld [vmem:[#allocation31_spill] sm:$0xff] }
 0x159   : > { %6852 = vst [vmem:[#allocation132_spill] sm:$0xff] %v4781_v6  ;;  %v4850_v0 = vmul.f32 0.2, %v6883_v15  ;;  %v4855_v28 = vmul.f32 0.2, %v6887_v20  ;;  %v6899_v17 = vld [vmem:[#allocation32_spill] sm:$0xff] }
 0x15a   : > { %6853 = vst [vmem:[#allocation133_spill] sm:$0xff] %v4784_v26  ;;  %v4858_v12 = vmul.f32 0.2, %v6889_v59  ;;  %v4861_v55 = vmul.f32 0.2, %v6891_v42  ;;  %v6903_v27 = vld [vmem:[#allocation33_spill] sm:$0xff] }
 0x15b   : > { %6854 = vst [vmem:[#allocation134_spill] sm:$0xff] %v4787_v37  ;;  %v4866_v4 = vmul.f32 0.2, %v6895_v61  ;;  %v4869_v2 = vmul.f32 0.2, %v6897_v33  ;;  %v6905_v53 = vld [vmem:[#allocation34_spill] sm:$0xff] }
 0x15c   : > { %6855 = vst [vmem:[#allocation135_spill] sm:$0xff] %v4790_v7  ;;  %v4872_v9 = vmul.f32 0.2, %v6899_v17  ;;  %v4877_v60 = vmul.f32 0.2, %v6903_v27  ;;  %v6907_v57 = vld [vmem:[#allocation35_spill] sm:$0xff] }
 0x15d   : > { %6856 = vst [vmem:[#allocation136_spill] sm:$0xff] %v4793_v52  ;;  %v4880_v11 = vmul.f32 0.2, %v6905_v53  ;;  %v4883_v63 = vmul.f32 0.2, %v6907_v57  ;;  %v2896_v24 = vld [vmem:[#allocation4 + $0x428] sm:$0xff] }
 0x15e   : > { %6858 = vst [vmem:[#allocation138_spill] sm:$0xff] %v4799_v3  ;;  %v4888_v1 = vmul.f32 0.2, %v6911_v62  ;;  %v2911_v62 = vld [vmem:[#allocation4 + $0x608] sm:$0xff]  ;;  %v6973_v20 = vld [vmem:[#allocation125_spill] sm:$0xff]  ;;  %v6975_v15 = vld [vmem:[#allocation127_spill] sm:$0xff] }
 0x15f   : > { %6859 = vst [vmem:[#allocation139_spill] sm:$0xff] %v4802_v13  ;;  %v6931_v13 = vld [vmem:[#allocation21_spill] sm:$0xff]  ;;  %v2913_v57 = vld [vmem:[#allocation4 + $0x648] sm:$0xff]  ;;  %v2934_v30 = vld [vmem:[#allocation4 + $0x138] sm:$0xff] }
 0x160   : > { %6860 = vst [vmem:[#allocation140_spill] sm:$0xff] %v4805_v22  ;;  %v2915_v53 = vld [vmem:[#allocation4 + $0x688] sm:$0xff]  ;;  %v2937_v46 = vld [vmem:[#allocation4 + $0x198] sm:$0xff] }
 0x161   : > { %6861 = vst [vmem:[#allocation141_spill] sm:$0xff] %v4808_v45  ;;  %v6929_v45 = vld [vmem:[#allocation20_spill] sm:$0xff]  ;;  %v2938_v38 = vld [vmem:[#allocation4 + $0x1b8] sm:$0xff] }
 0x162   : > { %6862 = vst [vmem:[#allocation142_spill] sm:$0xff] %v4811_v41  ;;  %v4913_v22 = vmul.f32 0.2, %v6929_v45  ;;  %v2904_v45 = vld [vmem:[#allocation4 + $0x528] sm:$0xff]  ;;  %v2939_v51 = vld [vmem:[#allocation4 + $0x1d8] sm:$0xff] }
 0x163   : > { %6863 = vst [vmem:[#allocation143_spill] sm:$0xff] %v4814_v50  ;;  %v6927_v50 = vld [vmem:[#allocation19_spill] sm:$0xff]  ;;  %v2917_v27 = vld [vmem:[#allocation4 + $0x6c8] sm:$0xff]  ;;  %v2940_v6 = vld [vmem:[#allocation4 + $0x1f8] sm:$0xff] }
 0x164   : > { %6864 = vst [vmem:[#allocation144_spill] sm:$0xff] %v4817_v54  ;;  %v4910_v41 = vmul.f32 0.2, %v6927_v50  ;;  %v2905_v50 = vld [vmem:[#allocation4 + $0x548] sm:$0xff]  ;;  %v2941_v10 = vld [vmem:[#allocation4 + $0x218] sm:$0xff] }
 0x165   : > { %6865 = vst [vmem:[#allocation145_spill] sm:$0xff] %v4820_v21  ;;  %v6923_v21 = vld [vmem:[#allocation18_spill] sm:$0xff]  ;;  %v2919_v17 = vld [vmem:[#allocation4 + $0x708] sm:$0xff] }
 0x166   : > { %6866 = vst [vmem:[#allocation146_spill] sm:$0xff] %v4823_v31  ;;  %v4905_v56 = vmul.f32 0.2, %v6923_v21  ;;  %v2906_v21 = vld [vmem:[#allocation4 + $0x568] sm:$0xff]  ;;  %v2942_v7 = vld [vmem:[#allocation4 + $0x238] sm:$0xff] }
 0x167   : > { %6868 = vst [vmem:[#allocation118_spill] sm:$0xff] %v4826_v8  ;;  %v6921_v8 = vld [vmem:[#allocation17_spill] sm:$0xff]  ;;  %v2921_v33 = vld [vmem:[#allocation4 + $0x748] sm:$0xff]  ;;  %v2943_v37 = vld [vmem:[#allocation4 + $0x258] sm:$0xff] }
 0x168   : > { %6870 = vst [vmem:[#allocation119_spill] sm:$0xff] %v4829_v44  ;;  %v4902_v31 = vmul.f32 0.2, %v6921_v8  ;;  %v2907_v8 = vld [vmem:[#allocation4 + $0x588] sm:$0xff]  ;;  %v2944_v3 = vld [vmem:[#allocation4 + $0x278] sm:$0xff] }
 0x169   : > { %6872 = vst [vmem:[#allocation120_spill] sm:$0xff] %v4832_v39  ;;  %v6919_v39 = vld [vmem:[#allocation16_spill] sm:$0xff]  ;;  %v2947_v48 = vld [vmem:[#allocation4 + $0x2d8] sm:$0xff] }
 0x16a   : > { %6874 = vst [vmem:[#allocation121_spill] sm:$0xff] %v4835_v18  ;;  %v4899_v44 = vmul.f32 0.2, %v6919_v39  ;;  %v4916_v18 = vmul.f32 0.2, %v6931_v13  ;;  %v2908_v39 = vld [vmem:[#allocation4 + $0x5a8] sm:$0xff] }
 0x16b   : > { %6876 = vst [vmem:[#allocation122_spill] sm:$0xff] %v4838_v58  ;;  %v6915_v58 = vld [vmem:[#allocation14_spill] sm:$0xff]  ;;  %v2922_v61 = vld [vmem:[#allocation4 + $0x768] sm:$0xff] }
 0x16c   : > { %6878 = vst [vmem:[#allocation123_spill] sm:$0xff] %v4841_v35  ;;  %v4891_v35 = vmul.f32 0.2, %v6913_v49  ;;  %v4894_v40 = vmul.f32 0.2, %v6915_v58  ;;  %v2897_v49 = vld [vmem:[#allocation4 + $0x448] sm:$0xff] }
 0x16d   : > { %6880 = vst [vmem:[#allocation147_spill] sm:$0xff] %v4844_v34  ;;  %v2909_v58 = vld [vmem:[#allocation4 + $0x5c8] sm:$0xff]  ;;  %v2948_v23 = vld [vmem:[#allocation4 + $0x2f8] sm:$0xff] }
 0x16e   : > { %6882 = vst [vmem:[#allocation148_spill] sm:$0xff] %v4847_v43  ;;  %v2924_v42 = vld [vmem:[#allocation4 + $0x7a8] sm:$0xff]  ;;  %v2950_v14 = vld [vmem:[#allocation4 + $0x338] sm:$0xff] }
 0x16f   : > { %6884 = vst [vmem:[#allocation149_spill] sm:$0xff] %v4850_v0  ;;  %v2926_v59 = vld [vmem:[#allocation4 + $0x7e8] sm:$0xff]  ;;  %v6974_v0 = vld [vmem:[#allocation126_spill] sm:$0xff] }
 0x170   : > { %6888 = vst [vmem:[#allocation150_spill] sm:$0xff] %v4855_v28  ;;  %v6972_v28 = vld [vmem:[#allocation124_spill] sm:$0xff]  ;;  %v2951_v47 = vld [vmem:[#allocation4 + $0x358] sm:$0xff] }
 0x171   : > { %6890 = vst [vmem:[#allocation151_spill] sm:$0xff] %v4858_v12  ;;  %v2925_v12 = vld [vmem:[#allocation4 + $0x7c8] sm:$0xff] }
 0x172   : > { %6892 = vst [vmem:[#allocation152_spill] sm:$0xff] %v4861_v55  ;;  %v2923_v55 = vld [vmem:[#allocation4 + $0x788] sm:$0xff] }
 0x173   : > { %6896 = vst [vmem:[#allocation153_spill] sm:$0xff] %v4866_v4  ;;  %v4985_v4 = vld [vmem:[%s3364_s12 + $0x5] ss:$0 sm:$0xff]  ;;  %v6976_v43 = vld [vmem:[#allocation128_spill] sm:$0xff] }
 0x174   : > { %6898 = vst [vmem:[#allocation154_spill] sm:$0xff] %v4869_v2  ;;  %v1824_v13 = vmul.f32 %v2897_v49, %v4985_v4  ;;  %v1831_v49 = vmul.f32 %v2904_v45, %v4985_v4  ;;  %v1838_v45 = vmul.f32 %v2911_v62, %v4985_v4  ;;  %v2920_v2 = vld [vmem:[#allocation4 + $0x728] sm:$0xff] }
 0x175   : > { %6900 = vst [vmem:[#allocation155_spill] sm:$0xff] %v4872_v9  ;;  %v2918_v9 = vld [vmem:[#allocation4 + $0x6e8] sm:$0xff] }
 0x176   : > { %6904 = vst [vmem:[#allocation156_spill] sm:$0xff] %v4877_v60  ;;  %v2916_v60 = vld [vmem:[#allocation4 + $0x6a8] sm:$0xff]  ;;  %v1845_v62 = vmul.f32 %v2918_v9, %v4985_v4  ;;  %v1852_v9 = vmul.f32 %v2925_v12, %v4985_v4 }
 0x177   : > { %6906 = vst [vmem:[#allocation157_spill] sm:$0xff] %v4880_v11  ;;  %v2914_v11 = vld [vmem:[#allocation4 + $0x668] sm:$0xff] }
 0x178   : > { %6908 = vst [vmem:[#allocation158_spill] sm:$0xff] %v4883_v63  ;;  %v2912_v63 = vld [vmem:[#allocation4 + $0x628] sm:$0xff] }
 0x179   : > { %6912 = vst [vmem:[#allocation159_spill] sm:$0xff] %v4888_v1  ;;  %v2910_v1 = vld [vmem:[#allocation4 + $0x5e8] sm:$0xff] }
 0x17a   : > { %6914 = vst [vmem:[#allocation160_spill] sm:$0xff] %v4891_v35  ;;  %v1823_v35 = vmul.f32 %v2896_v24, %v4985_v4 }
 0x17b   : > { %6916 = vst [vmem:[#allocation161_spill] sm:$0xff] %v4894_v40  ;;  %v2898_v40 = vld [vmem:[#allocation4 + $0x468] sm:$0xff] }
 0x17c   : > { %6920 = vst [vmem:[#allocation162_spill] sm:$0xff] %v4899_v44  ;;  %v1825_v5 = vmul.f32 %v2898_v40, %v4985_v4  ;;  %v2899_v44 = vld [vmem:[#allocation4 + $0x488] sm:$0xff]  ;;  %v1832_v40 = vmul.f32 %v2905_v50, %v4985_v4  ;;  %v1839_v50 = vmul.f32 %v2912_v63, %v4985_v4  ;;  %v1846_v63 = vmul.f32 %v2919_v17, %v4985_v4 }
 0x17d   : > { %6922 = vst [vmem:[#allocation163_spill] sm:$0xff] %v4902_v31  ;;  %v1826_v32 = vmul.f32 %v2899_v44, %v4985_v4  ;;  %v2900_v31 = vld [vmem:[#allocation4 + $0x4a8] sm:$0xff]  ;;  %v1833_v44 = vmul.f32 %v2906_v21, %v4985_v4  ;;  %v1840_v21 = vmul.f32 %v2913_v57, %v4985_v4  ;;  %v1847_v57 = vmul.f32 %v2920_v2, %v4985_v4 }
 0x17e   : > { %6924 = vst [vmem:[#allocation164_spill] sm:$0xff] %v4905_v56  ;;  %v1827_v52 = vmul.f32 %v2900_v31, %v4985_v4  ;;  %v2901_v56 = vld [vmem:[#allocation4 + $0x4c8] sm:$0xff]  ;;  %v1834_v31 = vmul.f32 %v2907_v8, %v4985_v4  ;;  %v1841_v8 = vmul.f32 %v2914_v11, %v4985_v4  ;;  %v1848_v11 = vmul.f32 %v2921_v33, %v4985_v4 }
 0x17f   : > { %6928 = vst [vmem:[#allocation165_spill] sm:$0xff] %v4910_v41  ;;  %v1828_v26 = vmul.f32 %v2901_v56, %v4985_v4  ;;  %v2902_v41 = vld [vmem:[#allocation4 + $0x4e8] sm:$0xff]  ;;  %v1835_v56 = vmul.f32 %v2908_v39, %v4985_v4  ;;  %v1842_v39 = vmul.f32 %v2915_v53, %v4985_v4  ;;  %v1849_v53 = vmul.f32 %v2922_v61, %v4985_v4 }
 0x180   : > { %6930 = vst [vmem:[#allocation166_spill] sm:$0xff] %v4913_v22  ;;  %v1829_v54 = vmul.f32 %v2902_v41, %v4985_v4  ;;  %v2903_v22 = vld [vmem:[#allocation4 + $0x508] sm:$0xff]  ;;  %v1836_v41 = vmul.f32 %v2909_v58, %v4985_v4  ;;  %v1843_v58 = vmul.f32 %v2916_v60, %v4985_v4  ;;  %v1850_v60 = vmul.f32 %v2923_v55, %v4985_v4 }
 0x181   : > { %6932 = vst [vmem:[#allocation167_spill] sm:$0xff] %v4916_v18  ;;  %v1830_v24 = vmul.f32 %v2903_v22, %v4985_v4  ;;  %v1837_v22 = vmul.f32 %v2910_v1, %v4985_v4  ;;  %v1844_v1 = vmul.f32 %v2917_v27, %v4985_v4  ;;  %v1851_v27 = vmul.f32 %v2924_v42, %v4985_v4  ;;  %v2946_v18 = vld [vmem:[#allocation4 + $0x2b8] sm:$0xff] }
 0x182   : > { %6971 = vst [vmem:[#allocation168_spill] sm:$0xff] %v4985_v4  ;;  %v1853_v17 = vmul.f32 %v2926_v59, %v4985_v4  ;;  %v5031_v2 = vadd.f32 %v1823_v35, %v4751_v29  ;;  %v5034_v33 = vadd.f32 %v1824_v13, %v4754_v16  ;;  %v5037_v61 = vadd.f32 %v1825_v5, %v6972_v28  ;;  %v6977_v29 = vld [vmem:[#allocation129_spill] sm:$0xff]  ;;  %v6978_v16 = vld [vmem:[#allocation130_spill] sm:$0xff]  ;;  %v6979_v5 = vld [vmem:[#allocation131_spill] sm:$0xff] }
 0x183   : > { %v5040_v55 = vadd.f32 %v1826_v32, %v6973_v20  ;;  %v5043_v42 = vadd.f32 %v1827_v52, %v6974_v0  ;;  %v5046_v12 = vadd.f32 %v1828_v26, %v6975_v15  ;;  %v5049_v59 = vadd.f32 %v1829_v54, %v6976_v43  ;;  %v6980_v20 = vld [vmem:[#allocation132_spill] sm:$0xff]  ;;  %v6981_v52 = vld [vmem:[#allocation133_spill] sm:$0xff]  ;;  %v6982_v26 = vld [vmem:[#allocation134_spill] sm:$0xff] }
 0x184   : > { %v5052_v35 = vadd.f32 %v1830_v24, %v6977_v29  ;;  %v5055_v13 = vadd.f32 %v1831_v49, %v6978_v16  ;;  %v5058_v28 = vadd.f32 %v1832_v40, %v6979_v5  ;;  %v5061_v32 = vadd.f32 %v1833_v44, %v6980_v20  ;;  %v6983_v54 = vld [vmem:[#allocation135_spill] sm:$0xff]  ;;  %v6984_v24 = vld [vmem:[#allocation136_spill] sm:$0xff]  ;;  %v6985_v49 = vld [vmem:[#allocation137_spill] sm:$0xff] }
 0x185   : > { %v5064_v0 = vadd.f32 %v1834_v31, %v6981_v52  ;;  %v5067_v15 = vadd.f32 %v1835_v56, %v6982_v26  ;;  %v5070_v43 = vadd.f32 %v1836_v41, %v6983_v54  ;;  %v5073_v29 = vadd.f32 %v1837_v22, %v6984_v24  ;;  %v6986_v40 = vld [vmem:[#allocation138_spill] sm:$0xff]  ;;  %v6987_v44 = vld [vmem:[#allocation139_spill] sm:$0xff]  ;;  %v6988_v31 = vld [vmem:[#allocation140_spill] sm:$0xff] }
 0x186   : > { %v5076_v16 = vadd.f32 %v1838_v45, %v6985_v49  ;;  %v5079_v5 = vadd.f32 %v1839_v50, %v6986_v40  ;;  %v5082_v20 = vadd.f32 %v1840_v21, %v6987_v44  ;;  %v5085_v52 = vadd.f32 %v1841_v8, %v6988_v31  ;;  %v6989_v56 = vld [vmem:[#allocation141_spill] sm:$0xff]  ;;  %v6990_v41 = vld [vmem:[#allocation142_spill] sm:$0xff]  ;;  %v6992_v22 = vld [vmem:[#allocation143_spill] sm:$0xff] }
 0x187   : > { %v5088_v26 = vadd.f32 %v1842_v39, %v6989_v56  ;;  %v5091_v54 = vadd.f32 %v1843_v58, %v6990_v41  ;;  %v5094_v24 = vadd.f32 %v1844_v1, %v6992_v22  ;;  %v6994_v45 = vld [vmem:[#allocation144_spill] sm:$0xff]  ;;  %v6996_v50 = vld [vmem:[#allocation145_spill] sm:$0xff]  ;;  %v6998_v21 = vld [vmem:[#allocation146_spill] sm:$0xff] }
 0x188   : > { %v5097_v49 = vadd.f32 %v1845_v62, %v6994_v45  ;;  %v5100_v40 = vadd.f32 %v1846_v63, %v6996_v50  ;;  %v5103_v44 = vadd.f32 %v1847_v57, %v6998_v21  ;;  %v7000_v8 = vld [vmem:[#allocation118_spill] sm:$0xff]  ;;  %v7002_v39 = vld [vmem:[#allocation119_spill] sm:$0xff]  ;;  %v7004_v58 = vld [vmem:[#allocation120_spill] sm:$0xff] }
 0x189   : > { %6991 = vst [vmem:[#allocation124_spill] sm:$0xff] %v5091_v54  ;;  %v5106_v31 = vadd.f32 %v1848_v11, %v7000_v8  ;;  %v5109_v56 = vadd.f32 %v1849_v53, %v7002_v39  ;;  %v5112_v41 = vadd.f32 %v1850_v60, %v7004_v58  ;;  %v7006_v1 = vld [vmem:[#allocation121_spill] sm:$0xff]  ;;  %v7008_v62 = vld [vmem:[#allocation122_spill] sm:$0xff]  ;;  %v7010_v63 = vld [vmem:[#allocation123_spill] sm:$0xff] }
 0x18a   : > { %6993 = vst [vmem:[#allocation125_spill] sm:$0xff] %v5094_v24  ;;  %v5115_v22 = vadd.f32 %v1851_v27, %v7006_v1  ;;  %v5118_v45 = vadd.f32 %v1852_v9, %v7008_v62  ;;  %v5121_v50 = vadd.f32 %v1853_v17, %v7010_v63  ;;  %v2927_v11 = vld [vmem:[#allocation4 + $0x58] sm:$0xff]  ;;  %v7014_v8 = vld [vmem:[#allocation75_spill] sm:$0xff] }
 0x18b   : > { %6995 = vst [vmem:[#allocation126_spill] sm:$0xff] %v5097_v49  ;;  %v5126_v34 = vmul.f32 %v2927_v11, %v7014_v8  ;;  %v2928_v53 = vld [vmem:[#allocation4 + $0x78] sm:$0xff]  ;;  %v2960_v49 = vld [vmem:[#allocation6 + $0x10] sm:$0xff]  ;;  %v2962_v54 = vld [vmem:[#allocation6 + $0x20] sm:$0xff] }
 0x18c   : > { %6997 = vst [vmem:[#allocation127_spill] sm:$0xff] %v5100_v40  ;;  %v5129_v60 = vmul.f32 %v2928_v53, %v7014_v8  ;;  %v2929_v39 = vld [vmem:[#allocation4 + $0x98] sm:$0xff]  ;;  %v7016_v40 = vld [vmem:[#allocation84_spill] sm:$0xff] }
 0x18d   : > { %6999 = vst [vmem:[#allocation128_spill] sm:$0xff] %v5103_v44  ;;  %v5132_v27 = vmul.f32 %v2929_v39, %v7014_v8  ;;  %v2930_v9 = vld [vmem:[#allocation4 + $0xb8] sm:$0xff]  ;;  %v5147_v39 = vmul.f32 %v2934_v30, %v7014_v8  ;;  %v5162_v30 = vmul.f32 %v2939_v51, %v7014_v8  ;;  %v5177_v51 = vmul.f32 %v2944_v3, %v7014_v8  ;;  %v2959_v44 = vld [vmem:[#allocation6 + $0x8] sm:$0xff] }
 0x18e   : > { %7001 = vst [vmem:[#allocation129_spill] sm:$0xff] %v5106_v31  ;;  %v5135_v58 = vmul.f32 %v2930_v9, %v7014_v8  ;;  %v2931_v17 = vld [vmem:[#allocation4 + $0xd8] sm:$0xff]  ;;  %v5192_v3 = vmul.f32 %v2949_v19, %v7014_v8  ;;  %v7015_v31 = vld [vmem:[#allocation80_spill] sm:$0xff] }
 0x18f   : > { %7003 = vst [vmem:[#allocation130_spill] sm:$0xff] %v5109_v56  ;;  %v5138_v1 = vmul.f32 %v2931_v17, %v7014_v8  ;;  %v2932_v62 = vld [vmem:[#allocation4 + $0xf8] sm:$0xff]  ;;  %v2958_v56 = vld [vmem:[#allocation6] sm:$0xff] }
 0x190   : > { %7005 = vst [vmem:[#allocation131_spill] sm:$0xff] %v5112_v41  ;;  %v5141_v63 = vmul.f32 %v2932_v62, %v7014_v8  ;;  %v2933_v11 = vld [vmem:[#allocation4 + $0x118] sm:$0xff]  ;;  %v5156_v62 = vmul.f32 %v2937_v46, %v7014_v8  ;;  %v5171_v46 = vmul.f32 %v2942_v7, %v7014_v8  ;;  %v5186_v7 = vmul.f32 %v2947_v48, %v7014_v8 }
 0x191   : > { %7007 = vst [vmem:[#allocation132_spill] sm:$0xff] %v5115_v22  ;;  %v5144_v53 = vmul.f32 %v2933_v11, %v7014_v8  ;;  %v2935_v57 = vld [vmem:[#allocation4 + $0x158] sm:$0xff]  ;;  %v5159_v11 = vmul.f32 %v2938_v38, %v7014_v8  ;;  %v5174_v38 = vmul.f32 %v2943_v37, %v7014_v8  ;;  %v5189_v37 = vmul.f32 %v2948_v23, %v7014_v8 }
 0x192   : > { %7009 = vst [vmem:[#allocation133_spill] sm:$0xff] %v5118_v45  ;;  %v5150_v9 = vmul.f32 %v2935_v57, %v7014_v8  ;;  %v2936_v21 = vld [vmem:[#allocation4 + $0x178] sm:$0xff]  ;;  %v5165_v57 = vmul.f32 %v2940_v6, %v7014_v8  ;;  %v5180_v6 = vmul.f32 %v2945_v25, %v7014_v8  ;;  %v5195_v25 = vmul.f32 %v2950_v14, %v7014_v8 }
 0x193   : > { %7011 = vst [vmem:[#allocation134_spill] sm:$0xff] %v5121_v50  ;;  %v5153_v17 = vmul.f32 %v2936_v21, %v7014_v8  ;;  %v5168_v21 = vmul.f32 %v2941_v10, %v7014_v8  ;;  %v5183_v10 = vmul.f32 %v2946_v18, %v7014_v8  ;;  %v5198_v18 = vmul.f32 %v2951_v47, %v7014_v8  ;;  %v2953_v4 = vld [vmem:[#allocation4 + $0x398] sm:$0xff] }
 0x194   : > { %v5201_v48 = vmul.f32 %v2952_v36, %v7014_v8  ;;  %v5204_v23 = vmul.f32 %v2953_v4, %v7014_v8  ;;  %v2954_v50 = vld [vmem:[#allocation4 + $0x3b8] sm:$0xff]  ;;  %v5219_v4 = vadd.f32 %v2958_v56, %v7015_v31  ;;  %v2964_v56 = vld [vmem:[#allocation6 + $0x30] sm:$0xff] }
 0x195   : > { %v5207_v19 = vmul.f32 %v2954_v50, %v7014_v8  ;;  %v2955_v45 = vld [vmem:[#allocation4 + $0x3d8] sm:$0xff]  ;;  %v5222_v50 = vadd.f32 %v2959_v44, %v7016_v40  ;;  %v5237_v40 = vadd.f32 %v2964_v56, %v5138_v1  ;;  %v2970_v56 = vld [vmem:[#allocation6 + $0x60] sm:$0xff] }
 0x196   : > { %v5210_v14 = vmul.f32 %v2955_v45, %v7014_v8  ;;  %v2956_v22 = vld [vmem:[#allocation4 + $0x3f8] sm:$0xff]  ;;  %v5225_v45 = vadd.f32 %v2960_v49, %v5126_v34  ;;  %v2966_v49 = vld [vmem:[#allocation6 + $0x40] sm:$0xff] }
 0x197   : > { %v5213_v47 = vmul.f32 %v2956_v22, %v7014_v8  ;;  %v2957_v41 = vld [vmem:[#allocation4 + $0x418] sm:$0xff]  ;;  %7020 = vst [vmem:[#allocation138_spill] sm:$0xff] %v5237_v40  ;;  %v3019_v40 = vld [vmem:[#allocation4 + $0x790] sm:$0xff] }
 0x198   : > { %v5216_v36 = vmul.f32 %v2957_v41, %v7014_v8  ;;  %v2961_v24 = vld [vmem:[#allocation6 + $0x18] sm:$0xff]  ;;  %v5231_v41 = vadd.f32 %v2962_v54, %v5132_v27  ;;  %v2963_v8 = vld [vmem:[#allocation6 + $0x28] sm:$0xff]  ;;  %v2968_v27 = vld [vmem:[#allocation6 + $0x50] sm:$0xff] }
 0x199   : > { %v5228_v22 = vadd.f32 %v2961_v24, %v5129_v60  ;;  %v5234_v31 = vadd.f32 %v2963_v8, %v5135_v58  ;;  %v2965_v44 = vld [vmem:[#allocation6 + $0x38] sm:$0xff]  ;;  %v5243_v24 = vadd.f32 %v2966_v49, %v5144_v53  ;;  %v2967_v60 = vld [vmem:[#allocation6 + $0x48] sm:$0xff]  ;;  %v5249_v58 = vadd.f32 %v2968_v27, %v5150_v9  ;;  %v2972_v49 = vld [vmem:[#allocation6 + $0x70] sm:$0xff] }
 0x19a   : > { %7018 = vst [vmem:[#allocation136_spill] sm:$0xff] %v5231_v41  ;;  %v5240_v34 = vadd.f32 %v2965_v44, %v5141_v63  ;;  %v5246_v54 = vadd.f32 %v2967_v60, %v5147_v39  ;;  %v2969_v8 = vld [vmem:[#allocation6 + $0x58] sm:$0xff]  ;;  %v5255_v63 = vadd.f32 %v2970_v56, %v5156_v62  ;;  %v2971_v44 = vld [vmem:[#allocation6 + $0x68] sm:$0xff]  ;;  %v5261_v39 = vadd.f32 %v2972_v49, %v5162_v30  ;;  %v2974_v27 = vld [vmem:[#allocation6 + $0x80] sm:$0xff] }
 0x19b   : > { %7017 = vst [vmem:[#allocation135_spill] sm:$0xff] %v5228_v22  ;;  %v5252_v1 = vadd.f32 %v2969_v8, %v5153_v17  ;;  %v5258_v53 = vadd.f32 %v2971_v44, %v5159_v11  ;;  %v2973_v60 = vld [vmem:[#allocation6 + $0x78] sm:$0xff]  ;;  %v5267_v17 = vadd.f32 %v2974_v27, %v5168_v21  ;;  %v2975_v8 = vld [vmem:[#allocation6 + $0x88] sm:$0xff]  ;;  %v2976_v56 = vld [vmem:[#allocation6 + $0x90] sm:$0xff] }
 0x19c   : > { %7019 = vst [vmem:[#allocation137_spill] sm:$0xff] %v5234_v31  ;;  %v5264_v9 = vadd.f32 %v2973_v60, %v5165_v57  ;;  %v5270_v62 = vadd.f32 %v2975_v8, %v5171_v46  ;;  %v5273_v11 = vadd.f32 %v2976_v56, %v5174_v38  ;;  %v2977_v44 = vld [vmem:[#allocation6 + $0x98] sm:$0xff]  ;;  %v2978_v49 = vld [vmem:[#allocation6 + $0xa0] sm:$0xff]  ;;  %v2979_v60 = vld [vmem:[#allocation6 + $0xa8] sm:$0xff] }
 0x19d   : > { %7021 = vst [vmem:[#allocation139_spill] sm:$0xff] %v5240_v34  ;;  %v5276_v30 = vadd.f32 %v2977_v44, %v5177_v51  ;;  %v5279_v57 = vadd.f32 %v2978_v49, %v5180_v6  ;;  %v5282_v21 = vadd.f32 %v2979_v60, %v5183_v10  ;;  %v2980_v27 = vld [vmem:[#allocation6 + $0xb0] sm:$0xff]  ;;  %v2981_v8 = vld [vmem:[#allocation6 + $0xb8] sm:$0xff]  ;;  %v2982_v56 = vld [vmem:[#allocation6 + $0xc0] sm:$0xff] }
 0x19e   : > { %7022 = vst [vmem:[#allocation140_spill] sm:$0xff] %v5243_v24  ;;  %v5285_v46 = vadd.f32 %v2980_v27, %v5186_v7  ;;  %v5288_v38 = vadd.f32 %v2981_v8, %v5189_v37  ;;  %v5291_v51 = vadd.f32 %v2982_v56, %v5192_v3  ;;  %v2983_v44 = vld [vmem:[#allocation6 + $0xc8] sm:$0xff]  ;;  %v2984_v49 = vld [vmem:[#allocation6 + $0xd0] sm:$0xff]  ;;  %v2985_v60 = vld [vmem:[#allocation6 + $0xd8] sm:$0xff] }
 0x19f   : > { %7023 = vst [vmem:[#allocation141_spill] sm:$0xff] %v5246_v54  ;;  %v5294_v6 = vadd.f32 %v2983_v44, %v5195_v25  ;;  %v5297_v10 = vadd.f32 %v2984_v49, %v5198_v18  ;;  %v5300_v7 = vadd.f32 %v2985_v60, %v5201_v48  ;;  %v5303_v27 = vld [vmem:[%s3364_s12 + $0x6] ss:$0 sm:$0xff]  ;;  %v2987_v3 = vld [vmem:[#allocation6 + $0xe8] sm:$0xff]  ;;  %v2988_v25 = vld [vmem:[#allocation6 + $0xf0] sm:$0xff] }
 0x1a0   : > { %7024 = vst [vmem:[#allocation142_spill] sm:$0xff] %v5249_v58  ;;  %v2986_v37 = vld [vmem:[#allocation6 + $0xe0] sm:$0xff]  ;;  %v5309_v56 = vadd.f32 %v2987_v3, %v5207_v19  ;;  %v5312_v44 = vadd.f32 %v2988_v25, %v5210_v14  ;;  %v2989_v18 = vld [vmem:[#allocation6 + $0xf8] sm:$0xff]  ;;  %v2993_v3 = vld [vmem:[#allocation4 + $0x450] sm:$0xff] }
 0x1a1   : > { %7025 = vst [vmem:[#allocation143_spill] sm:$0xff] %v5252_v1  ;;  %v5306_v8 = vadd.f32 %v2986_v37, %v5204_v23  ;;  %v5315_v49 = vadd.f32 %v2989_v18, %v5213_v47  ;;  %v2990_v48 = vld [vmem:[#allocation6 + $0x100] sm:$0xff]  ;;  %v2992_v37 = vld [vmem:[#allocation4 + $0x430] sm:$0xff] }
 0x1a2   : > { %7026 = vst [vmem:[#allocation144_spill] sm:$0xff] %v5255_v63  ;;  %v5318_v60 = vadd.f32 %v2990_v48, %v5216_v36  ;;  %v1953_v19 = vmul.f32 %v2992_v37, %v5303_v27  ;;  %v2994_v14 = vld [vmem:[#allocation4 + $0x470] sm:$0xff] }
 0x1a3   : > { %7027 = vst [vmem:[#allocation145_spill] sm:$0xff] %v5258_v53  ;;  %v1955_v25 = vmul.f32 %v2994_v14, %v5303_v27  ;;  %v2996_v18 = vld [vmem:[#allocation4 + $0x4b0] sm:$0xff] }
 0x1a4   : > { %7028 = vst [vmem:[#allocation146_spill] sm:$0xff] %v5261_v39  ;;  %v1957_v36 = vmul.f32 %v2996_v18, %v5303_v27  ;;  %v2997_v48 = vld [vmem:[#allocation4 + $0x4d0] sm:$0xff] }
 0x1a5   : > { %7029 = vst [vmem:[#allocation118_spill] sm:$0xff] %v5264_v9  ;;  %v3010_v9 = vld [vmem:[#allocation4 + $0x670] sm:$0xff] }
 0x1a6   : > { %7030 = vst [vmem:[#allocation119_spill] sm:$0xff] %v5267_v17  ;;  %v3009_v17 = vld [vmem:[#allocation4 + $0x650] sm:$0xff] }
 0x1a7   : > { %7031 = vst [vmem:[#allocation120_spill] sm:$0xff] %v5270_v62  ;;  %v3008_v62 = vld [vmem:[#allocation4 + $0x630] sm:$0xff] }
 0x1a8   : > { %7032 = vst [vmem:[#allocation121_spill] sm:$0xff] %v5273_v11  ;;  %v3007_v11 = vld [vmem:[#allocation4 + $0x610] sm:$0xff] }
 0x1a9   : > { %7033 = vst [vmem:[#allocation122_spill] sm:$0xff] %v5276_v30  ;;  %v3006_v30 = vld [vmem:[#allocation4 + $0x5f0] sm:$0xff] }
 0x1aa   : > { %7034 = vst [vmem:[#allocation123_spill] sm:$0xff] %v5279_v57  ;;  %v3005_v57 = vld [vmem:[#allocation4 + $0x5d0] sm:$0xff] }
 0x1ab   : > { %7035 = vst [vmem:[#allocation75_spill] sm:$0xff] %v5282_v21  ;;  %v3004_v21 = vld [vmem:[#allocation4 + $0x5b0] sm:$0xff] }
 0x1ac   : > { %7036 = vst [vmem:[#allocation80_spill] sm:$0xff] %v5285_v46  ;;  %v3003_v46 = vld [vmem:[#allocation4 + $0x590] sm:$0xff] }
 0x1ad   : > { %7037 = vst [vmem:[#allocation84_spill] sm:$0xff] %v5288_v38  ;;  %v3002_v38 = vld [vmem:[#allocation4 + $0x570] sm:$0xff]  ;;  %v1964_v18 = vmul.f32 %v3003_v46, %v5303_v27  ;;  %v1971_v46 = vmul.f32 %v3010_v9, %v5303_v27 }
 0x1ae   : > { %7038 = vst [vmem:[#allocation169_spill] sm:$0xff] %v5291_v51  ;;  %v3001_v51 = vld [vmem:[#allocation4 + $0x550] sm:$0xff] }
 0x1af   : > { %7039 = vst [vmem:[#allocation170_spill] sm:$0xff] %v5294_v6  ;;  %v3000_v6 = vld [vmem:[#allocation4 + $0x530] sm:$0xff]  ;;  %v1962_v14 = vmul.f32 %v3001_v51, %v5303_v27  ;;  %v1969_v51 = vmul.f32 %v3008_v62, %v5303_v27 }
 0x1b0   : > { %7040 = vst [vmem:[#allocation171_spill] sm:$0xff] %v5297_v10  ;;  %v7048_v10 = vld [vmem:[#allocation117_spill] sm:$0xff] }
 0x1b1   : > { %7041 = vst [vmem:[#allocation172_spill] sm:$0xff] %v5300_v7  ;;  %v2991_v7 = vld [vmem:[#allocation4] sm:$0xff]  ;;  %v3011_v39 = vld [vmem:[#allocation4 + $0x690] sm:$0xff] }
 0x1b2   : > { %7042 = vst [vmem:[#allocation173_spill] sm:$0xff] %v5303_v27  ;;  %v5321_v23 = vmul.f32 %v2991_v7, %v7048_v10  ;;  %v2998_v7 = vld [vmem:[#allocation4 + $0x4f0] sm:$0xff] }
 0x1b3   : > { %7043 = vst [vmem:[#allocation174_spill] sm:$0xff] %v5306_v8  ;;  %v2999_v8 = vld [vmem:[#allocation4 + $0x510] sm:$0xff] }
 0x1b4   : > { %7044 = vst [vmem:[#allocation175_spill] sm:$0xff] %v5309_v56  ;;  %v1954_v56 = vmul.f32 %v2993_v3, %v5303_v27  ;;  %v1960_v37 = vmul.f32 %v2999_v8, %v5303_v27  ;;  %v1961_v3 = vmul.f32 %v3000_v6, %v5303_v27  ;;  %v1967_v8 = vmul.f32 %v3006_v30, %v5303_v27  ;;  %v3012_v53 = vld [vmem:[#allocation4 + $0x6b0] sm:$0xff] }
 0x1b5   : > { %7045 = vst [vmem:[#allocation176_spill] sm:$0xff] %v5312_v44  ;;  %v2995_v44 = vld [vmem:[#allocation4 + $0x490] sm:$0xff]  ;;  %v1968_v6 = vmul.f32 %v3007_v11, %v5303_v27 }
 0x1b6   : > { %7046 = vst [vmem:[#allocation177_spill] sm:$0xff] %v5315_v49  ;;  %v1956_v47 = vmul.f32 %v2995_v44, %v5303_v27  ;;  %v1959_v49 = vmul.f32 %v2998_v7, %v5303_v27  ;;  %v1963_v44 = vmul.f32 %v3002_v38, %v5303_v27  ;;  %v1966_v7 = vmul.f32 %v3005_v57, %v5303_v27  ;;  %v3013_v63 = vld [vmem:[#allocation4 + $0x6d0] sm:$0xff] }
 0x1b7   : > { %7047 = vst [vmem:[#allocation178_spill] sm:$0xff] %v5318_v60  ;;  %v1958_v60 = vmul.f32 %v2997_v48, %v5303_v27  ;;  %v1965_v48 = vmul.f32 %v3004_v21, %v5303_v27  ;;  %v1970_v38 = vmul.f32 %v3009_v17, %v5303_v27  ;;  %v1972_v21 = vmul.f32 %v3011_v39, %v5303_v27  ;;  %v3014_v1 = vld [vmem:[#allocation4 + $0x6f0] sm:$0xff] }
 0x1b8   : > { %v1973_v57 = vmul.f32 %v3012_v53, %v5303_v27  ;;  %v1974_v30 = vmul.f32 %v3013_v63, %v5303_v27  ;;  %v1975_v11 = vmul.f32 %v3014_v1, %v5303_v27  ;;  %v3015_v58 = vld [vmem:[#allocation4 + $0x710] sm:$0xff]  ;;  %v1980_v53 = vmul.f32 %v3019_v40, %v5303_v27 }
 0x1b9   : > { %v1976_v62 = vmul.f32 %v3015_v58, %v5303_v27  ;;  %v3016_v54 = vld [vmem:[#allocation4 + $0x730] sm:$0xff]  ;;  %v5364_v40 = vadd.f32 %v1956_v47, %v5040_v55  ;;  %v5385_v55 = vadd.f32 %v1963_v44, %v5061_v32  ;;  %v5406_v32 = vadd.f32 %v1970_v38, %v5082_v20  ;;  %v7061_v20 = vld [vmem:[#allocation128_spill] sm:$0xff]  ;;  %v3024_v38 = vld [vmem:[#allocation4 + $0x40] sm:$0xff] }
 0x1ba   : > { %v1977_v17 = vmul.f32 %v3016_v54, %v5303_v27  ;;  %v3017_v24 = vld [vmem:[#allocation4 + $0x750] sm:$0xff]  ;;  %v5355_v54 = vadd.f32 %v1953_v19, %v5031_v2  ;;  %v5376_v2 = vadd.f32 %v1960_v37, %v5052_v35  ;;  %v5397_v35 = vadd.f32 %v1967_v8, %v5073_v29  ;;  %v7067_v37 = vld [vmem:[#allocation131_spill] sm:$0xff] }
 0x1bb   : > { %v1978_v9 = vmul.f32 %v3017_v24, %v5303_v27  ;;  %v3018_v34 = vld [vmem:[#allocation4 + $0x770] sm:$0xff]  ;;  %v5358_v24 = vadd.f32 %v1954_v56, %v5034_v33  ;;  %v5379_v33 = vadd.f32 %v1961_v3, %v5055_v13  ;;  %v5400_v13 = vadd.f32 %v1968_v6, %v5076_v16  ;;  %7050 = vst [vmem:[#allocation179_spill] sm:$0xff] %v5406_v32  ;;  %v7057_v16 = vld [vmem:[#allocation126_spill] sm:$0xff]  ;;  %v3023_v6 = vld [vmem:[#allocation4 + $0x20] sm:$0xff] }
 0x1bc   : > { %v1979_v39 = vmul.f32 %v3018_v34, %v5303_v27  ;;  %v3020_v31 = vld [vmem:[#allocation4 + $0x7b0] sm:$0xff]  ;;  %v5361_v34 = vadd.f32 %v1955_v25, %v5037_v61  ;;  %v5382_v61 = vadd.f32 %v1962_v14, %v5058_v28  ;;  %v5403_v28 = vadd.f32 %v1969_v51, %v5079_v5  ;;  %v7059_v5 = vld [vmem:[#allocation127_spill] sm:$0xff]  ;;  %v7069_v14 = vld [vmem:[#allocation132_spill] sm:$0xff] }
 0x1bd   : > { %v1981_v63 = vmul.f32 %v3020_v31, %v5303_v27  ;;  %v3021_v41 = vld [vmem:[#allocation4 + $0x7d0] sm:$0xff]  ;;  %v5367_v31 = vadd.f32 %v1957_v36, %v5043_v42  ;;  %v5388_v42 = vadd.f32 %v1964_v18, %v5064_v0  ;;  %v5409_v0 = vadd.f32 %v1971_v46, %v5085_v52 }
 0x1be   : > { %v1982_v1 = vmul.f32 %v3021_v41, %v5303_v27  ;;  %v3022_v22 = vld [vmem:[#allocation4 + $0x7f0] sm:$0xff]  ;;  %v5370_v41 = vadd.f32 %v1958_v60, %v5046_v12  ;;  %v5391_v12 = vadd.f32 %v1965_v48, %v5067_v15  ;;  %7049 = vst [vmem:[#allocation117_spill] sm:$0xff] %v5403_v28  ;;  %v5412_v15 = vadd.f32 %v1972_v21, %v5088_v26  ;;  %v7065_v26 = vld [vmem:[#allocation130_spill] sm:$0xff]  ;;  %v3025_v21 = vld [vmem:[#allocation4 + $0x60] sm:$0xff] }
 0x1bf   : > { %v1983_v58 = vmul.f32 %v3022_v22, %v5303_v27  ;;  %v5373_v22 = vadd.f32 %v1959_v49, %v5049_v59  ;;  %v5394_v59 = vadd.f32 %v1966_v7, %v5070_v43  ;;  %7051 = vst [vmem:[#allocation180_spill] sm:$0xff] %v5409_v0  ;;  %v7053_v43 = vld [vmem:[#allocation124_spill] sm:$0xff]  ;;  %v7055_v29 = vld [vmem:[#allocation125_spill] sm:$0xff]  ;;  %v5421_v60 = vadd.f32 %v1975_v11, %v7057_v16  ;;  %v7073_v7 = vld [vmem:[#allocation134_spill] sm:$0xff] }
 0x1c0   : > { %7052 = vst [vmem:[#allocation181_spill] sm:$0xff] %v5412_v15  ;;  %v5415_v56 = vadd.f32 %v1973_v57, %v7053_v43  ;;  %v5418_v49 = vadd.f32 %v1974_v30, %v7055_v29  ;;  %v5424_v19 = vadd.f32 %v1976_v62, %v7059_v5  ;;  %v5427_v25 = vadd.f32 %v1977_v17, %v7061_v20  ;;  %v7063_v52 = vld [vmem:[#allocation129_spill] sm:$0xff]  ;;  %v3026_v30 = vld [vmem:[#allocation4 + $0x80] sm:$0xff]  ;;  %v7076_v0 = vld [vmem:[#allocation136_spill] sm:$0xff] }
 0x1c1   : > { %7058 = vst [vmem:[#allocation126_spill] sm:$0xff] %v5421_v60  ;;  %v5430_v47 = vadd.f32 %v1978_v9, %v7063_v52  ;;  %v5433_v36 = vadd.f32 %v1979_v39, %v7065_v26  ;;  %v5436_v3 = vadd.f32 %v1980_v53, %v7067_v37  ;;  %v5439_v44 = vadd.f32 %v1981_v63, %v7069_v14  ;;  %v7071_v18 = vld [vmem:[#allocation133_spill] sm:$0xff]  ;;  %v3027_v62 = vld [vmem:[#allocation4 + $0xa0] sm:$0xff] }
 0x1c2   : > { %7054 = vst [vmem:[#allocation124_spill] sm:$0xff] %v5415_v56  ;;  %v5442_v48 = vadd.f32 %v1982_v1, %v7071_v18  ;;  %v5445_v8 = vadd.f32 %v1983_v58, %v7073_v7  ;;  %v5448_v51 = vmul.f32 %v3023_v6, %v7048_v10  ;;  %v5451_v46 = vmul.f32 %v3024_v38, %v7048_v10  ;;  %v3028_v9 = vld [vmem:[#allocation4 + $0xc0] sm:$0xff]  ;;  %v7077_v32 = vld [vmem:[#allocation137_spill] sm:$0xff] }
 0x1c3   : > { %7056 = vst [vmem:[#allocation125_spill] sm:$0xff] %v5418_v49  ;;  %v1663_v57 = vmul.f32 %v3025_v21, %v7048_v10  ;;  %v1664_v11 = vmul.f32 %v3026_v30, %v7048_v10  ;;  %v1665_v17 = vmul.f32 %v3027_v62, %v7048_v10  ;;  %v1666_v39 = vmul.f32 %v3028_v9, %v7048_v10  ;;  %v3029_v53 = vld [vmem:[#allocation4 + $0xe0] sm:$0xff] }
 0x1c4   : > { %7060 = vst [vmem:[#allocation127_spill] sm:$0xff] %v5424_v19  ;;  %v1667_v63 = vmul.f32 %v3029_v53, %v7048_v10  ;;  %v3030_v1 = vld [vmem:[#allocation4 + $0x100] sm:$0xff] }
 0x1c5   : > { %7062 = vst [vmem:[#allocation128_spill] sm:$0xff] %v5427_v25  ;;  %v1668_v58 = vmul.f32 %v3030_v1, %v7048_v10  ;;  %v3031_v43 = vld [vmem:[#allocation4 + $0x120] sm:$0xff] }
 0x1c6   : > { %7064 = vst [vmem:[#allocation129_spill] sm:$0xff] %v5430_v47  ;;  %v1669_v29 = vmul.f32 %v3031_v43, %v7048_v10  ;;  %v3032_v16 = vld [vmem:[#allocation4 + $0x140] sm:$0xff] }
 0x1c7   : > { %7066 = vst [vmem:[#allocation130_spill] sm:$0xff] %v5433_v36  ;;  %v1670_v5 = vmul.f32 %v3032_v16, %v7048_v10  ;;  %v3033_v20 = vld [vmem:[#allocation4 + $0x160] sm:$0xff] }
 0x1c8   : > { %7068 = vst [vmem:[#allocation131_spill] sm:$0xff] %v5436_v3  ;;  %v1671_v52 = vmul.f32 %v3033_v20, %v7048_v10  ;;  %v3034_v26 = vld [vmem:[#allocation4 + $0x180] sm:$0xff] }
 0x1c9   : > { %7070 = vst [vmem:[#allocation132_spill] sm:$0xff] %v5439_v44  ;;  %v1672_v37 = vmul.f32 %v3034_v26, %v7048_v10  ;;  %v3035_v14 = vld [vmem:[#allocation4 + $0x1a0] sm:$0xff] }
 0x1ca   : > { %7072 = vst [vmem:[#allocation133_spill] sm:$0xff] %v5442_v48  ;;  %v1673_v18 = vmul.f32 %v3035_v14, %v7048_v10  ;;  %v3036_v7 = vld [vmem:[#allocation4 + $0x1c0] sm:$0xff] }
 0x1cb   : > { %7074 = vst [vmem:[#allocation134_spill] sm:$0xff] %v5445_v8  ;;  %v1674_v6 = vmul.f32 %v3036_v7, %v7048_v10  ;;  %v3037_v38 = vld [vmem:[#allocation4 + $0x1e0] sm:$0xff] }
 0x1cc   : > { %v1675_v21 = vmul.f32 %v3037_v38, %v7048_v10  ;;  %v3038_v30 = vld [vmem:[#allocation4 + $0x200] sm:$0xff] }
 0x1cd   : > { %v1676_v62 = vmul.f32 %v3038_v30, %v7048_v10  ;;  %v3039_v9 = vld [vmem:[#allocation4 + $0x220] sm:$0xff] }
 0x1ce   : > { %v1677_v53 = vmul.f32 %v3039_v9, %v7048_v10  ;;  %v3040_v1 = vld [vmem:[#allocation4 + $0x240] sm:$0xff] }
 0x1cf   : > { %v1678_v43 = vmul.f32 %v3040_v1, %v7048_v10  ;;  %v3041_v16 = vld [vmem:[#allocation4 + $0x260] sm:$0xff] }
 0x1d0   : > { %v1679_v20 = vmul.f32 %v3041_v16, %v7048_v10  ;;  %v3042_v26 = vld [vmem:[#allocation4 + $0x280] sm:$0xff] }
 0x1d1   : > { %v1680_v14 = vmul.f32 %v3042_v26, %v7048_v10  ;;  %v3043_v8 = vld [vmem:[#allocation4 + $0x2a0] sm:$0xff] }
 0x1d2   : > { %v1681_v7 = vmul.f32 %v3043_v8, %v7048_v10  ;;  %v3044_v48 = vld [vmem:[#allocation4 + $0x2c0] sm:$0xff] }
 0x1d3   : > { %v1682_v38 = vmul.f32 %v3044_v48, %v7048_v10  ;;  %v3045_v44 = vld [vmem:[#allocation4 + $0x2e0] sm:$0xff] }
 0x1d4   : > { %v1683_v30 = vmul.f32 %v3045_v44, %v7048_v10  ;;  %v3046_v3 = vld [vmem:[#allocation4 + $0x300] sm:$0xff] }
 0x1d5   : > { %v1684_v9 = vmul.f32 %v3046_v3, %v7048_v10  ;;  %v3047_v36 = vld [vmem:[#allocation4 + $0x320] sm:$0xff] }
 0x1d6   : > { %v1685_v1 = vmul.f32 %v3047_v36, %v7048_v10  ;;  %v3048_v47 = vld [vmem:[#allocation4 + $0x340] sm:$0xff] }
 0x1d7   : > { %v1686_v16 = vmul.f32 %v3048_v47, %v7048_v10  ;;  %v3049_v25 = vld [vmem:[#allocation4 + $0x360] sm:$0xff]  ;;  %v5485_v47 = vadd.f32 %v5321_v23, %v5219_v4 }
 0x1d8   : > { %v1687_v26 = vmul.f32 %v3049_v25, %v7048_v10  ;;  %v3050_v19 = vld [vmem:[#allocation4 + $0x380] sm:$0xff]  ;;  %v5489_v25 = vadd.f32 %v5448_v51, %v5222_v50  ;;  %v7082_v50 = vld [vmem:[#allocation140_spill] sm:$0xff] }
 0x1d9   : > { %v1688_v8 = vmul.f32 %v3050_v19, %v7048_v10  ;;  %v3051_v60 = vld [vmem:[#allocation4 + $0x3a0] sm:$0xff]  ;;  %v5511_v51 = vadd.f32 %v1668_v58, %v7082_v50  ;;  %v7096_v58 = vld [vmem:[#allocation118_spill] sm:$0xff] }
 0x1da   : > { %v1689_v48 = vmul.f32 %v3051_v60, %v7048_v10  ;;  %v3052_v49 = vld [vmem:[#allocation4 + $0x3c0] sm:$0xff]  ;;  %v5493_v60 = vadd.f32 %v5451_v46, %v5225_v45  ;;  %v7084_v45 = vld [vmem:[#allocation141_spill] sm:$0xff]  ;;  %v5532_v50 = vadd.f32 %v1675_v21, %v7096_v58  ;;  %v7110_v21 = vld [vmem:[#allocation80_spill] sm:$0xff] }
 0x1db   : > { %v1690_v44 = vmul.f32 %v3052_v49, %v7048_v10  ;;  %v3053_v56 = vld [vmem:[#allocation4 + $0x3e0] sm:$0xff]  ;;  %7083 = vst [vmem:[#allocation137_spill] sm:$0xff] %v5511_v51  ;;  %v5514_v46 = vadd.f32 %v1669_v29, %v7084_v45  ;;  %v5553_v58 = vadd.f32 %v1682_v38, %v7110_v21 }
 0x1dc   : > { %v1691_v3 = vmul.f32 %v3053_v56, %v7048_v10  ;;  %v3054_v15 = vld [vmem:[#allocation4 + $0x400] sm:$0xff]  ;;  %v5499_v56 = vadd.f32 %v1664_v11, %v7076_v0 }
 0x1dd   : > { %v1692_v36 = vmul.f32 %v3054_v15, %v7048_v10  ;;  %v7075_v19 = vld [vmem:[#allocation135_spill] sm:$0xff]  ;;  %v5502_v10 = vadd.f32 %v1665_v17, %v7077_v32  ;;  %v7078_v15 = vld [vmem:[#allocation138_spill] sm:$0xff]  ;;  %v7090_v32 = vld [vmem:[#allocation144_spill] sm:$0xff] }
 0x1de   : > { %v5496_v49 = vadd.f32 %v1663_v57, %v7075_v19  ;;  %v5505_v4 = vadd.f32 %v1666_v39, %v7078_v15  ;;  %v7080_v23 = vld [vmem:[#allocation139_spill] sm:$0xff]  ;;  %7085 = vst [vmem:[#allocation138_spill] sm:$0xff] %v5514_v46  ;;  %v7086_v57 = vld [vmem:[#allocation142_spill] sm:$0xff]  ;;  %v5523_v17 = vadd.f32 %v1672_v37, %v7090_v32  ;;  %v7092_v39 = vld [vmem:[#allocation145_spill] sm:$0xff] }
 0x1df   : > { %v5508_v28 = vadd.f32 %v1667_v63, %v7080_v23  ;;  %v5517_v19 = vadd.f32 %v1670_v5, %v7086_v57  ;;  %v7088_v0 = vld [vmem:[#allocation143_spill] sm:$0xff]  ;;  %v5526_v15 = vadd.f32 %v1673_v18, %v7092_v39  ;;  %v7094_v63 = vld [vmem:[#allocation146_spill] sm:$0xff]  ;;  %7097 = vst [vmem:[#allocation144_spill] sm:$0xff] %v5532_v50  ;;  %v7100_v5 = vld [vmem:[#allocation120_spill] sm:$0xff]  ;;  %v5693_v50 = vmul.f32 0.2, %v5397_v35 }
 0x1e0   : > { %7079 = vst [vmem:[#allocation135_spill] sm:$0xff] %v5505_v4  ;;  %v5520_v11 = vadd.f32 %v1671_v52, %v7088_v0  ;;  %v5529_v23 = vadd.f32 %v1674_v6, %v7094_v63  ;;  %v7098_v29 = vld [vmem:[#allocation119_spill] sm:$0xff]  ;;  %v5538_v57 = vadd.f32 %v1677_v53, %v7100_v5  ;;  %v7102_v52 = vld [vmem:[#allocation121_spill] sm:$0xff]  ;;  %v7104_v37 = vld [vmem:[#allocation122_spill] sm:$0xff] }
 0x1e1   : > { %7081 = vst [vmem:[#allocation136_spill] sm:$0xff] %v5508_v28  ;;  %v5535_v45 = vadd.f32 %v1676_v62, %v7098_v29  ;;  %v5541_v0 = vadd.f32 %v1678_v43, %v7102_v52  ;;  %v5544_v32 = vadd.f32 %v1679_v20, %v7104_v37  ;;  %v7106_v18 = vld [vmem:[#allocation123_spill] sm:$0xff]  ;;  %v7112_v62 = vld [vmem:[#allocation84_spill] sm:$0xff]  ;;  %v7114_v53 = vld [vmem:[#allocation169_spill] sm:$0xff] }
 0x1e2   : > { %7087 = vst [vmem:[#allocation139_spill] sm:$0xff] %v5517_v19  ;;  %v5547_v39 = vadd.f32 %v1680_v14, %v7106_v18  ;;  %v7108_v6 = vld [vmem:[#allocation75_spill] sm:$0xff]  ;;  %v5556_v29 = vadd.f32 %v1683_v30, %v7112_v62  ;;  %v5559_v5 = vadd.f32 %v1684_v9, %v7114_v53  ;;  %v7116_v43 = vld [vmem:[#allocation170_spill] sm:$0xff]  ;;  %v7120_v14 = vld [vmem:[#allocation172_spill] sm:$0xff] }
 0x1e3   : > { %7089 = vst [vmem:[#allocation140_spill] sm:$0xff] %v5520_v11  ;;  %v5550_v63 = vadd.f32 %v1681_v7, %v7108_v6  ;;  %v5562_v52 = vadd.f32 %v1685_v1, %v7116_v43  ;;  %v7118_v20 = vld [vmem:[#allocation171_spill] sm:$0xff]  ;;  %v5568_v18 = vadd.f32 %v1687_v26, %v7120_v14  ;;  %v7122_v7 = vld [vmem:[#allocation174_spill] sm:$0xff]  ;;  %v7126_v30 = vld [vmem:[#allocation176_spill] sm:$0xff] }
 0x1e4   : > { %7091 = vst [vmem:[#allocation141_spill] sm:$0xff] %v5523_v17  ;;  %v5565_v37 = vadd.f32 %v1686_v16, %v7118_v20  ;;  %v5571_v6 = vadd.f32 %v1688_v8, %v7122_v7  ;;  %v7124_v38 = vld [vmem:[#allocation175_spill] sm:$0xff]  ;;  %v5577_v62 = vadd.f32 %v1690_v44, %v7126_v30  ;;  %v7128_v9 = vld [vmem:[#allocation177_spill] sm:$0xff]  ;;  %v7130_v1 = vld [vmem:[#allocation178_spill] sm:$0xff] }
 0x1e5   : > { %7093 = vst [vmem:[#allocation142_spill] sm:$0xff] %v5526_v15  ;;  %v5574_v21 = vadd.f32 %v1689_v48, %v7124_v38  ;;  %v5580_v53 = vadd.f32 %v1691_v3, %v7128_v9  ;;  %v5583_v43 = vadd.f32 %v1692_v36, %v7130_v1  ;;  %v3055_v16 = vld [vmem:[#allocation4 + $0x8] sm:$0xff] }
 0x1e6   : > { %7095 = vst [vmem:[#allocation143_spill] sm:$0xff] %v5529_v23  ;;  %v7132_v20 = vld [vmem:[#allocation168_spill] sm:$0xff] }
 0x1e7   : > { %7099 = vst [vmem:[#allocation145_spill] sm:$0xff] %v5535_v45  ;;  %v3056_v26 = vld [vmem:[#allocation4 + $0x28] sm:$0xff] }
 0x1e8   : > { %7101 = vst [vmem:[#allocation146_spill] sm:$0xff] %v5538_v57  ;;  %v1791_v14 = vmul.f32 %v3056_v26, %v7132_v20  ;;  %v3057_v8 = vld [vmem:[#allocation4 + $0x48] sm:$0xff]  ;;  %v5681_v57 = vmul.f32 0.2, %v5388_v42 }
 0x1e9   : > { %7103 = vst [vmem:[#allocation118_spill] sm:$0xff] %v5541_v0  ;;  %v1792_v7 = vmul.f32 %v3057_v8, %v7132_v20  ;;  %v3058_v48 = vld [vmem:[#allocation4 + $0x68] sm:$0xff] }
 0x1ea   : > { %7105 = vst [vmem:[#allocation119_spill] sm:$0xff] %v5544_v32  ;;  %v1793_v38 = vmul.f32 %v3058_v48, %v7132_v20  ;;  %v3059_v44 = vld [vmem:[#allocation4 + $0x88] sm:$0xff] }
 0x1eb   : > { %7107 = vst [vmem:[#allocation120_spill] sm:$0xff] %v5547_v39  ;;  %v1794_v30 = vmul.f32 %v3059_v44, %v7132_v20  ;;  %v3060_v3 = vld [vmem:[#allocation4 + $0xa8] sm:$0xff]  ;;  %v1856_v32 = vadd.f32 %v1792_v7, %v5493_v60  ;;  %v5654_v60 = vmul.f32 0.2, %v5364_v40  ;;  %v3077_v7 = vld [vmem:[#allocation4 + $0x50] sm:$0xff] }
 0x1ec   : > { %7109 = vst [vmem:[#allocation121_spill] sm:$0xff] %v5550_v63  ;;  %v1795_v9 = vmul.f32 %v3060_v3, %v7132_v20  ;;  %v3061_v36 = vld [vmem:[#allocation4 + $0xc8] sm:$0xff] }
 0x1ed   : > { %7111 = vst [vmem:[#allocation122_spill] sm:$0xff] %v5553_v58  ;;  %v5592_v1 = vmul.f32 %v3061_v36, %v7132_v20  ;;  %v3063_v26 = vld [vmem:[#allocation4 + $0x108] sm:$0xff]  ;;  %v5638_v0 = vadd.f32 %v1794_v30, %v5499_v56  ;;  %v5668_v30 = vmul.f32 0.2, %v5376_v2 }
 0x1ee   : > { %7113 = vst [vmem:[#allocation123_spill] sm:$0xff] %v5556_v29  ;;  %v5598_v8 = vmul.f32 %v3063_v26, %v7132_v20  ;;  %v3065_v44 = vld [vmem:[#allocation4 + $0x148] sm:$0xff] }
 0x1ef   : > { %7115 = vst [vmem:[#allocation75_spill] sm:$0xff] %v5559_v5  ;;  %v3066_v3 = vld [vmem:[#allocation4 + $0x168] sm:$0xff] }
 0x1f0   : > { %7117 = vst [vmem:[#allocation80_spill] sm:$0xff] %v5562_v52  ;;  %v5607_v36 = vmul.f32 %v3066_v3, %v7132_v20  ;;  %v3070_v52 = vld [vmem:[#allocation4 + $0x1e8] sm:$0xff] }
 0x1f1   : > { %7119 = vst [vmem:[#allocation84_spill] sm:$0xff] %v5565_v37  ;;  %v1790_v37 = vmul.f32 %v3055_v16, %v7132_v20  ;;  %v3062_v16 = vld [vmem:[#allocation4 + $0xe8] sm:$0xff] }
 0x1f2   : > { %7121 = vst [vmem:[#allocation169_spill] sm:$0xff] %v5568_v18  ;;  %v3069_v18 = vld [vmem:[#allocation4 + $0x1c8] sm:$0xff] }
 0x1f3   : > { %7123 = vst [vmem:[#allocation170_spill] sm:$0xff] %v5571_v6  ;;  %v3068_v6 = vld [vmem:[#allocation4 + $0x1a8] sm:$0xff]  ;;  %v1854_v39 = vadd.f32 %v1790_v37, %v5485_v47  ;;  %v5648_v47 = vmul.f32 0.2, %v5358_v24  ;;  %v5661_v37 = vmul.f32 0.2, %v5370_v41 }
 0x1f4   : > { %7125 = vst [vmem:[#allocation171_spill] sm:$0xff] %v5574_v21  ;;  %v3067_v21 = vld [vmem:[#allocation4 + $0x188] sm:$0xff]  ;;  %v5613_v26 = vmul.f32 %v3068_v6, %v7132_v20 }
 0x1f5   : > { %7127 = vst [vmem:[#allocation172_spill] sm:$0xff] %v5577_v62  ;;  %v5604_v62 = vmul.f32 %v3065_v44, %v7132_v20  ;;  %v5619_v44 = vmul.f32 %v3070_v52, %v7132_v20  ;;  %v3071_v5 = vld [vmem:[#allocation4 + $0x208] sm:$0xff]  ;;  %v1855_v52 = vadd.f32 %v1791_v14, %v5489_v25  ;;  %v5651_v25 = vmul.f32 0.2, %v5361_v34 }
 0x1f6   : > { %7129 = vst [vmem:[#allocation174_spill] sm:$0xff] %v5580_v53  ;;  %v3064_v53 = vld [vmem:[#allocation4 + $0x128] sm:$0xff]  ;;  %v5622_v3 = vmul.f32 %v3071_v5, %v7132_v20  ;;  %v1857_v5 = vadd.f32 %v1793_v38, %v5496_v49  ;;  %v3076_v49 = vld [vmem:[#allocation4 + $0x30] sm:$0xff]  ;;  %v5664_v14 = vmul.f32 0.2, %v5373_v22  ;;  %v1922_v38 = vmul.f32 %v3077_v7, %v5303_v27 }
 0x1f7   : > { %7131 = vst [vmem:[#allocation175_spill] sm:$0xff] %v5583_v43  ;;  %v5595_v43 = vmul.f32 %v3062_v16, %v7132_v20  ;;  %v5601_v48 = vmul.f32 %v3064_v53, %v7132_v20  ;;  %v5610_v16 = vmul.f32 %v3067_v21, %v7132_v20  ;;  %v5616_v53 = vmul.f32 %v3069_v18, %v7132_v20  ;;  %v3072_v29 = vld [vmem:[#allocation4 + $0x228] sm:$0xff] }
 0x1f8   : > { %7133 = vst [vmem:[#allocation176_spill] sm:$0xff] %v5592_v1  ;;  %v5625_v21 = vmul.f32 %v3072_v29, %v7132_v20  ;;  %v3073_v58 = vld [vmem:[#allocation4 + $0x248] sm:$0xff]  ;;  %v5641_v29 = vadd.f32 %v1795_v9, %v5502_v10  ;;  %v1921_v56 = vmul.f32 %v3076_v49, %v5303_v27  ;;  %v5658_v10 = vmul.f32 0.2, %v5367_v31  ;;  %v3078_v49 = vld [vmem:[#allocation4 + $0x70] sm:$0xff]  ;;  %v7165_v1 = vld [vmem:[#allocation130_spill] sm:$0xff] }
 0x1f9   : > { %7134 = vst [vmem:[#allocation177_spill] sm:$0xff] %v5595_v43  ;;  %v5628_v6 = vmul.f32 %v3073_v58, %v7132_v20  ;;  %v3074_v63 = vld [vmem:[#allocation4 + $0x268] sm:$0xff]  ;;  %v5644_v58 = vmul.f32 0.2, %v5355_v54  ;;  %v5671_v9 = vmul.f32 0.2, %v5379_v33 }
 0x1fa   : > { %7135 = vst [vmem:[#allocation178_spill] sm:$0xff] %v5598_v8  ;;  %v5631_v18 = vmul.f32 %v3074_v63, %v7132_v20  ;;  %v5684_v7 = vmul.f32 0.2, %v5391_v12  ;;  %v7157_v8 = vld [vmem:[#allocation125_spill] sm:$0xff]  ;;  %v5721_v51 = vadd.f32 %v1921_v56, %v1855_v52  ;;  %v7160_v43 = vld [vmem:[#allocation127_spill] sm:$0xff] }
 0x1fb   : > { %7136 = vst [vmem:[#allocation182_spill] sm:$0xff] %v5601_v48  ;;  %v7156_v48 = vld [vmem:[#allocation124_spill] sm:$0xff]  ;;  %v5727_v28 = vmul.f32 0.2, %v7160_v43  ;;  %v5738_v4 = vmul.f32 0.2, %v7165_v1 }
 0x1fc   : > { %7137 = vst [vmem:[#allocation183_spill] sm:$0xff] %v5604_v62  ;;  %v7155_v62 = vld [vmem:[#allocation181_spill] sm:$0xff]  ;;  %v5716_v46 = vmul.f32 0.2, %v7156_v48  ;;  %v7166_v20 = vld [vmem:[#allocation131_spill] sm:$0xff] }
 0x1fd   : > { %7138 = vst [vmem:[#allocation184_spill] sm:$0xff] %v5607_v36  ;;  %v5713_v19 = vmul.f32 0.2, %v7155_v62  ;;  %v5741_v52 = vmul.f32 0.2, %v7166_v20  ;;  %v7169_v43 = vld [vmem:[#allocation133_spill] sm:$0xff]  ;;  %v2147_v20 = vmax.f32 %v5361_v34, %v5651_v25 }
 0x1fe   : > { %7139 = vst [vmem:[#allocation185_spill] sm:$0xff] %v5610_v16  ;;  %v7152_v16 = vld [vmem:[#allocation179_spill] sm:$0xff]  ;;  %v7183_v25 = vld [vmem:[#allocation109_spill] sm:$0xff] }
 0x1ff   : > { %7140 = vst [vmem:[#allocation186_spill] sm:$0xff] %v5613_v26  ;;  %v7151_v26 = vld [vmem:[#allocation117_spill] sm:$0xff]  ;;  %v5705_v17 = vmul.f32 0.2, %v7152_v16 }
 0x200   : > { %7141 = vst [vmem:[#allocation187_spill] sm:$0xff] %v5616_v53  ;;  %v3080_v53 = vld [vmem:[#allocation4 + $0xb0] sm:$0xff]  ;;  %v5702_v15 = vmul.f32 0.2, %v7151_v26 }
 0x201   : > { %7142 = vst [vmem:[#allocation188_spill] sm:$0xff] %v5619_v44  ;;  %v5690_v44 = vmul.f32 0.2, %v5394_v59  ;;  %v5699_v23 = vmul.f32 %v3080_v53, %v5303_v27  ;;  %v5719_v53 = vmul.f32 0.2, %v7157_v8 }
 0x202   : > { %7143 = vst [vmem:[#allocation189_spill] sm:$0xff] %v5622_v3  ;;  %v3079_v3 = vld [vmem:[#allocation4 + $0x90] sm:$0xff] }
 0x203   : > { %7144 = vst [vmem:[#allocation190_spill] sm:$0xff] %v5625_v21  ;;  %v5678_v21 = vmul.f32 0.2, %v5385_v55  ;;  %v5687_v45 = vmul.f32 %v3079_v3, %v5303_v27  ;;  %v7153_v3 = vld [vmem:[#allocation180_spill] sm:$0xff] }
 0x204   : > { %7145 = vst [vmem:[#allocation191_spill] sm:$0xff] %v5628_v6  ;;  %v3075_v6 = vld [vmem:[#allocation4 + $0x10] sm:$0xff]  ;;  %v5708_v36 = vmul.f32 0.2, %v7153_v3 }
 0x205   : > { %7146 = vst [vmem:[#allocation192_spill] sm:$0xff] %v5631_v18  ;;  %v1920_v63 = vmul.f32 %v3075_v6, %v5303_v27  ;;  %v5674_v6 = vmul.f32 0.2, %v5382_v61  ;;  %v1923_v18 = vmul.f32 %v3078_v49, %v5303_v27  ;;  %v5696_v49 = vmul.f32 0.2, %v5400_v13 }
 0x206   : > { %7147 = vst [vmem:[#allocation193_spill] sm:$0xff] %v5638_v0  ;;  %v7164_v0 = vld [vmem:[#allocation129_spill] sm:$0xff] }
 0x207   : > { %7148 = vst [vmem:[#allocation194_spill] sm:$0xff] %v5641_v29  ;;  %v5710_v11 = vadd.f32 %v1920_v63, %v1854_v39  ;;  %v5732_v63 = vadd.f32 %v1922_v38, %v1856_v32  ;;  %v5735_v27 = vmul.f32 0.2, %v7164_v0  ;;  %v5743_v56 = vadd.f32 %v1923_v18, %v1857_v5 }
 0x208   : > { %7149 = vst [vmem:[#allocation195_spill] sm:$0xff] %v5687_v45  ;;  %v7162_v45 = vld [vmem:[#allocation128_spill] sm:$0xff]  ;;  %v2145_v38 = vmax.f32 %v5355_v54, %v5644_v58  ;;  %v2148_v18 = vmax.f32 %v5364_v40, %v5654_v60  ;;  %v2149_v5 = vmax.f32 %v5367_v31, %v5658_v10  ;;  %v2152_v54 = vmax.f32 %v5376_v2, %v5668_v30 }
 0x209   : > { %7150 = vst [vmem:[#allocation196_spill] sm:$0xff] %v5699_v23  ;;  %v7159_v23 = vld [vmem:[#allocation126_spill] sm:$0xff]  ;;  %v5730_v39 = vmul.f32 0.2, %v7162_v45  ;;  %v2154_v34 = vmax.f32 %v5382_v61, %v5674_v6  ;;  %v2155_v40 = vmax.f32 %v5385_v55, %v5678_v21  ;;  %v2156_v31 = vmax.f32 %v5388_v42, %v5681_v57  ;;  %v7177_v21 = vld [vmem:[#allocation107_spill] sm:$0xff]  ;;  %v7191_v6 = vld [vmem:[#allocation61_spill] sm:$0xff] }
 0x20a   : > { %7154 = vst [vmem:[#allocation117_spill] sm:$0xff] %v5710_v11  ;;  %v5724_v29 = vmul.f32 0.2, %v7159_v23  ;;  %v7170_v45 = vld [vmem:[#allocation134_spill] sm:$0xff]  ;;  %v2159_v2 = vmax.f32 %v5397_v35, %v5693_v50  ;;  %v2161_v61 = vmax.f32 %v7151_v26, %v5702_v15  ;;  %v2162_v55 = vmax.f32 %v7152_v16, %v5705_v17  ;;  %v7172_v15 = vld [vmem:[#allocation127_spill] sm:$0xff]  ;;  %v7173_v17 = vld [vmem:[#allocation128_spill] sm:$0xff] }
 0x20b   : > { %7158 = vst [vmem:[#allocation179_spill] sm:$0xff] %v5721_v51  ;;  %v7168_v51 = vld [vmem:[#allocation132_spill] sm:$0xff]  ;;  %v5752_v32 = vmul.f32 0.2, %v7170_v45  ;;  %v2151_v45 = vmax.f32 %v5373_v22, %v5664_v14  ;;  %v2158_v22 = vmax.f32 %v5394_v59, %v5690_v44  ;;  %v2163_v42 = vmax.f32 %v7153_v3, %v5708_v36  ;;  %v7189_v14 = vld [vmem:[#allocation111_spill] sm:$0xff] }
 0x20c   : > { %7161 = vst [vmem:[#allocation180_spill] sm:$0xff] %v5727_v28  ;;  %v5746_v11 = vmul.f32 0.2, %v7168_v51  ;;  %v5749_v28 = vmul.f32 0.2, %v7169_v43  ;;  %v2165_v59 = vmax.f32 %v7156_v48, %v5716_v46  ;;  %v2166_v35 = vmax.f32 %v7157_v8, %v5719_v53  ;;  %v7174_v46 = vld [vmem:[#allocation131_spill] sm:$0xff] }
 0x20d   : > { %7163 = vst [vmem:[#allocation181_spill] sm:$0xff] %v5732_v63  ;;  %v2146_v63 = vmax.f32 %v5358_v24, %v5648_v47  ;;  %v2153_v24 = vmax.f32 %v5379_v33, %v5671_v9  ;;  %v2160_v33 = vmax.f32 %v5400_v13, %v5696_v49  ;;  %v2167_v13 = vmax.f32 %v7159_v23, %v5724_v29  ;;  %v7175_v48 = vld [vmem:[#allocation134_spill] sm:$0xff]  ;;  %v7176_v44 = vld [vmem:[#allocation56_spill] sm:$0xff] }
 0x20e   : > { %7167 = vst [vmem:[#allocation124_spill] sm:$0xff] %v5743_v56  ;;  %v2150_v56 = vmax.f32 %v5370_v41, %v5661_v37  ;;  %v2157_v41 = vmax.f32 %v5391_v12, %v5684_v7  ;;  %v2164_v12 = vmax.f32 %v7155_v62, %v5713_v19  ;;  %v2169_v16 = vmax.f32 %v7173_v17, %v5730_v39  ;;  %v7182_v47 = vld [vmem:[#allocation58_spill] sm:$0xff]  ;;  %v7188_v37 = vld [vmem:[#allocation60_spill] sm:$0xff]  ;;  %v7195_v39 = vld [vmem:[#allocation113_spill] sm:$0xff] }
 0x20f   : > { %v2170_v36 = vmax.f32 %v7164_v0, %v5735_v27  ;;  %v2171_v19 = vmax.f32 %v7165_v1, %v5738_v4  ;;  %v2172_v62 = vmax.f32 %v7174_v46, %v5741_v52  ;;  %v2173_v8 = vmax.f32 %v7168_v51, %v5746_v11  ;;  %v7179_v27 = vld [vmem:[#allocation57_spill] sm:$0xff]  ;;  %v7180_v0 = vld [vmem:[#allocation108_spill] sm:$0xff]  ;;  %v7185_v11 = vld [vmem:[#allocation59_spill] sm:$0xff] }
 0x210   : > { %v2174_v23 = vmax.f32 %v7169_v43, %v5749_v28  ;;  %v2175_v26 = vmax.f32 %v7175_v48, %v5752_v32  ;;  %v7178_v29 = vmax.f32 %v7176_v44, %v7177_v21  ;;  %v7181_v4 = vmax.f32 %v7179_v27, %v7180_v0  ;;  %v7186_v28 = vld [vmem:[#allocation110_spill] sm:$0xff]  ;;  %v7192_v7 = vld [vmem:[#allocation112_spill] sm:$0xff]  ;;  %v7197_v52 = vld [vmem:[#allocation63_spill] sm:$0xff] }
 0x211   : > { %v7184_v60 = vmax.f32 %v7182_v47, %v7183_v25  ;;  %v7187_v43 = vmax.f32 %v7185_v11, %v7186_v28  ;;  %v7190_v30 = vmax.f32 %v7188_v37, %v7189_v14  ;;  %v7193_v49 = vmax.f32 %v7191_v6, %v7192_v7  ;;  %v7194_v53 = vld [vmem:[#allocation62_spill] sm:$0xff]  ;;  %v7203_v46 = vld [vmem:[#allocation23_spill] sm:$0xff]  ;;  %v7204_v48 = vld [vmem:[#allocation116_spill] sm:$0xff] }
 0x212   : > { %v5819_v58 = vadd.f32 %v2145_v38, %v7178_v29  ;;  %v5824_v1 = vadd.f32 %v2146_v63, %v7181_v4  ;;  %v7196_v63 = vmax.f32 %v7194_v53, %v7195_v39  ;;  %v7198_v32 = vld [vmem:[#allocation114_spill] sm:$0xff]  ;;  %v7205_v44 = vmax.f32 %v7203_v46, %v7204_v48  ;;  %v7206_v21 = vld [vmem:[#allocation24_spill] sm:$0xff]  ;;  %v7207_v29 = vld [vmem:[#allocation147_spill] sm:$0xff] }
 0x213   : > { %v7171_v50 = vld [vmem:[#allocation180_spill] sm:$0xff]  ;;  %v5829_v51 = vadd.f32 %v2147_v20, %v7184_v60  ;;  %v5834_v10 = vadd.f32 %v2148_v18, %v7187_v43  ;;  %v5839_v9 = vadd.f32 %v2149_v5, %v7190_v30  ;;  %v5844_v3 = vadd.f32 %v2150_v56, %v7193_v49  ;;  %v7209_v0 = vld [vmem:[#allocation25_spill] sm:$0xff]  ;;  %v7212_v25 = vld [vmem:[#allocation26_spill] sm:$0xff] }
 0x214   : > { %v2168_v57 = vmax.f32 %v7172_v15, %v7171_v50  ;;  %v5849_v20 = vadd.f32 %v2151_v45, %v7196_v63  ;;  %v7199_v38 = vmax.f32 %v7197_v52, %v7198_v32  ;;  %v7200_v50 = vld [vmem:[#allocation64_spill] sm:$0xff]  ;;  %v7201_v15 = vld [vmem:[#allocation115_spill] sm:$0xff]  ;;  %v5864_v56 = vadd.f32 %v2154_v34, %v7205_v44  ;;  %v7213_v60 = vld [vmem:[#allocation149_spill] sm:$0xff] }
 0x215   : > { %v7202_v17 = vmax.f32 %v7200_v50, %v7201_v15  ;;  %v7208_v27 = vmax.f32 %v7206_v21, %v7207_v29  ;;  %v7210_v4 = vld [vmem:[#allocation148_spill] sm:$0xff]  ;;  %v7214_v11 = vmax.f32 %v7212_v25, %v7213_v60  ;;  %v7216_v28 = vld [vmem:[#allocation27_spill] sm:$0xff]  ;;  %v7217_v43 = vld [vmem:[#allocation150_spill] sm:$0xff] }
 0x216   : > { %v5854_v18 = vadd.f32 %v2152_v54, %v7199_v38  ;;  %v7211_v47 = vmax.f32 %v7209_v0, %v7210_v4  ;;  %v7218_v37 = vmax.f32 %v7216_v28, %v7217_v43  ;;  %v7220_v14 = vld [vmem:[#allocation28_spill] sm:$0xff]  ;;  %v7221_v30 = vld [vmem:[#allocation151_spill] sm:$0xff]  ;;  %v7224_v7 = vld [vmem:[#allocation29_spill] sm:$0xff] }
 0x217   : > { %v5859_v5 = vadd.f32 %v2153_v24, %v7202_v17  ;;  %v5869_v45 = vadd.f32 %v2155_v40, %v7208_v27  ;;  %v5879_v24 = vadd.f32 %v2157_v41, %v7214_v11  ;;  %v7222_v6 = vmax.f32 %v7220_v14, %v7221_v30  ;;  %v7225_v49 = vld [vmem:[#allocation152_spill] sm:$0xff]  ;;  %v7228_v39 = vld [vmem:[#allocation30_spill] sm:$0xff]  ;;  %v7229_v63 = vld [vmem:[#allocation153_spill] sm:$0xff] }
 0x218   : > { %v5874_v54 = vadd.f32 %v2156_v31, %v7211_v47  ;;  %v5884_v34 = vadd.f32 %v2158_v22, %v7218_v37  ;;  %v7226_v53 = vmax.f32 %v7224_v7, %v7225_v49  ;;  %v7230_v52 = vmax.f32 %v7228_v39, %v7229_v63  ;;  %v7232_v32 = vld [vmem:[#allocation31_spill] sm:$0xff]  ;;  %v7233_v38 = vld [vmem:[#allocation154_spill] sm:$0xff]  ;;  %v7236_v15 = vld [vmem:[#allocation32_spill] sm:$0xff] }
 0x219   : > { %7215 = vst [vmem:[#allocation125_spill] sm:$0xff] %v5879_v24  ;;  %v5889_v40 = vadd.f32 %v2159_v2, %v7222_v6  ;;  %v7234_v50 = vmax.f32 %v7232_v32, %v7233_v38  ;;  %v7237_v17 = vld [vmem:[#allocation155_spill] sm:$0xff]  ;;  %v7240_v48 = vld [vmem:[#allocation33_spill] sm:$0xff]  ;;  %v7241_v44 = vld [vmem:[#allocation156_spill] sm:$0xff] }
 0x21a   : > { %7219 = vst [vmem:[#allocation126_spill] sm:$0xff] %v5884_v34  ;;  %v5894_v31 = vadd.f32 %v2160_v33, %v7226_v53  ;;  %v5899_v41 = vadd.f32 %v2161_v61, %v7230_v52  ;;  %v7238_v46 = vmax.f32 %v7236_v15, %v7237_v17  ;;  %v7242_v21 = vmax.f32 %v7240_v48, %v7241_v44  ;;  %v7244_v29 = vld [vmem:[#allocation34_spill] sm:$0xff]  ;;  %v7245_v27 = vld [vmem:[#allocation157_spill] sm:$0xff]  ;;  %v7248_v4 = vld [vmem:[#allocation35_spill] sm:$0xff] }
 0x21b   : > { %7223 = vst [vmem:[#allocation129_spill] sm:$0xff] %v5889_v40  ;;  %v5904_v22 = vadd.f32 %v2162_v55, %v7234_v50  ;;  %v7246_v0 = vmax.f32 %v7244_v29, %v7245_v27  ;;  %v7249_v47 = vld [vmem:[#allocation158_spill] sm:$0xff]  ;;  %v7252_v60 = vld [vmem:[#allocation12_spill] sm:$0xff]  ;;  %v7253_v11 = vld [vmem:[#allocation159_spill] sm:$0xff] }
 0x21c   : > { %7227 = vst [vmem:[#allocation130_spill] sm:$0xff] %v5894_v31  ;;  %v5909_v2 = vadd.f32 %v2163_v42, %v7238_v46  ;;  %v5914_v33 = vadd.f32 %v2164_v12, %v7242_v21  ;;  %v7250_v25 = vmax.f32 %v7248_v4, %v7249_v47  ;;  %v7254_v28 = vmax.f32 %v7252_v60, %v7253_v11  ;;  %v7256_v43 = vld [vmem:[#allocation13_spill] sm:$0xff]  ;;  %v7257_v37 = vld [vmem:[#allocation160_spill] sm:$0xff]  ;;  %v7260_v30 = vld [vmem:[#allocation14_spill] sm:$0xff] }
 0x21d   : > { %7231 = vst [vmem:[#allocation132_spill] sm:$0xff] %v5899_v41  ;;  %v5919_v61 = vadd.f32 %v2165_v59, %v7246_v0  ;;  %v7258_v14 = vmax.f32 %v7256_v43, %v7257_v37  ;;  %v7261_v6 = vld [vmem:[#allocation161_spill] sm:$0xff]  ;;  %v7264_v49 = vld [vmem:[#allocation16_spill] sm:$0xff]  ;;  %v7265_v53 = vld [vmem:[#allocation162_spill] sm:$0xff] }
 0x21e   : > { %7235 = vst [vmem:[#allocation133_spill] sm:$0xff] %v5904_v22  ;;  %v5924_v55 = vadd.f32 %v2166_v35, %v7250_v25  ;;  %v5929_v42 = vadd.f32 %v2167_v13, %v7254_v28  ;;  %v7262_v7 = vmax.f32 %v7260_v30, %v7261_v6  ;;  %v7266_v39 = vmax.f32 %v7264_v49, %v7265_v53  ;;  %v7268_v63 = vld [vmem:[#allocation17_spill] sm:$0xff]  ;;  %v7269_v52 = vld [vmem:[#allocation163_spill] sm:$0xff]  ;;  %v7272_v38 = vld [vmem:[#allocation18_spill] sm:$0xff] }
 0x21f   : > { %7239 = vst [vmem:[#allocation180_spill] sm:$0xff] %v5909_v2  ;;  %v5934_v12 = vadd.f32 %v2168_v57, %v7258_v14  ;;  %v7270_v32 = vmax.f32 %v7268_v63, %v7269_v52  ;;  %v7273_v50 = vld [vmem:[#allocation164_spill] sm:$0xff]  ;;  %v7276_v17 = vld [vmem:[#allocation19_spill] sm:$0xff]  ;;  %v7277_v46 = vld [vmem:[#allocation165_spill] sm:$0xff] }
 0x220   : > { %7243 = vst [vmem:[#allocation127_spill] sm:$0xff] %v5914_v33  ;;  %v5939_v59 = vadd.f32 %v2169_v16, %v7262_v7  ;;  %v5944_v35 = vadd.f32 %v2170_v36, %v7266_v39  ;;  %v7274_v15 = vmax.f32 %v7272_v38, %v7273_v50  ;;  %v7278_v48 = vmax.f32 %v7276_v17, %v7277_v46  ;;  %v7280_v44 = vld [vmem:[#allocation117_spill] sm:$0xff]  ;;  %v7281_v29 = vld [vmem:[#allocation179_spill] sm:$0xff]  ;;  %v7282_v27 = vld [vmem:[#allocation20_spill] sm:$0xff] }
 0x221   : > { %7247 = vst [vmem:[#allocation128_spill] sm:$0xff] %v5919_v61  ;;  %v5949_v13 = vadd.f32 %v2171_v19, %v7270_v32  ;;  %v2048_v21 = vmul.f32 0.2, %v7280_v44  ;;  %v2049_v36 = vmul.f32 0.2, %v7281_v29  ;;  %v7283_v0 = vld [vmem:[#allocation166_spill] sm:$0xff] }
 0x222   : > { %7251 = vst [vmem:[#allocation131_spill] sm:$0xff] %v5924_v55  ;;  %v5954_v57 = vadd.f32 %v2172_v62, %v7274_v15  ;;  %v5959_v16 = vadd.f32 %v2173_v8, %v7278_v48  ;;  %v7284_v4 = vmax.f32 %v7282_v27, %v7283_v0  ;;  %v7286_v19 = vld [vmem:[#allocation21_spill] sm:$0xff]  ;;  %v7287_v25 = vld [vmem:[#allocation167_spill] sm:$0xff]  ;;  %v3081_v62 = vld [vmem:[#allocation4 + $0x288] sm:$0xff] }
 0x223   : > { %7255 = vst [vmem:[#allocation134_spill] sm:$0xff] %v5929_v42  ;;  %v7288_v60 = vmax.f32 %v7286_v19, %v7287_v25  ;;  %v7290_v28 = vld [vmem:[#allocation168_spill] sm:$0xff]  ;;  %v7291_v7 = vld [vmem:[#allocation135_spill] sm:$0xff]  ;;  %v3085_v53 = vld [vmem:[#allocation4 + $0xd0] sm:$0xff] }
 0x224   : > { %7259 = vst [vmem:[#allocation56_spill] sm:$0xff] %v5934_v12  ;;  %v5966_v47 = vadd.f32 %v2174_v23, %v7284_v4  ;;  %v5974_v43 = vmul.f32 %v3081_v62, %v7290_v28  ;;  %v3082_v8 = vld [vmem:[#allocation4 + $0x2a8] sm:$0xff]  ;;  %v7293_v39 = vld [vmem:[#allocation173_spill] sm:$0xff]  ;;  %v7295_v32 = vld [vmem:[#allocation195_spill] sm:$0xff] }
 0x225   : > { %7263 = vst [vmem:[#allocation107_spill] sm:$0xff] %v5939_v59  ;;  %v5971_v11 = vadd.f32 %v2175_v26, %v7288_v60  ;;  %v5977_v37 = vmul.f32 %v3082_v8, %v7290_v28  ;;  %v3083_v14 = vld [vmem:[#allocation4 + $0x2c8] sm:$0xff]  ;;  %v1926_v63 = vmul.f32 %v3085_v53, %v7293_v39  ;;  %v7294_v52 = vld [vmem:[#allocation193_spill] sm:$0xff]  ;;  %v7299_v62 = vld [vmem:[#allocation194_spill] sm:$0xff]  ;;  %v2113_v53 = vmax.f32 %v7281_v29, %v2049_v36 }
 0x226   : > { %7267 = vst [vmem:[#allocation57_spill] sm:$0xff] %v5944_v35  ;;  %v5980_v30 = vmul.f32 %v3083_v14, %v7290_v28  ;;  %v3084_v6 = vld [vmem:[#allocation4 + $0x2e8] sm:$0xff]  ;;  %v5990_v38 = vadd.f32 %v7295_v32, %v7294_v52  ;;  %v7296_v50 = vld [vmem:[#allocation181_spill] sm:$0xff]  ;;  %v7320_v41 = vld [vmem:[#allocation79_spill] sm:$0xff] }
 0x227   : > { %7271 = vst [vmem:[#allocation108_spill] sm:$0xff] %v5949_v13  ;;  %v5983_v23 = vmul.f32 %v3084_v6, %v7290_v28  ;;  %v7292_v49 = vld [vmem:[#allocation176_spill] sm:$0xff]  ;;  %v2050_v15 = vmul.f32 0.2, %v7296_v50  ;;  %v7298_v4 = vld [vmem:[#allocation177_spill] sm:$0xff]  ;;  %v2374_v40 = vld [vmem:[#allocation8 + $0x18] sm:$0xff] }
 0x228   : > { %7275 = vst [vmem:[#allocation58_spill] sm:$0xff] %v5954_v57  ;;  %v1860_v26 = vadd.f32 %v7292_v49, %v7291_v7  ;;  %v3086_v17 = vld [vmem:[#allocation4 + $0x308] sm:$0xff]  ;;  %v3088_v25 = vld [vmem:[#allocation4 + $0xf0] sm:$0xff]  ;;  %v2112_v49 = vmax.f32 %v7280_v44, %v2048_v21  ;;  %v2052_v29 = vmul.f32 0.2, %v5990_v38 }
 0x229   : > { %7279 = vst [vmem:[#allocation109_spill] sm:$0xff] %v5959_v16  ;;  %v5994_v46 = vmul.f32 %v3086_v17, %v7290_v28  ;;  %v3087_v48 = vld [vmem:[#allocation4 + $0x328] sm:$0xff]  ;;  %v1927_v60 = vmul.f32 %v3088_v25, %v7293_v39  ;;  %v7302_v25 = vld [vmem:[#allocation137_spill] sm:$0xff]  ;;  %v2114_v36 = vmax.f32 %v7296_v50, %v2050_v15  ;;  %v7305_v16 = vld [vmem:[#allocation182_spill] sm:$0xff] }
 0x22a   : > { %7285 = vst [vmem:[#allocation59_spill] sm:$0xff] %v5966_v47  ;;  %v5997_v27 = vmul.f32 %v3087_v48, %v7290_v28  ;;  %v7297_v0 = vld [vmem:[#allocation136_spill] sm:$0xff]  ;;  %v6021_v21 = vadd.f32 %v1926_v63, %v1860_v26  ;;  %v7304_v47 = vld [vmem:[#allocation138_spill] sm:$0xff]  ;;  %v3094_v57 = vld [vmem:[#allocation4 + $0x130] sm:$0xff] }
 0x22b   : > { %7289 = vst [vmem:[#allocation110_spill] sm:$0xff] %v5971_v11  ;;  %v1861_v19 = vadd.f32 %v7298_v4, %v7297_v0  ;;  %v7300_v8 = vld [vmem:[#allocation196_spill] sm:$0xff]  ;;  %v3092_v11 = vld [vmem:[#allocation4 + $0x110] sm:$0xff]  ;;  %v1929_v13 = vmul.f32 %v3094_v57, %v7293_v39  ;;  %v7306_v63 = vld [vmem:[#allocation42_spill] sm:$0xff] }
 0x22c   : > { %v6004_v14 = vadd.f32 %v7300_v8, %v7299_v62  ;;  %v7301_v6 = vld [vmem:[#allocation124_spill] sm:$0xff]  ;;  %v7303_v62 = vld [vmem:[#allocation178_spill] sm:$0xff]  ;;  %v1928_v44 = vmul.f32 %v3092_v11, %v7293_v39  ;;  %v7309_v15 = vld [vmem:[#allocation15_spill] sm:$0xff] }
 0x22d   : > { %v2051_v7 = vmul.f32 0.2, %v7301_v6  ;;  %v3089_v52 = vld [vmem:[#allocation4 + $0x348] sm:$0xff]  ;;  %v1862_v8 = vadd.f32 %v7303_v62, %v7302_v25  ;;  %v6031_v25 = vadd.f32 %v1927_v60, %v1861_v19  ;;  %v7310_v59 = vld [vmem:[#allocation77_spill] sm:$0xff]  ;;  %v7312_v19 = vld [vmem:[#allocation139_spill] sm:$0xff] }
 0x22e   : > { %v6010_v32 = vmul.f32 %v3089_v52, %v7290_v28  ;;  %v3090_v17 = vld [vmem:[#allocation4 + $0x368] sm:$0xff]  ;;  %v2053_v11 = vmul.f32 0.2, %v6004_v14  ;;  %v7313_v60 = vld [vmem:[#allocation183_spill] sm:$0xff]  ;;  %v3098_v2 = vld [vmem:[#allocation4 + $0x170] sm:$0xff] }
 0x22f   : > { %v6013_v48 = vmul.f32 %v3090_v17, %v7290_v28  ;;  %v3091_v0 = vld [vmem:[#allocation4 + $0x388] sm:$0xff]  ;;  %v2115_v26 = vmax.f32 %v7301_v6, %v2051_v7  ;;  %v1864_v55 = vadd.f32 %v7313_v60, %v7312_v19  ;;  %v3097_v6 = vld [vmem:[#allocation4 + $0x150] sm:$0xff]  ;;  %v1931_v19 = vmul.f32 %v3098_v2, %v7293_v39 }
 0x230   : > { %v6016_v4 = vmul.f32 %v3091_v0, %v7290_v28  ;;  %v3093_v52 = vld [vmem:[#allocation4 + $0x3a8] sm:$0xff]  ;;  %v1863_v0 = vadd.f32 %v7305_v16, %v7304_v47  ;;  %v1930_v7 = vmul.f32 %v3097_v6, %v7293_v39  ;;  %v2055_v6 = vmul.f32 0.2, %v6031_v25 }
 0x231   : > { %v6026_v17 = vmul.f32 %v3093_v52, %v7290_v28  ;;  %v7307_v62 = vld [vmem:[#allocation76_spill] sm:$0xff]  ;;  %v7311_v52 = vmax.f32 %v7309_v15, %v7310_v59  ;;  %v2054_v59 = vmul.f32 0.2, %v6021_v21 }
 0x232   : > { %v7308_v35 = vmax.f32 %v7306_v63, %v7307_v62  ;;  %v3095_v42 = vld [vmem:[#allocation4 + $0x3c8] sm:$0xff]  ;;  %v2371_v63 = vld [vmem:[#allocation8] sm:$0xff]  ;;  %v7315_v62 = vld [vmem:[#allocation78_spill] sm:$0xff]  ;;  %v6060_v60 = vadd.f32 %v1929_v13, %v1863_v0 }
 0x233   : > { %v2177_v12 = vadd.f32 %v2113_v53, %v7311_v52  ;;  %v6042_v16 = vmul.f32 %v3095_v42, %v7290_v28  ;;  %v3096_v47 = vld [vmem:[#allocation4 + $0x3e8] sm:$0xff]  ;;  %v2116_v53 = vmax.f32 %v5990_v38, %v2052_v29  ;;  %v7314_v42 = vld [vmem:[#allocation43_spill] sm:$0xff]  ;;  %v3100_v13 = vld [vmem:[#allocation4 + $0x190] sm:$0xff] }
 0x234   : > { %v2176_v50 = vadd.f32 %v2112_v49, %v7308_v35  ;;  %v6045_v57 = vmul.f32 %v3096_v47, %v7290_v28  ;;  %v2372_v35 = vld [vmem:[#allocation8 + $0x8] sm:$0xff]  ;;  %v6050_v49 = vadd.f32 %v1928_v44, %v1862_v8  ;;  %v7316_v15 = vmax.f32 %v7314_v42, %v7315_v62  ;;  %v2373_v8 = vld [vmem:[#allocation8 + $0x10] sm:$0xff] }
 0x235   : > { %v7317_v47 = vld [vmem:[#allocation140_spill] sm:$0xff]  ;;  %v2117_v44 = vmax.f32 %v6004_v14, %v2053_v11  ;;  %v2436_v42 = vmul.f32 %v2372_v35, %v2177_v12  ;;  %v1932_v0 = vmul.f32 %v3100_v13, %v7293_v39  ;;  %v7325_v11 = vld [vmem:[#allocation81_spill] sm:$0xff]  ;;  %v7329_v13 = vld [vmem:[#allocation46_spill] sm:$0xff] }
 0x236   : > { %v2178_v52 = vadd.f32 %v2114_v36, %v7316_v15  ;;  %v7318_v61 = vld [vmem:[#allocation184_spill] sm:$0xff]  ;;  %v2435_v31 = vmul.f32 %v2371_v63, %v2176_v50  ;;  %v7323_v15 = vld [vmem:[#allocation185_spill] sm:$0xff]  ;;  %v2056_v14 = vmul.f32 0.2, %v6050_v49  ;;  %v7328_v63 = vld [vmem:[#allocation186_spill] sm:$0xff] }
 0x237   : > { %v1865_v33 = vadd.f32 %v7318_v61, %v7317_v47  ;;  %v7319_v22 = vld [vmem:[#allocation44_spill] sm:$0xff]  ;;  %v7322_v61 = vld [vmem:[#allocation141_spill] sm:$0xff]  ;;  %v6073_v47 = vadd.f32 %v1930_v7, %v1864_v55  ;;  %v2057_v55 = vmul.f32 0.2, %v6060_v60  ;;  %v2375_v7 = vld [vmem:[#allocation8 + $0x20] sm:$0xff] }
 0x238   : > { %v7321_v38 = vmax.f32 %v7319_v22, %v7320_v41  ;;  %v3099_v36 = vld [vmem:[#allocation4 + $0x408] sm:$0xff]  ;;  %v1866_v2 = vadd.f32 %v7323_v15, %v7322_v61  ;;  %v2118_v41 = vmax.f32 %v6021_v21, %v2054_v59  ;;  %v7324_v22 = vld [vmem:[#allocation45_spill] sm:$0xff]  ;;  %v2437_v50 = vmul.f32 %v2373_v8, %v2178_v52  ;;  %v7330_v21 = vld [vmem:[#allocation82_spill] sm:$0xff] }
 0x239   : > { %v6068_v62 = vmul.f32 %v3099_v36, %v7290_v28  ;;  %v7326_v12 = vmax.f32 %v7324_v22, %v7325_v11  ;;  %v7327_v28 = vld [vmem:[#allocation142_spill] sm:$0xff]  ;;  %v6083_v61 = vadd.f32 %v1931_v19, %v1865_v33  ;;  %v2119_v15 = vmax.f32 %v6031_v25, %v2055_v6  ;;  %v7332_v52 = vld [vmem:[#allocation143_spill] sm:$0xff]  ;;  %v2376_v19 = vld [vmem:[#allocation8 + $0x28] sm:$0xff] }
 0x23a   : > { %v2179_v29 = vadd.f32 %v2115_v26, %v7321_v38  ;;  %v1867_v35 = vadd.f32 %v7328_v63, %v7327_v28  ;;  %v3101_v38 = vld [vmem:[#allocation4 + $0x1b0] sm:$0xff]  ;;  %v7331_v59 = vmax.f32 %v7329_v13, %v7330_v21  ;;  %v7333_v8 = vld [vmem:[#allocation187_spill] sm:$0xff]  ;;  %v6093_v63 = vadd.f32 %v1932_v0, %v1866_v2 }
 0x23b   : > { %v2180_v26 = vadd.f32 %v2116_v53, %v7326_v12  ;;  %v1933_v36 = vmul.f32 %v3101_v38, %v7293_v39  ;;  %v2499_v53 = vadd.f32 %v2436_v42, %v2435_v31  ;;  %v1868_v11 = vadd.f32 %v7333_v8, %v7332_v52  ;;  %v3102_v12 = vld [vmem:[#allocation4 + $0x1d0] sm:$0xff]  ;;  %v7334_v25 = vld [vmem:[#allocation47_spill] sm:$0xff]  ;;  %v7337_v31 = vld [vmem:[#allocation144_spill] sm:$0xff] }
 0x23c   : > { %v2181_v34 = vadd.f32 %v2117_v44, %v7331_v59  ;;  %v2438_v22 = vmul.f32 %v2374_v40, %v2179_v29  ;;  %v1934_v28 = vmul.f32 %v3102_v12, %v7293_v39  ;;  %v2058_v33 = vmul.f32 0.2, %v6073_v47  ;;  %v7335_v6 = vld [vmem:[#allocation83_spill] sm:$0xff]  ;;  %v7338_v29 = vld [vmem:[#allocation188_spill] sm:$0xff]  ;;  %v3103_v21 = vld [vmem:[#allocation4 + $0x1f0] sm:$0xff] }
 0x23d   : > { %v2120_v38 = vmax.f32 %v6050_v49, %v2056_v14  ;;  %v7336_v24 = vmax.f32 %v7334_v25, %v7335_v6  ;;  %v2439_v44 = vmul.f32 %v2375_v7, %v2180_v26  ;;  %v2500_v40 = vadd.f32 %v2499_v53, %v2437_v50  ;;  %v2377_v0 = vld [vmem:[#allocation8 + $0x30] sm:$0xff]  ;;  %v7339_v49 = vld [vmem:[#allocation48_spill] sm:$0xff] }
 0x23e   : > { %v1869_v42 = vadd.f32 %v7338_v29, %v7337_v31  ;;  %v1935_v59 = vmul.f32 %v3103_v21, %v7293_v39  ;;  %v6103_v52 = vadd.f32 %v1933_v36, %v1867_v35  ;;  %v2059_v2 = vmul.f32 0.2, %v6083_v61  ;;  %v7340_v14 = vld [vmem:[#allocation85_spill] sm:$0xff]  ;;  %v2378_v36 = vld [vmem:[#allocation8 + $0x38] sm:$0xff] }
 0x23f   : > { %v2182_v13 = vadd.f32 %v2118_v41, %v7336_v24  ;;  %v2121_v8 = vmax.f32 %v6060_v60, %v2057_v55  ;;  %v7341_v12 = vmax.f32 %v7339_v49, %v7340_v14  ;;  %v2440_v24 = vmul.f32 %v2376_v19, %v2181_v34  ;;  %v7342_v26 = vld [vmem:[#allocation145_spill] sm:$0xff]  ;;  %v7344_v60 = vld [vmem:[#allocation50_spill] sm:$0xff] }
 0x240   : > { %v2501_v41 = vadd.f32 %v2500_v40, %v2438_v22  ;;  %v7343_v50 = vld [vmem:[#allocation189_spill] sm:$0xff]  ;;  %v6113_v31 = vadd.f32 %v1934_v28, %v1868_v11  ;;  %v2060_v35 = vmul.f32 0.2, %v6093_v63  ;;  %v2122_v29 = vmax.f32 %v6073_v47, %v2058_v33  ;;  %v7345_v55 = vld [vmem:[#allocation86_spill] sm:$0xff]  ;;  %v2379_v28 = vld [vmem:[#allocation8 + $0x40] sm:$0xff] }
 0x241   : > { %v2183_v25 = vadd.f32 %v2119_v15, %v7341_v12  ;;  %v1870_v7 = vadd.f32 %v7343_v50, %v7342_v26  ;;  %v3104_v53 = vld [vmem:[#allocation4 + $0x210] sm:$0xff]  ;;  %v7346_v21 = vmax.f32 %v7344_v60, %v7345_v55  ;;  %v2441_v15 = vmul.f32 %v2377_v0, %v2182_v13  ;;  %v7347_v22 = vld [vmem:[#allocation146_spill] sm:$0xff]  ;;  %v7350_v33 = vld [vmem:[#allocation87_spill] sm:$0xff] }
 0x242   : > { %v1936_v6 = vmul.f32 %v3104_v53, %v7293_v39  ;;  %v2502_v34 = vadd.f32 %v2501_v41, %v2439_v44  ;;  %v7348_v19 = vld [vmem:[#allocation190_spill] sm:$0xff]  ;;  %v3105_v14 = vld [vmem:[#allocation4 + $0x230] sm:$0xff]  ;;  %v6123_v26 = vadd.f32 %v1935_v59, %v1869_v42  ;;  %v2061_v11 = vmul.f32 0.2, %v6103_v52  ;;  %v7353_v0 = vld [vmem:[#allocation191_spill] sm:$0xff] }
 0x243   : > { %v2184_v49 = vadd.f32 %v2120_v38, %v7346_v21  ;;  %v1871_v40 = vadd.f32 %v7348_v19, %v7347_v22  ;;  %v1937_v12 = vmul.f32 %v3105_v14, %v7293_v39  ;;  %v2123_v50 = vmax.f32 %v6083_v61, %v2059_v2  ;;  %v7349_v47 = vld [vmem:[#allocation49_spill] sm:$0xff]  ;;  %v7352_v44 = vld [vmem:[#allocation118_spill] sm:$0xff]  ;;  %v2380_v59 = vld [vmem:[#allocation8 + $0x48] sm:$0xff] }
 0x244   : > { %v7351_v53 = vmax.f32 %v7349_v47, %v7350_v33  ;;  %v2442_v38 = vmul.f32 %v2378_v36, %v2183_v25  ;;  %v2503_v13 = vadd.f32 %v2502_v34, %v2440_v24  ;;  %v1872_v41 = vadd.f32 %v7353_v0, %v7352_v44  ;;  %v3106_v55 = vld [vmem:[#allocation4 + $0x250] sm:$0xff]  ;;  %v7355_v2 = vld [vmem:[#allocation88_spill] sm:$0xff]  ;;  %v7357_v24 = vld [vmem:[#allocation119_spill] sm:$0xff] }
 0x245   : > { %v1938_v21 = vmul.f32 %v3106_v55, %v7293_v39  ;;  %v6133_v22 = vadd.f32 %v1936_v6, %v1870_v7  ;;  %v2062_v42 = vmul.f32 0.2, %v6113_v31  ;;  %v2124_v19 = vmax.f32 %v6093_v63, %v2060_v35  ;;  %v7354_v61 = vld [vmem:[#allocation65_spill] sm:$0xff]  ;;  %v7358_v36 = vld [vmem:[#allocation192_spill] sm:$0xff]  ;;  %v7359_v63 = vld [vmem:[#allocation66_spill] sm:$0xff] }
 0x246   : > { %v2185_v60 = vadd.f32 %v2121_v8, %v7351_v53  ;;  %v7356_v14 = vmax.f32 %v7354_v61, %v7355_v2  ;;  %v2443_v8 = vmul.f32 %v2379_v28, %v2184_v49  ;;  %v2504_v25 = vadd.f32 %v2503_v13, %v2441_v15  ;;  %v3107_v33 = vld [vmem:[#allocation4 + $0x270] sm:$0xff]  ;;  %v7362_v15 = vld [vmem:[#allocation120_spill] sm:$0xff] }
 0x247   : > { %v1873_v34 = vadd.f32 %v7358_v36, %v7357_v24  ;;  %v1939_v53 = vmul.f32 %v3107_v33, %v7293_v39  ;;  %v6143_v44 = vadd.f32 %v1937_v12, %v1871_v40  ;;  %v2063_v7 = vmul.f32 0.2, %v6123_v26  ;;  %v2381_v6 = vld [vmem:[#allocation8 + $0x50] sm:$0xff]  ;;  %v2382_v12 = vld [vmem:[#allocation8 + $0x58] sm:$0xff] }
 0x248   : > { %v2186_v47 = vadd.f32 %v2122_v29, %v7356_v14  ;;  %v2125_v0 = vmax.f32 %v6103_v52, %v2061_v11  ;;  %v7360_v35 = vld [vmem:[#allocation89_spill] sm:$0xff]  ;;  %v2444_v29 = vmul.f32 %v2380_v59, %v2185_v60  ;;  %v2505_v49 = vadd.f32 %v2504_v25, %v2442_v38  ;;  %v7363_v52 = vld [vmem:[#allocation67_spill] sm:$0xff]  ;;  %v7364_v11 = vld [vmem:[#allocation90_spill] sm:$0xff] }
 0x249   : > { %v7361_v55 = vmax.f32 %v7359_v63, %v7360_v35  ;;  %v1874_v28 = vadd.f32 %v5974_v43, %v7362_v15  ;;  %v3108_v13 = vld [vmem:[#allocation4 + $0x290] sm:$0xff]  ;;  %v6153_v14 = vadd.f32 %v1938_v21, %v1872_v41  ;;  %v2064_v40 = vmul.f32 0.2, %v6133_v22  ;;  %v2383_v21 = vld [vmem:[#allocation8 + $0x60] sm:$0xff] }
 0x24a   : > { %v1940_v2 = vmul.f32 %v3108_v13, %v7293_v39  ;;  %v2126_v24 = vmax.f32 %v6113_v31, %v2062_v42  ;;  %v7365_v36 = vmax.f32 %v7363_v52, %v7364_v11  ;;  %v2506_v60 = vadd.f32 %v2505_v49, %v2443_v8  ;;  %v7366_v38 = vld [vmem:[#allocation121_spill] sm:$0xff]  ;;  %v7367_v31 = vld [vmem:[#allocation68_spill] sm:$0xff]  ;;  %v7368_v42 = vld [vmem:[#allocation91_spill] sm:$0xff] }
 0x24b   : > { %v2187_v61 = vadd.f32 %v2123_v50, %v7361_v55  ;;  %v2445_v50 = vmul.f32 %v2381_v6, %v2186_v47  ;;  %v1875_v59 = vadd.f32 %v5977_v37, %v7366_v38  ;;  %v3109_v43 = vld [vmem:[#allocation4 + $0x2b0] sm:$0xff]  ;;  %v6163_v63 = vadd.f32 %v1939_v53, %v1873_v34  ;;  %v7370_v8 = vld [vmem:[#allocation122_spill] sm:$0xff]  ;;  %v2384_v53 = vld [vmem:[#allocation8 + $0x68] sm:$0xff] }
 0x24c   : > { %v2188_v33 = vadd.f32 %v2124_v19, %v7365_v36  ;;  %v1941_v25 = vmul.f32 %v3109_v43, %v7293_v39  ;;  %v2065_v41 = vmul.f32 0.2, %v6143_v44  ;;  %v2127_v35 = vmax.f32 %v6123_v26, %v2063_v7  ;;  %v3110_v37 = vld [vmem:[#allocation4 + $0x2d0] sm:$0xff]  ;;  %v7372_v7 = vld [vmem:[#allocation92_spill] sm:$0xff] }
 0x24d   : > { %v7369_v55 = vmax.f32 %v7367_v31, %v7368_v42  ;;  %v2446_v19 = vmul.f32 %v2382_v12, %v2187_v61  ;;  %v2507_v47 = vadd.f32 %v2506_v60, %v2444_v29  ;;  %v1876_v6 = vadd.f32 %v5980_v30, %v7370_v8  ;;  %v7371_v26 = vld [vmem:[#allocation69_spill] sm:$0xff]  ;;  %v7374_v29 = vld [vmem:[#allocation123_spill] sm:$0xff] }
 0x24e   : > { %v1942_v49 = vmul.f32 %v3110_v37, %v7293_v39  ;;  %v6173_v13 = vadd.f32 %v1940_v2, %v1874_v28  ;;  %v2066_v34 = vmul.f32 0.2, %v6153_v14  ;;  %v2128_v52 = vmax.f32 %v6133_v22, %v2064_v40  ;;  %v3111_v30 = vld [vmem:[#allocation4 + $0x2f0] sm:$0xff]  ;;  %v7375_v22 = vld [vmem:[#allocation70_spill] sm:$0xff] }
 0x24f   : > { %v2189_v15 = vadd.f32 %v2125_v0, %v7369_v55  ;;  %v7373_v11 = vmax.f32 %v7371_v26, %v7372_v7  ;;  %v2447_v0 = vmul.f32 %v2383_v21, %v2188_v33  ;;  %v2508_v61 = vadd.f32 %v2507_v47, %v2445_v50  ;;  %v2385_v2 = vld [vmem:[#allocation8 + $0x70] sm:$0xff]  ;;  %v7378_v50 = vld [vmem:[#allocation75_spill] sm:$0xff] }
 0x250   : > { %v1877_v12 = vadd.f32 %v5983_v23, %v7374_v29  ;;  %v1943_v60 = vmul.f32 %v3111_v30, %v7293_v39  ;;  %v6183_v38 = vadd.f32 %v1941_v25, %v1875_v59  ;;  %v2067_v28 = vmul.f32 0.2, %v6163_v63  ;;  %v7376_v40 = vld [vmem:[#allocation93_spill] sm:$0xff]  ;;  %v2386_v25 = vld [vmem:[#allocation8 + $0x78] sm:$0xff] }
 0x251   : > { %v2190_v36 = vadd.f32 %v2126_v24, %v7373_v11  ;;  %v2129_v43 = vmax.f32 %v6143_v44, %v2065_v41  ;;  %v7377_v31 = vmax.f32 %v7375_v22, %v7376_v40  ;;  %v2448_v24 = vmul.f32 %v2384_v53, %v2189_v15  ;;  %v3112_v23 = vld [vmem:[#allocation4 + $0x310] sm:$0xff]  ;;  %v7379_v44 = vld [vmem:[#allocation71_spill] sm:$0xff]  ;;  %v7380_v41 = vld [vmem:[#allocation94_spill] sm:$0xff] }
 0x252   : > { %v2509_v33 = vadd.f32 %v2508_v61, %v2446_v19  ;;  %v1878_v21 = vadd.f32 %v5994_v46, %v7378_v50  ;;  %v1944_v55 = vmul.f32 %v3112_v23, %v7293_v39  ;;  %v6193_v47 = vadd.f32 %v1942_v49, %v1876_v6  ;;  %v7382_v19 = vld [vmem:[#allocation80_spill] sm:$0xff]  ;;  %v3113_v46 = vld [vmem:[#allocation4 + $0x330] sm:$0xff]  ;;  %v2387_v49 = vld [vmem:[#allocation8 + $0x80] sm:$0xff] }
 0x253   : > { %v2191_v42 = vadd.f32 %v2127_v35, %v7377_v31  ;;  %v2068_v59 = vmul.f32 0.2, %v6173_v13  ;;  %v2130_v8 = vmax.f32 %v6153_v14, %v2066_v34  ;;  %v7381_v37 = vmax.f32 %v7379_v44, %v7380_v41  ;;  %v7383_v14 = vld [vmem:[#allocation72_spill] sm:$0xff]  ;;  %v7384_v34 = vld [vmem:[#allocation95_spill] sm:$0xff] }
 0x254   : > { %v2449_v35 = vmul.f32 %v2385_v2, %v2190_v36  ;;  %v2510_v15 = vadd.f32 %v2509_v33, %v2447_v0  ;;  %v1879_v53 = vadd.f32 %v5997_v27, %v7382_v19  ;;  %v1945_v7 = vmul.f32 %v3113_v46, %v7293_v39  ;;  %v7386_v0 = vld [vmem:[#allocation84_spill] sm:$0xff]  ;;  %v3114_v27 = vld [vmem:[#allocation4 + $0x350] sm:$0xff] }
 0x255   : > { %v2192_v26 = vadd.f32 %v2128_v52, %v7381_v37  ;;  %v6203_v11 = vadd.f32 %v1943_v60, %v1877_v12  ;;  %v2069_v6 = vmul.f32 0.2, %v6183_v38  ;;  %v2131_v61 = vmax.f32 %v6163_v63, %v2067_v28  ;;  %v2388_v60 = vld [vmem:[#allocation8 + $0x88] sm:$0xff]  ;;  %v7387_v63 = vld [vmem:[#allocation73_spill] sm:$0xff] }
 0x256   : > { %v7385_v29 = vmax.f32 %v7383_v14, %v7384_v34  ;;  %v2450_v52 = vmul.f32 %v2386_v25, %v2191_v42  ;;  %v2511_v36 = vadd.f32 %v2510_v15, %v2448_v24  ;;  %v1880_v2 = vadd.f32 %v6010_v32, %v7386_v0  ;;  %v7388_v28 = vld [vmem:[#allocation96_spill] sm:$0xff]  ;;  %v7390_v24 = vld [vmem:[#allocation169_spill] sm:$0xff] }
 0x257   : > { %v1946_v22 = vmul.f32 %v3114_v27, %v7293_v39  ;;  %v6213_v40 = vadd.f32 %v1944_v55, %v1878_v21  ;;  %v2070_v12 = vmul.f32 0.2, %v6193_v47  ;;  %v2132_v31 = vmax.f32 %v6173_v13, %v2068_v59  ;;  %v3115_v32 = vld [vmem:[#allocation4 + $0x370] sm:$0xff]  ;;  %v7391_v13 = vld [vmem:[#allocation74_spill] sm:$0xff] }
 0x258   : > { %v2193_v30 = vadd.f32 %v2129_v43, %v7385_v29  ;;  %v7389_v33 = vmax.f32 %v7387_v63, %v7388_v28  ;;  %v2451_v43 = vmul.f32 %v2387_v49, %v2192_v26  ;;  %v2512_v42 = vadd.f32 %v2511_v36, %v2449_v35  ;;  %v2389_v55 = vld [vmem:[#allocation8 + $0x90] sm:$0xff]  ;;  %v7394_v35 = vld [vmem:[#allocation170_spill] sm:$0xff]  ;;  %v7399_v63 = vld [vmem:[#allocation52_spill] sm:$0xff] }
 0x259   : > { %v1881_v23 = vadd.f32 %v6013_v48, %v7390_v24  ;;  %v1947_v25 = vmul.f32 %v3115_v32, %v7293_v39  ;;  %v6223_v44 = vadd.f32 %v1945_v7, %v1879_v53  ;;  %v2071_v21 = vmul.f32 0.2, %v6203_v11  ;;  %v7392_v59 = vld [vmem:[#allocation97_spill] sm:$0xff]  ;;  %v2390_v7 = vld [vmem:[#allocation8 + $0x98] sm:$0xff]  ;;  %v2392_v32 = vld [vmem:[#allocation8 + $0xa8] sm:$0xff] }
 0x25a   : > { %v2194_v50 = vadd.f32 %v2130_v8, %v7389_v33  ;;  %v2133_v41 = vmax.f32 %v6183_v38, %v2069_v6  ;;  %v7393_v37 = vmax.f32 %v7391_v13, %v7392_v59  ;;  %v2452_v8 = vmul.f32 %v2388_v60, %v2193_v30  ;;  %v3116_v48 = vld [vmem:[#allocation4 + $0x390] sm:$0xff]  ;;  %v7395_v38 = vld [vmem:[#allocation51_spill] sm:$0xff]  ;;  %v7396_v6 = vld [vmem:[#allocation98_spill] sm:$0xff] }
 0x25b   : > { %v2513_v26 = vadd.f32 %v2512_v42, %v2450_v52  ;;  %v1882_v19 = vadd.f32 %v6016_v4, %v7394_v35  ;;  %v1948_v46 = vmul.f32 %v3116_v48, %v7293_v39  ;;  %v6233_v49 = vadd.f32 %v1946_v22, %v1880_v2  ;;  %v7398_v52 = vld [vmem:[#allocation171_spill] sm:$0xff]  ;;  %v3117_v4 = vld [vmem:[#allocation4 + $0x3b0] sm:$0xff] }
 0x25c   : > { %v2195_v15 = vadd.f32 %v2131_v61, %v7393_v37  ;;  %v2072_v53 = vmul.f32 0.2, %v6213_v40  ;;  %v2134_v14 = vmax.f32 %v6193_v47, %v2070_v12  ;;  %v7397_v34 = vmax.f32 %v7395_v38, %v7396_v6  ;;  %v2391_v22 = vld [vmem:[#allocation8 + $0xa0] sm:$0xff]  ;;  %v3118_v42 = vld [vmem:[#allocation4 + $0x3d0] sm:$0xff]  ;;  %v7406_v37 = vld [vmem:[#allocation174_spill] sm:$0xff] }
 0x25d   : > { %v2453_v61 = vmul.f32 %v2389_v55, %v2194_v50  ;;  %v2514_v30 = vadd.f32 %v2513_v26, %v2451_v43  ;;  %v1883_v36 = vadd.f32 %v6026_v17, %v7398_v52  ;;  %v1949_v0 = vmul.f32 %v3117_v4, %v7293_v39  ;;  %v7400_v47 = vld [vmem:[#allocation99_spill] sm:$0xff]  ;;  %v7402_v50 = vld [vmem:[#allocation172_spill] sm:$0xff]  ;;  %v7403_v55 = vld [vmem:[#allocation53_spill] sm:$0xff] }
 0x25e   : > { %v2196_v29 = vadd.f32 %v2132_v31, %v7397_v34  ;;  %v2011_v27 = vadd.f32 %v1947_v25, %v1881_v23  ;;  %v2073_v2 = vmul.f32 0.2, %v6223_v44  ;;  %v2135_v60 = vmax.f32 %v6203_v11, %v2071_v21  ;;  %v7404_v11 = vld [vmem:[#allocation100_spill] sm:$0xff]  ;;  %v2394_v52 = vld [vmem:[#allocation8 + $0xb8] sm:$0xff]  ;;  %v7411_v4 = vld [vmem:[#allocation55_spill] sm:$0xff] }
 0x25f   : > { %v7401_v12 = vmax.f32 %v7399_v63, %v7400_v47  ;;  %v2454_v33 = vmul.f32 %v2390_v7, %v2195_v15  ;;  %v2515_v31 = vadd.f32 %v2514_v30, %v2452_v8  ;;  %v1884_v43 = vadd.f32 %v6042_v16, %v7402_v50  ;;  %v3119_v8 = vld [vmem:[#allocation4 + $0x3f0] sm:$0xff]  ;;  %v2395_v50 = vld [vmem:[#allocation8 + $0xc0] sm:$0xff] }
 0x260   : > { %v1950_v17 = vmul.f32 %v3118_v42, %v7293_v39  ;;  %v2012_v24 = vadd.f32 %v1948_v46, %v1882_v19  ;;  %v2074_v23 = vmul.f32 0.2, %v6233_v49  ;;  %v2136_v25 = vmax.f32 %v6213_v40, %v2072_v53  ;;  %v2393_v19 = vld [vmem:[#allocation8 + $0xb0] sm:$0xff]  ;;  %v7407_v46 = vld [vmem:[#allocation54_spill] sm:$0xff]  ;;  %v7418_v42 = vld [vmem:[#allocation103_spill] sm:$0xff] }
 0x261   : > { %v2197_v28 = vadd.f32 %v2133_v41, %v7401_v12  ;;  %v7405_v21 = vmax.f32 %v7403_v55, %v7404_v11  ;;  %v2455_v59 = vmul.f32 %v2391_v22, %v2196_v29  ;;  %v2516_v41 = vadd.f32 %v2515_v31, %v2453_v61  ;;  %v7408_v7 = vld [vmem:[#allocation101_spill] sm:$0xff]  ;;  %v7420_v55 = vld [vmem:[#allocation39_spill] sm:$0xff] }
 0x262   : > { %v1885_v15 = vadd.f32 %v6045_v57, %v7406_v37  ;;  %v1951_v16 = vmul.f32 %v3119_v8, %v7293_v39  ;;  %v2013_v26 = vadd.f32 %v1949_v0, %v1883_v36  ;;  %v2075_v35 = vmul.f32 0.2, %v2011_v27  ;;  %v3120_v29 = vld [vmem:[#allocation4 + $0x410] sm:$0xff]  ;;  %v7412_v0 = vld [vmem:[#allocation102_spill] sm:$0xff]  ;;  %v2396_v37 = vld [vmem:[#allocation8 + $0xc8] sm:$0xff] }
 0x263   : > { %v2198_v13 = vadd.f32 %v2134_v14, %v7405_v21  ;;  %v2137_v48 = vmax.f32 %v6223_v44, %v2073_v2  ;;  %v7409_v40 = vmax.f32 %v7407_v46, %v7408_v7  ;;  %v2456_v38 = vmul.f32 %v2392_v32, %v2197_v28  ;;  %v7410_v14 = vld [vmem:[#allocation175_spill] sm:$0xff]  ;;  %v7415_v12 = vld [vmem:[#allocation105_spill] sm:$0xff]  ;;  %v7422_v21 = vld [vmem:[#allocation22_spill] sm:$0xff] }
 0x264   : > { %v2517_v6 = vadd.f32 %v2516_v41, %v2454_v33  ;;  %v1886_v34 = vadd.f32 %v6068_v62, %v7410_v14  ;;  %v1952_v57 = vmul.f32 %v3120_v29, %v7293_v39  ;;  %v2014_v61 = vadd.f32 %v1950_v17, %v1884_v43  ;;  %v7416_v28 = vld [vmem:[#allocation37_spill] sm:$0xff]  ;;  %v7417_v43 = vld [vmem:[#allocation11_spill] sm:$0xff]  ;;  %v7426_v7 = vld [vmem:[#allocation40_spill] sm:$0xff] }
 0x265   : > { %v2199_v53 = vadd.f32 %v2135_v60, %v7409_v40  ;;  %v2076_v30 = vmul.f32 0.2, %v2012_v24  ;;  %v2138_v36 = vmax.f32 %v6233_v49, %v2074_v23  ;;  %v7413_v44 = vmax.f32 %v7411_v4, %v7412_v0  ;;  %v7414_v60 = vld [vmem:[#allocation38_spill] sm:$0xff] }
 0x266   : > { %v2457_v22 = vmul.f32 %v2393_v19, %v2198_v13  ;;  %v2518_v63 = vadd.f32 %v2517_v6, %v2455_v59  ;;  %v1363_v47 = vmul.f32 0.2, %v7414_v60  ;;  %v1425_v33 = vmax.f32 %v7416_v28, %v7415_v12  ;;  %v7423_v19 = vld [vmem:[#allocation36_spill] sm:$0xff]  ;;  %v2398_v4 = vld [vmem:[#allocation8 + $0xd8] sm:$0xff] }
 0x267   : > { %v2200_v2 = vadd.f32 %v2136_v25, %v7413_v44  ;;  %v2015_v62 = vadd.f32 %v1951_v16, %v1885_v15  ;;  %v2077_v31 = vmul.f32 0.2, %v2013_v26  ;;  %v2139_v39 = vmax.f32 %v2011_v27, %v2075_v35  ;;  %v7421_v25 = vld [vmem:[#allocation106_spill] sm:$0xff]  ;;  %v7424_v15 = vld [vmem:[#allocation104_spill] sm:$0xff] }
 0x268   : > { %v7419_v17 = vmax.f32 %v7417_v43, %v7418_v42  ;;  %v2458_v49 = vmul.f32 %v2394_v52, %v2199_v53  ;;  %v2519_v23 = vadd.f32 %v2518_v63, %v2456_v38  ;;  %v1364_v11 = vmul.f32 0.2, %v7420_v55  ;;  %v2397_v38 = vld [vmem:[#allocation8 + $0xd0] sm:$0xff]  ;;  %v2399_v63 = vld [vmem:[#allocation8 + $0xe0] sm:$0xff] }
 0x269   : > { %v1426_v13 = vmax.f32 %v7422_v21, %v7421_v25  ;;  %v2016_v59 = vadd.f32 %v1952_v57, %v1886_v34  ;;  %v2078_v41 = vmul.f32 0.2, %v2014_v61  ;;  %v2140_v8 = vmax.f32 %v2012_v24, %v2076_v30  ;;  %v7427_v34 = vld [vmem:[#allocation41_spill] sm:$0xff]  ;;  %v2403_v25 = vld [vmem:[#allocation8 + $0x100] sm:$0xff] }
 0x26a   : > { %v2201_v32 = vadd.f32 %v2137_v48, %v7419_v17  ;;  %v7425_v16 = vmax.f32 %v7423_v19, %v7424_v15  ;;  %v2459_v27 = vmul.f32 %v2395_v50, %v2200_v2  ;;  %v2520_v35 = vadd.f32 %v2519_v23, %v2457_v22  ;;  %v2401_v42 = vld [vmem:[#allocation8 + $0xf0] sm:$0xff]  ;;  %v2406_v15 = vld [vmem:[#allocation8 + $0x118] sm:$0xff] }
 0x26b   : > { %v1365_v40 = vmul.f32 0.2, %v7426_v7  ;;  %v1427_v48 = vmax.f32 %v7414_v60, %v1363_v47  ;;  %v2079_v53 = vmul.f32 0.2, %v2015_v62  ;;  %v2141_v6 = vmax.f32 %v2013_v26, %v2077_v31 }
 0x26c   : > { %v2202_v46 = vadd.f32 %v2138_v36, %v7425_v16  ;;  %v2203_v14 = vadd.f32 %v2139_v39, %v1425_v33  ;;  %v2460_v29 = vmul.f32 %v2396_v37, %v2201_v32  ;;  %v2521_v52 = vadd.f32 %v2520_v35, %v2458_v49  ;;  %v2400_v33 = vld [vmem:[#allocation8 + $0xe8] sm:$0xff]  ;;  %v2402_v49 = vld [vmem:[#allocation8 + $0xf8] sm:$0xff] }
 0x26d   : > { %v1366_v57 = vmul.f32 0.2, %v7427_v34  ;;  %v1428_v24 = vmax.f32 %v7420_v55, %v1364_v11  ;;  %v2080_v30 = vmul.f32 0.2, %v2016_v59  ;;  %v2142_v0 = vmax.f32 %v2014_v61, %v2078_v41 }
 0x26e   : > { %v2204_v36 = vadd.f32 %v2140_v8, %v1426_v13  ;;  %v2461_v44 = vmul.f32 %v2397_v38, %v2202_v46  ;;  %v2522_v2 = vadd.f32 %v2521_v52, %v2459_v27  ;;  %v1429_v22 = vmax.f32 %v7426_v7, %v1365_v40  ;;  %v2404_v13 = vld [vmem:[#allocation8 + $0x108] sm:$0xff]  ;;  %v2405_v8 = vld [vmem:[#allocation8 + $0x110] sm:$0xff]  ;;  %v2407_v27 = vld [vmem:[#allocation8 + $0x120] sm:$0xff] }
 0x26f   : > { %v2143_v60 = vmax.f32 %v2015_v62, %v2079_v53  ;;  %v2205_v47 = vadd.f32 %v2141_v6, %v1427_v48  ;;  %v2462_v12 = vmul.f32 %v2398_v4, %v2203_v14  ;;  %v1430_v28 = vmax.f32 %v7427_v34, %v1366_v57  ;;  %v2408_v40 = vld [vmem:[#allocation8 + $0x128] sm:$0xff]  ;;  %v2409_v38 = vld [vmem:[#allocation8 + $0x130] sm:$0xff]  ;;  %v2411_v34 = vld [vmem:[#allocation8 + $0x140] sm:$0xff] }
 0x270   : > { %v2523_v26 = vadd.f32 %v2522_v2, %v2460_v29  ;;  %v2144_v31 = vmax.f32 %v2016_v59, %v2080_v30  ;;  %v2206_v50 = vadd.f32 %v2142_v0, %v1428_v24  ;;  %v2463_v39 = vmul.f32 %v2399_v63, %v2204_v36  ;;  %v2410_v29 = vld [vmem:[#allocation8 + $0x138] sm:$0xff]  ;;  %v2412_v24 = vld [vmem:[#allocation8 + $0x148] sm:$0xff]  ;;  %v2413_v4 = vld [vmem:[#allocation8 + $0x150] sm:$0xff] }
 0x271   : > { %v2207_v17 = vadd.f32 %v2143_v60, %v1429_v22  ;;  %v2464_v61 = vmul.f32 %v2400_v33, %v2205_v47  ;;  %v2468_v59 = vmul.f32 %v2404_v13, %v5819_v58  ;;  %v2469_v16 = vmul.f32 %v2405_v8, %v5824_v1  ;;  %v2414_v36 = vld [vmem:[#allocation8 + $0x158] sm:$0xff]  ;;  %v2415_v2 = vld [vmem:[#allocation8 + $0x160] sm:$0xff]  ;;  %v2416_v63 = vld [vmem:[#allocation8 + $0x168] sm:$0xff] }
 0x272   : > { %v2524_v43 = vadd.f32 %v2523_v26, %v2461_v44  ;;  %v2208_v23 = vadd.f32 %v2144_v31, %v1430_v28  ;;  %v2465_v55 = vmul.f32 %v2401_v42, %v2206_v50  ;;  %v2470_v35 = vmul.f32 %v2406_v15, %v5829_v51  ;;  %v2417_v47 = vld [vmem:[#allocation8 + $0x170] sm:$0xff]  ;;  %v2418_v28 = vld [vmem:[#allocation8 + $0x178] sm:$0xff]  ;;  %v2419_v50 = vld [vmem:[#allocation8 + $0x180] sm:$0xff] }
 0x273   : > { %v2466_v62 = vmul.f32 %v2402_v49, %v2207_v17  ;;  %v2471_v48 = vmul.f32 %v2407_v27, %v5834_v10  ;;  %v2472_v6 = vmul.f32 %v2408_v40, %v5839_v9  ;;  %v2473_v58 = vmul.f32 %v2409_v38, %v5844_v3  ;;  %v7429_v33 = vld [vmem:[#allocation126_spill] sm:$0xff]  ;;  %v2420_v42 = vld [vmem:[#allocation8 + $0x188] sm:$0xff]  ;;  %v7437_v40 = vld [vmem:[#allocation131_spill] sm:$0xff] }
 0x274   : > { %v2525_v32 = vadd.f32 %v2524_v43, %v2462_v12  ;;  %v2467_v41 = vmul.f32 %v2403_v25, %v2208_v23  ;;  %v2474_v1 = vmul.f32 %v2410_v29, %v5849_v20  ;;  %v2475_v51 = vmul.f32 %v2411_v34, %v5854_v18  ;;  %v7428_v12 = vld [vmem:[#allocation125_spill] sm:$0xff]  ;;  %v7431_v17 = vld [vmem:[#allocation130_spill] sm:$0xff]  ;;  %v7432_v49 = vld [vmem:[#allocation132_spill] sm:$0xff] }
 0x275   : > { %v2476_v10 = vmul.f32 %v2412_v24, %v5859_v5  ;;  %v2477_v9 = vmul.f32 %v2413_v4, %v5864_v56  ;;  %v2478_v3 = vmul.f32 %v2414_v36, %v5869_v45  ;;  %v2479_v20 = vmul.f32 %v2415_v2, %v5874_v54  ;;  %v7434_v13 = vld [vmem:[#allocation180_spill] sm:$0xff]  ;;  %v2427_v38 = vld [vmem:[#allocation8 + $0x1c0] sm:$0xff]  ;;  %v2430_v4 = vld [vmem:[#allocation8 + $0x1d8] sm:$0xff] }
 0x276   : > { %v2526_v11 = vadd.f32 %v2525_v32, %v2463_v39  ;;  %v2480_v18 = vmul.f32 %v2416_v63, %v7428_v12  ;;  %v2481_v5 = vmul.f32 %v2417_v47, %v7429_v33  ;;  %v7430_v39 = vld [vmem:[#allocation129_spill] sm:$0xff]  ;;  %v2483_v45 = vmul.f32 %v2419_v50, %v7431_v17  ;;  %v2424_v8 = vld [vmem:[#allocation8 + $0x1a8] sm:$0xff]  ;;  %v7440_v24 = vld [vmem:[#allocation107_spill] sm:$0xff] }
 0x277   : > { %v2482_v56 = vmul.f32 %v2418_v28, %v7430_v39  ;;  %v2421_v32 = vld [vmem:[#allocation8 + $0x190] sm:$0xff]  ;;  %v2484_v54 = vmul.f32 %v2420_v42, %v7432_v49  ;;  %v7443_v63 = vld [vmem:[#allocation58_spill] sm:$0xff]  ;;  %v7445_v33 = vld [vmem:[#allocation59_spill] sm:$0xff] }
 0x278   : > { %v2527_v21 = vadd.f32 %v2526_v11, %v2464_v61  ;;  %v7433_v11 = vld [vmem:[#allocation133_spill] sm:$0xff]  ;;  %v2434_v28 = vld [vmem:[#allocation8 + $0x1f8] sm:$0xff] }
 0x279   : > { %v2485_v25 = vmul.f32 %v2421_v32, %v7433_v11  ;;  %v2433_v47 = vld [vmem:[#allocation8 + $0x1f0] sm:$0xff]  ;;  %v7446_v50 = vld [vmem:[#allocation110_spill] sm:$0xff] }
 0x27a   : > { %v2528_v37 = vadd.f32 %v2527_v21, %v2465_v55  ;;  %v2422_v55 = vld [vmem:[#allocation8 + $0x198] sm:$0xff]  ;;  %v2423_v21 = vld [vmem:[#allocation8 + $0x1a0] sm:$0xff]  ;;  %v7444_v12 = vld [vmem:[#allocation109_spill] sm:$0xff]  ;;  %v2498_v39 = vmul.f32 %v2434_v28, %v7446_v50 }
 0x27c   : > { %v2529_v19 = vadd.f32 %v2528_v37, %v2466_v62 }
 0x27e   : > { %v2530_v46 = vadd.f32 %v2529_v19, %v2467_v41  ;;  %v2486_v41 = vmul.f32 %v2422_v55, %v7434_v13 }
 0x280   : > { %v2531_v7 = vadd.f32 %v2530_v46, %v2468_v59  ;;  %v7435_v59 = vld [vmem:[#allocation127_spill] sm:$0xff]  ;;  %v7436_v46 = vld [vmem:[#allocation128_spill] sm:$0xff] }
 0x281   : > { %v2487_v19 = vmul.f32 %v2423_v21, %v7435_v59  ;;  %v2488_v27 = vmul.f32 %v2424_v8, %v7436_v46 }
 0x282   : > { %v2532_v53 = vadd.f32 %v2531_v7, %v2469_v16  ;;  %v2425_v16 = vld [vmem:[#allocation8 + $0x1b0] sm:$0xff]  ;;  %v2426_v7 = vld [vmem:[#allocation8 + $0x1b8] sm:$0xff] }
 0x284   : > { %v2533_v14 = vadd.f32 %v2532_v53, %v2470_v35 }
 0x286   : > { %v2534_v52 = vadd.f32 %v2533_v14, %v2471_v48  ;;  %v2489_v48 = vmul.f32 %v2425_v16, %v7437_v40 }
 0x288   : > { %v2535_v57 = vadd.f32 %v2534_v52, %v2472_v6  ;;  %v7438_v6 = vld [vmem:[#allocation134_spill] sm:$0xff]  ;;  %v7439_v52 = vld [vmem:[#allocation56_spill] sm:$0xff] }
 0x289   : > { %v2490_v14 = vmul.f32 %v2426_v7, %v7438_v6  ;;  %v2491_v34 = vmul.f32 %v2427_v38, %v7439_v52 }
 0x28a   : > { %v2536_v30 = vadd.f32 %v2535_v57, %v2473_v58  ;;  %v2428_v58 = vld [vmem:[#allocation8 + $0x1c8] sm:$0xff]  ;;  %v2429_v57 = vld [vmem:[#allocation8 + $0x1d0] sm:$0xff] }
 0x28c   : > { %v2537_v0 = vadd.f32 %v2536_v30, %v2474_v1 }
 0x28e   : > { %v2538_v44 = vadd.f32 %v2537_v0, %v2475_v51  ;;  %v2492_v51 = vmul.f32 %v2428_v58, %v7440_v24 }
 0x290   : > { %v2539_v22 = vadd.f32 %v2538_v44, %v2476_v10  ;;  %v7441_v10 = vld [vmem:[#allocation57_spill] sm:$0xff]  ;;  %v7442_v44 = vld [vmem:[#allocation108_spill] sm:$0xff] }
 0x291   : > { %v2493_v0 = vmul.f32 %v2429_v57, %v7441_v10  ;;  %v2494_v2 = vmul.f32 %v2430_v4, %v7442_v44 }
 0x292   : > { %v2540_v60 = vadd.f32 %v2539_v22, %v2477_v9  ;;  %v2431_v9 = vld [vmem:[#allocation8 + $0x1e0] sm:$0xff]  ;;  %v2432_v22 = vld [vmem:[#allocation8 + $0x1e8] sm:$0xff] }
 0x294   : > { %v2541_v26 = vadd.f32 %v2540_v60, %v2478_v3 }
 0x296   : > { %v2542_v31 = vadd.f32 %v2541_v26, %v2479_v20  ;;  %v2495_v20 = vmul.f32 %v2431_v9, %v7443_v63 }
 0x298   : > { %v2543_v43 = vadd.f32 %v2542_v31, %v2480_v18  ;;  %v2496_v18 = vmul.f32 %v2432_v22, %v7444_v12 }
 0x29a   : > { %v2544_v61 = vadd.f32 %v2543_v43, %v2481_v5  ;;  %v2497_v5 = vmul.f32 %v2433_v47, %v7445_v33 }
 0x29c   : > { %v2545_v23 = vadd.f32 %v2544_v61, %v2482_v56 }
 0x29e   : > { %v2546_v62 = vadd.f32 %v2545_v23, %v2483_v45 }
 0x2a0   : > { %v2547_v37 = vadd.f32 %v2546_v62, %v2484_v54 }
 0x2a2   : > { %v2548_v15 = vadd.f32 %v2547_v37, %v2485_v25 }
 0x2a4   : > { %v2549_v35 = vadd.f32 %v2548_v15, %v2486_v41 }
 0x2a6   : > { %v2550_v53 = vadd.f32 %v2549_v35, %v2487_v19 }
 0x2a8   : > { %v2551_v29 = vadd.f32 %v2550_v53, %v2488_v27 }
 0x2aa   : > { %v2552_v1 = vadd.f32 %v2551_v29, %v2489_v48 }
 0x2ac   : > { %v2553_v30 = vadd.f32 %v2552_v1, %v2490_v14 }
 0x2ae   : > { %v2554_v36 = vadd.f32 %v2553_v30, %v2491_v34 }
 0x2b0   : > { %v2555_v3 = vadd.f32 %v2554_v36, %v2492_v51 }
 0x2b2   : > { %v2556_v60 = vadd.f32 %v2555_v3, %v2493_v0 }
 0x2b4   : > { %v2557_v26 = vadd.f32 %v2556_v60, %v2494_v2 }
 0x2b6   : > { %v2558_v31 = vadd.f32 %v2557_v26, %v2495_v20 }
 0x2b8   : > { %v2559_v56 = vadd.f32 %v2558_v31, %v2496_v18 }
 0x2ba   : > { %v2560_v43 = vadd.f32 %v2559_v56, %v2497_v5 }
 0x2bc   : > { %v2561_v42 = vadd.f32 %v2560_v43, %v2498_v39 }
 0x2be   : > { %2562 = vadd.xlane.f32.xlu0 %v2561_v42 }
 0x331   : > { %v2563_v17 = vpop.xlane.xlu0 %2562 }
 0x332   : > { %v2564_v45 = vrot.slane %v2563_v17, 4 }
 0x334   : > { %v2565_v61 = vadd.f32 %v2564_v45, %v2563_v17 }
 0x336   : > { %v2566_v32 = vrot.slane %v2565_v61, 2 }
 0x338   : > { %v2567_v49 = vadd.f32 %v2566_v32, %v2565_v61 }
 0x33a   : > { %v2568_v54 = vrot.slane %v2567_v49, 1 }
 0x33c   : > { %v2569_v23 = vadd.f32 %v2568_v54, %v2567_v49 }
 0x33e   : > { %2724 = vpush %v2569_v23 }
 0x36f   : > { %s2725_s13 = spop %2724 }
 0x370   : > { %s2571_s14 = smul.f32 0.00390625, %s2725_s13 }
 0x372   : > { %s2573_s15 = sadd.f32 %s2572_s29, %s2571_s14 }
 0x374   : > { %s2574_s16 = sxor.u32 2147483648, %s2573_s15 }
 0x375   : > { %v2575_v55 = vstv %s2574_s16 }
 0x376   : > { %v2576_v11 = vmul.f32 1.442695, %v2575_v55 }
 0x378   : > { %2797 = vpow2.f32 %v2576_v11 }
 0x37e   : > { %v2798_v25 = vpop.eup %2797 }
 0x37f   : > { %2726 = vpush %v2798_v25 }
 0x3b0   : > { %s2727_s17 = spop %2726 }
 0x3b1   : > { %s2579_s18 = sadd.f32 1.0, %s2727_s17 }
 0x3b3   : > { %v2580_v62 = vstv %s2579_s18 }
 0x3b4   : > { %2799 = vrcp.f32 %v2580_v62  ;;  %v2592_v37 = vand.u32 2147483648, %v2580_v62  ;;  %v2590_v59 = vand.u32 2147483647, %v2580_v62  ;;  %vm2586_vm1 = vweird.f32 %v2580_v62 }
 0x3b6   : > { %v2593_v15 = vor.u32 1.1754944e-38, %v2592_v37  ;;  %vm2591_vm3 = vcmp.eq.f32.partialorder %v2590_v59, 8.507059e+37 }
 0x3ba   : > { %v2800_v21 = vpop.eup %2799 }
 0x3bb   : > { %v2582_v13 = vmul.f32 %v2800_v21, %v2580_v62  ;;  %vm2587_vm0 = vweird.f32 %v2800_v21 }
 0x3bc   : > { %vm2588_vm2 = vmor %vm2586_vm1, %vm2587_vm0 }
 0x3bd   : > { %v2583_v41 = vsub.f32 1.0, %v2582_v13 }
 0x3bf   : > { %v2584_v8 = vmul.f32 %v2800_v21, %v2583_v41 }
 0x3c1   : > { %v2585_v19 = vadd.f32 %v2800_v21, %v2584_v8 }
 0x3c3   : > { %v2589_v16 = vsel %vm2588_vm2, %v2800_v21, %v2585_v19 }
 0x3c4   : > { %v2594_v46 = vsel %vm2591_vm3, %v2593_v15, %v2589_v16 }
 0x3c5   : > { %2728 = vpush %v2594_v46 }
 0x3f6   : > { %s2729_s22 = spop %2728 }
 0x3f7   : > { %v2596_v27 = vstv %s2729_s22 }
 0x3f8   : > { %2598 = vst.msk [vmem:[%s359_s21] sm:$0x1] %vm2597_vm4, %v2596_v27 }
 0x3f9 PF: > { %s19_s25 = sadd.s32 1, %s3241_s25   ;;  %s7447_s23 = smov %s3237_s24 }
 0x3fa   : > { %p16_p8 = scmp.ge.s32.totalorder %s19_s25, 4   ;;  %s7448_s24 = smov %s7450_s10 }
 0x3fc   :  { %18 = sbr.rel (!%p16_p8) target bundleno = 5 (0x5), region = 98 }
 0x401   :  { %2616 = vsyncpa [#allocation5], 1 }
 0x402   :  { %2618 = vsyncpa [#allocation5 + $0x1], 1 }
 0x403   :  { %2619 = vsyncpa [#allocation7], 1 }

</bundles_post_ra>
